<compile_context>
chip_gen: v7x
topology: tpu7x:2x2x1
jax: 0.10.0
libtpu: 0.0.40
codegen_flags: <defaults>
</compile_context>

<pallas_src>
import functools

import jax
import jax.numpy as jnp
from jax.experimental import pallas as pl
from jax.experimental.pallas import tpu as pltpu


_CIN1_PAD = 16    # conv1's 3 input channels padded to one full bf16 sublane tile


# -----------------------------------------------------------------------------
# Conv2d(3x3, stride=2, padding=1) + ReLU
# -----------------------------------------------------------------------------
def _conv3x3_s2_p1_relu_kernel(xee_ref, xeo_ref, xoe_ref, xoo_ref,
                               w_ref, b_ref, o_ref, *, row_block):
    Ho, Cout, Wo = o_ref.shape
    w = w_ref[...]            # (Cout, 9*Cin)  bf16, columns ordered (kh, kw, cin)
    bias = b_ref[...]         # (Cout, 1)      f32
    # tap (kh, kw) reads padded pixel (2h+kh, 2w+kw):
    #   kh in {0,2} -> even-row parity grid (row h / h+1), kh==1 -> odd rows.
    gmat = ((xee_ref, xeo_ref), (xoe_ref, xoo_ref))
    rpar = (0, 1, 0)
    roff = (0, 0, 1)
    n_blocks = Ho // row_block

    def block_body(bi, carry):
        r0 = pl.multiple_of(bi * row_block, row_block)
        slabs = []
        for kh in range(3):
            ge = gmat[rpar[kh]][0][pl.ds(r0 + roff[kh], row_block), :, :]
            go = gmat[rpar[kh]][1][pl.ds(r0 + roff[kh], row_block), :, :]
            slabs.append(ge[:, :, 0:Wo])          # kw = 0  (even cols)
            slabs.append(go[:, :, 0:Wo])          # kw = 1  (odd cols)
            slabs.append(ge[:, :, 1:Wo + 1])      # kw = 2  (even cols, +1)
        # (row_block, 9*Cin, Wo): sublane-aligned concat (Cin is a multiple of 16)
        patches = jnp.concatenate(slabs, axis=1)
        for r in range(row_block):
            acc = jnp.dot(w, patches[r], preferred_element_type=jnp.float32)
            o_ref[r0 + r] = jnp.maximum(acc + bias, 0.0).astype(o_ref.dtype)
        return carry

    jax.lax.fori_loop(0, n_blocks, block_body, 0)


def _pick_row_block(ho, target=8):
    r = min(target, ho)
    while ho % r:
        r -= 1
    return r


def conv3x3_s2_p1_relu(x_nhcw, w_packed, b):
    """x_nhcw: (N, H, Cin, W) bf16, Cin a multiple of 16, H/W even.
    w_packed: (Cout, 9*Cin) bf16, columns ordered (kh, kw, cin).
    b: (Cout, 1) f32.  Returns (N, H//2, Cout, W//2) bf16."""
    N, H, Cin, W = x_nhcw.shape
    assert H % 2 == 0 and W % 2 == 0 and Cin % 16 == 0
    Ho, Wo = H // 2, W // 2
    Cout = w_packed.shape[0]

    # 4 stride-2 parity grids of the zero-padded image, each (N, Ho+1, Cin, Wo+1).
    # TODO(synk): emit the previous conv's output directly in this parity-grid
    # layout to avoid the XLA pad + strided-slice round trip between convs.
    xp = jnp.pad(x_nhcw, ((0, 0), (1, 1), (0, 0), (1, 1)))
    xee = xp[:, 0::2, :, 0::2]
    xeo = xp[:, 0::2, :, 1::2]
    xoe = xp[:, 1::2, :, 0::2]
    xoo = xp[:, 1::2, :, 1::2]
    Hq, Wq = Ho + 1, Wo + 1
    row_block = _pick_row_block(Ho)

    pg_spec = pl.BlockSpec((None, Hq, Cin, Wq), lambda n: (n, 0, 0, 0))
    return pl.pallas_call(
        functools.partial(_conv3x3_s2_p1_relu_kernel, row_block=row_block),
        out_shape=jax.ShapeDtypeStruct((N, Ho, Cout, Wo), jnp.bfloat16),
        grid=(N,),
        in_specs=[pg_spec, pg_spec, pg_spec, pg_spec,
                  pl.BlockSpec((Cout, 9 * Cin), lambda n: (0, 0)),
                  pl.BlockSpec((Cout, 1), lambda n: (0, 0))],
        out_specs=pl.BlockSpec((None, Ho, Cout, Wo), lambda n: (n, 0, 0, 0)),
        compiler_params=pltpu.CompilerParams(
            dimension_semantics=("parallel",)),      # batch across TCs on v7x
    )(xee, xeo, xoe, xoo, w_packed, b)


# -----------------------------------------------------------------------------
# fc1 (+ReLU) + both heads.  K-tiled, K-split streaming matmul + tiny epilogue.
# -----------------------------------------------------------------------------
def _fc1_partial_kernel(x_ref, w1_ref, o_ref):
    @pl.when(pl.program_id(1) == 0)
    def _():
        o_ref[...] = jnp.zeros_like(o_ref)
    o_ref[...] += jnp.dot(x_ref[...], w1_ref[...],
                          preferred_element_type=jnp.float32)


def _combine_heads_kernel(p_ref, b1_ref, wh_ref, bh_ref, o_ref):
    h = jnp.maximum(jnp.sum(p_ref[...], axis=0) + b1_ref[...], 0.0)   # fc1+ReLU
    out = jnp.dot(h.astype(wh_ref.dtype), wh_ref[...],
                  preferred_element_type=jnp.float32) + bh_ref[...]
    col = jax.lax.broadcasted_iota(jnp.int32, out.shape, 1)
    out = jnp.where(col == 0, jax.nn.sigmoid(out), out)      # sigmoid(cls col)
    o_ref[...] = out.astype(o_ref.dtype)


def _pick_k_tile(k_chunk, max_tile):
    """Largest multiple-of-128 divisor of k_chunk that is <= max_tile.
    k_chunk is always a multiple of 128, so this never falls back to K."""
    t = min(max_tile // 128, k_chunk // 128) * 128
    while t >= 128:
        if k_chunk % t == 0:
            return t
        t -= 128
    return 128


def fc1_heads(x, w1, b1, wh, bh, *, max_k_tile=25600, num_k_splits=2):
    """x: (M, K) bf16.  w1: (K, 128) bf16.  b1: (1, 128) f32.
    wh: (128, 2) bf16 (col 0 = classification, col 1 = regression). bh: (1,2) f32.
    Returns (M, 2) f32 with sigmoid already applied to column 0."""
    M, K = x.shape
    Kw, Nh = w1.shape
    assert K == Kw
    Nout = wh.shape[1]

    # Pad K to a multiple of 128 (never triggers for this model: K = 32*(H/4)*(W/4)).
    if K % 128 != 0:
        k_pad = (-K) % 128
        x = jnp.pad(x, ((0, 0), (0, k_pad)))
        w1 = jnp.pad(w1, ((0, k_pad), (0, 0)))
        K = K + k_pad

    splits = num_k_splits if K % (num_k_splits * 128) == 0 else 1
    k_chunk = K // splits
    tk = _pick_k_tile(k_chunk, max_k_tile)
    nk = k_chunk // tk

    # Scoped-VMEM bound: double-buffered w1/x tiles + resident f32 partial block.
    vmem_bytes = 2 * tk * Nh * 2 + 2 * M * tk * 2 + 2 * M * Nh * 4 + (2 << 20)
    vmem_bytes = max(int(vmem_bytes), 16 << 20)

    partial = pl.pallas_call(
        _fc1_partial_kernel,
        out_shape=jax.ShapeDtypeStruct((splits, M, Nh), jnp.float32),
        grid=(splits, nk),
        in_specs=[
            pl.BlockSpec((M, tk), lambda c, k: (0, c * nk + k)),
            pl.BlockSpec((tk, Nh), lambda c, k: (c * nk + k, 0)),
        ],
        out_specs=pl.BlockSpec((None, M, Nh), lambda c, k: (c, 0, 0)),
        compiler_params=pltpu.CompilerParams(
            dimension_semantics=("parallel", "arbitrary"),
            vmem_limit_bytes=vmem_bytes),
        cost_estimate=pl.CostEstimate(
            flops=2 * M * K * Nh,
            transcendentals=0,
            bytes_accessed=K * Nh * 2 + M * K * 2 + splits * M * Nh * 4),
    )(x, w1)

    return pl.pallas_call(
        _combine_heads_kernel,
        out_shape=jax.ShapeDtypeStruct((M, Nout), jnp.float32),
        grid=(1,),
        in_specs=[
            pl.BlockSpec((splits, M, Nh), lambda i: (0, 0, 0)),
            pl.BlockSpec((1, Nh), lambda i: (0, 0)),
            pl.BlockSpec((Nh, Nout), lambda i: (0, 0)),
            pl.BlockSpec((1, Nout), lambda i: (0, 0)),
        ],
        out_specs=pl.BlockSpec((M, Nout), lambda i: (0, 0)),
    )(partial, b1, wh, bh)


# -----------------------------------------------------------------------------
# Parameters (deterministic, PyTorch-default-style uniform bounds), stored in
# kernel-ready layouts.
# -----------------------------------------------------------------------------
def _pack_conv_w(w_oihw, cin_pad):
    """torch-layout (Cout, Cin, 3, 3) f32 -> (Cout, 9*cin_pad) bf16, columns
    ordered (kh, kw, cin) with the cin tail zero-padded."""
    cout, cin = w_oihw.shape[0], w_oihw.shape[1]
    w = jnp.transpose(w_oihw, (0, 2, 3, 1))                 # (Cout, kh, kw, Cin)
    w = jnp.pad(w, ((0, 0), (0, 0), (0, 0), (0, cin_pad - cin)))
    return w.reshape(cout, 9 * cin_pad).astype(jnp.bfloat16)


def init_params(key, in_h, in_w):
    h2, w2 = in_h // 4, in_w // 4
    flat = 32 * h2 * w2       # module spec: 32*60*80 for 3x240x320 inputs

    def unif(k, shape, fan_in):
        bound = 1.0 / jnp.sqrt(jnp.float32(fan_in))
        return jax.random.uniform(k, shape, jnp.float32, -bound, bound)

    ks = jax.random.split(key, 10)
    conv1_w = unif(ks[0], (16, 3, 3, 3), 3 * 9)             # torch OIHW layout
    conv2_w = unif(ks[2], (32, 16, 3, 3), 16 * 9)
    # fc1_w rows are ordered for the (H, C, W) flatten the conv kernels emit;
    # importing a torch checkpoint needs a one-time transpose + row permutation.
    fc1_w = unif(ks[4], (flat, 128), flat)
    cls_w = unif(ks[6], (128, 1), 128)
    reg_w = unif(ks[8], (128, 1), 128)
    return {
        "conv1_w": _pack_conv_w(conv1_w, _CIN1_PAD),
        "conv1_b": unif(ks[1], (16, 1), 3 * 9),
        "conv2_w": _pack_conv_w(conv2_w, 16),
        "conv2_b": unif(ks[3], (32, 1), 16 * 9),
        "fc1_w": fc1_w.astype(jnp.bfloat16),
        "fc1_b": unif(ks[5], (1, 128), flat),
        "head_w": jnp.concatenate([cls_w, reg_w], axis=1).astype(jnp.bfloat16),
        "head_b": jnp.concatenate(
            [unif(ks[7], (1, 1), 128), unif(ks[9], (1, 1), 128)], axis=1),
    }


def custom_cnn_forward(params, x_nchw):
    n, c = x_nchw.shape[0], x_nchw.shape[1]
    # NCHW -> (N, H, C, W): W on the lane axis for the whole conv path.
    x = jnp.transpose(x_nchw, (0, 2, 1, 3)).astype(jnp.bfloat16)
    x = jnp.pad(x, ((0, 0), (0, 0), (0, _CIN1_PAD - c), (0, 0)))
    x = conv3x3_s2_p1_relu(x, params["conv1_w"], params["conv1_b"])
    x = conv3x3_s2_p1_relu(x, params["conv2_w"], params["conv2_b"])
    xf = x.reshape(n, -1)       # (H, C, W)-order flatten; fc1_w rows match it
    out = fc1_heads(xf, params["fc1_w"], params["fc1_b"],
                    params["head_w"], params["head_b"])
    return out[:, 0:1], out[:, 1:2]


# -----------------------------------------------------------------------------
# Pure-JAX reference (no Pallas) with the same bf16/f32 dtype policy.
# -----------------------------------------------------------------------------
def _reference_forward(params, x_nchw):
    x = jnp.transpose(x_nchw, (0, 2, 3, 1)).astype(jnp.bfloat16)   # NHWC

    def conv(x_nhwc, w_packed, b, cin_pad):
        n, h, w, cin = x_nhwc.shape
        cout = w_packed.shape[0]
        ho, wo = h // 2, w // 2
        x_nhwc = jnp.pad(x_nhwc, ((0, 0), (0, 0), (0, 0), (0, cin_pad - cin)))
        w4 = w_packed.reshape(cout, 3, 3, cin_pad)
        xp = jnp.pad(x_nhwc, ((0, 0), (1, 1), (1, 1), (0, 0)))
        acc = jnp.zeros((n, ho, wo, cout), jnp.float32)
        for kh in range(3):
            for kw in range(3):
                patch = xp[:, kh:kh + 2 * ho:2, kw:kw + 2 * wo:2, :]
                acc = acc + jnp.einsum("nhwc,oc->nhwo", patch, w4[:, kh, kw, :],
                                       preferred_element_type=jnp.float32)
        return jnp.maximum(acc + b.reshape(1, 1, 1, cout), 0.0).astype(
            jnp.bfloat16)

    x = conv(x, params["conv1_w"], params["conv1_b"], _CIN1_PAD)
    x = conv(x, params["conv2_w"], params["conv2_b"], 16)
    xf = jnp.transpose(x, (0, 1, 3, 2)).reshape(x.shape[0], -1)   # (H, C, W)
    h = jnp.maximum(
        jnp.dot(xf, params["fc1_w"], preferred_element_type=jnp.float32)
        + params["fc1_b"], 0.0)
    out = jnp.dot(h.astype(jnp.bfloat16), params["head_w"],
                  preferred_element_type=jnp.float32) + params["head_b"]
    return jax.nn.sigmoid(out[:, 0:1]), out[:, 1:2]


if __name__ == "__main__":
    key = jax.random.PRNGKey(0)
    k_x, k_p = jax.random.split(key)
    # Small demo shape consistent with the module (the original uses 3x240x320):
    # 3x64x64 gives flat = 32*16*16 = 8192, so fc1 exercises the K-split/K-tiling.
    n, c, h, w = 2, 3, 64, 64
    x = jax.random.normal(k_x, (n, c, h, w), jnp.float32)
    params = init_params(k_p, h, w)

    fwd = jax.jit(custom_cnn_forward)
    out_cls, out_reg = fwd(params, x)
    jax.block_until_ready((out_cls, out_reg))

    assert out_cls.shape == (n, 1) and out_reg.shape == (n, 1)
    assert bool(jnp.all((out_cls >= 0.0) & (out_cls <= 1.0)))

    ref_cls, ref_reg = _reference_forward(params, x)
    assert float(jnp.max(jnp.abs(out_cls - ref_cls))) < 5e-3
    assert float(jnp.max(jnp.abs(out_reg - ref_reg))) < 5e-3

    print("KERNEL_OK")
</pallas_src>

<mosaic_0001>
module attributes {stable_mosaic.version = 11 : i64} {
  func.func @_conv3x3_s2_p1_relu_kernel(%arg0: i32, %arg1: memref<1x33x16x33xbf16, #tpu.memory_space<vmem>>, %arg2: memref<1x33x16x33xbf16, #tpu.memory_space<vmem>>, %arg3: memref<1x33x16x33xbf16, #tpu.memory_space<vmem>>, %arg4: memref<1x33x16x33xbf16, #tpu.memory_space<vmem>>, %arg5: memref<16x144xbf16, #tpu.memory_space<vmem>>, %arg6: memref<16x1xf32, #tpu.memory_space<vmem>>, %arg7: memref<1x32x16x32xbf16, #tpu.memory_space<vmem>>) attributes {dimension_semantics = [#tpu.dimension_semantics<parallel>], iteration_bounds = array<i64: 2>, scalar_prefetch = 0 : i64, scratch_operands = 0 : i64, tpu.core_type = #tpu.core_type<tc>, window_params = [{transform_indices = @transform_0, window_bounds = array<i64: 1, 33, 16, 33>}, {transform_indices = @transform_1, window_bounds = array<i64: 1, 33, 16, 33>}, {transform_indices = @transform_2, window_bounds = array<i64: 1, 33, 16, 33>}, {transform_indices = @transform_3, window_bounds = array<i64: 1, 33, 16, 33>}, {pipeline_mode = #tpu.pipeline_mode<synchronous>, transform_indices = @transform_4, window_bounds = array<i64: 16, 144>}, {pipeline_mode = #tpu.pipeline_mode<synchronous>, transform_indices = @transform_5, window_bounds = array<i64: 16, 1>}, {transform_indices = @transform_6, window_bounds = array<i64: 1, 32, 16, 32>}]} {
    %c0 = arith.constant 0 : index
    %c0_0 = arith.constant 0 : index
    %0 = vector.load %arg5[%c0, %c0_0] : memref<16x144xbf16, #tpu.memory_space<vmem>>, vector<16x144xbf16>
    %c0_1 = arith.constant 0 : index
    %c0_2 = arith.constant 0 : index
    %1 = vector.load %arg6[%c0_1, %c0_2] : memref<16x1xf32, #tpu.memory_space<vmem>>, vector<16x1xf32>
    %c0_i32 = arith.constant 0 : i32
    %c4_i32 = arith.constant 4 : i32
    %2 = arith.addi %c0_i32, %c4_i32 : i32
    %c1_i32 = arith.constant 1 : i32
    scf.for %arg8 = %c0_i32 to %2 step %c1_i32  : i32 {
      %c8_i32 = arith.constant 8 : i32
      %3 = arith.muli %arg8, %c8_i32 : i32
      %4 = tpu.assume_multiple %3, 8 : i32
      %c0_i32_4 = arith.constant 0 : i32
      %5 = arith.addi %4, %c0_i32_4 : i32
      %c0_5 = arith.constant 0 : index
      %6 = arith.index_cast %5 : i32 to index
      %c0_6 = arith.constant 0 : index
      %c0_7 = arith.constant 0 : index
      %7 = vector.load %arg1[%c0_5, %6, %c0_6, %c0_7] : memref<1x33x16x33xbf16, #tpu.memory_space<vmem>>, vector<1x8x16x33xbf16>
      %8 = vector.shape_cast %7 : vector<1x8x16x33xbf16> to vector<8x16x33xbf16>
      %c0_i32_8 = arith.constant 0 : i32
      %9 = arith.addi %4, %c0_i32_8 : i32
      %c0_9 = arith.constant 0 : index
      %10 = arith.index_cast %9 : i32 to index
      %c0_10 = arith.constant 0 : index
      %c0_11 = arith.constant 0 : index
      %11 = vector.load %arg2[%c0_9, %10, %c0_10, %c0_11] : memref<1x33x16x33xbf16, #tpu.memory_space<vmem>>, vector<1x8x16x33xbf16>
      %12 = vector.shape_cast %11 : vector<1x8x16x33xbf16> to vector<8x16x33xbf16>
      %13 = vector.extract_strided_slice %8 {offsets = [0, 0, 0], sizes = [8, 16, 32], strides = [1, 1, 1]} : vector<8x16x33xbf16> to vector<8x16x32xbf16>
      %14 = vector.extract_strided_slice %12 {offsets = [0, 0, 0], sizes = [8, 16, 32], strides = [1, 1, 1]} : vector<8x16x33xbf16> to vector<8x16x32xbf16>
      %15 = vector.extract_strided_slice %8 {offsets = [0, 0, 1], sizes = [8, 16, 32], strides = [1, 1, 1]} : vector<8x16x33xbf16> to vector<8x16x32xbf16>
      %c0_i32_12 = arith.constant 0 : i32
      %16 = arith.addi %4, %c0_i32_12 : i32
      %c0_13 = arith.constant 0 : index
      %17 = arith.index_cast %16 : i32 to index
      %c0_14 = arith.constant 0 : index
      %c0_15 = arith.constant 0 : index
      %18 = vector.load %arg3[%c0_13, %17, %c0_14, %c0_15] : memref<1x33x16x33xbf16, #tpu.memory_space<vmem>>, vector<1x8x16x33xbf16>
      %19 = vector.shape_cast %18 : vector<1x8x16x33xbf16> to vector<8x16x33xbf16>
      %c0_i32_16 = arith.constant 0 : i32
      %20 = arith.addi %4, %c0_i32_16 : i32
      %c0_17 = arith.constant 0 : index
      %21 = arith.index_cast %20 : i32 to index
      %c0_18 = arith.constant 0 : index
      %c0_19 = arith.constant 0 : index
      %22 = vector.load %arg4[%c0_17, %21, %c0_18, %c0_19] : memref<1x33x16x33xbf16, #tpu.memory_space<vmem>>, vector<1x8x16x33xbf16>
      %23 = vector.shape_cast %22 : vector<1x8x16x33xbf16> to vector<8x16x33xbf16>
      %24 = vector.extract_strided_slice %19 {offsets = [0, 0, 0], sizes = [8, 16, 32], strides = [1, 1, 1]} : vector<8x16x33xbf16> to vector<8x16x32xbf16>
      %25 = vector.extract_strided_slice %23 {offsets = [0, 0, 0], sizes = [8, 16, 32], strides = [1, 1, 1]} : vector<8x16x33xbf16> to vector<8x16x32xbf16>
      %26 = vector.extract_strided_slice %19 {offsets = [0, 0, 1], sizes = [8, 16, 32], strides = [1, 1, 1]} : vector<8x16x33xbf16> to vector<8x16x32xbf16>
      %c1_i32_20 = arith.constant 1 : i32
      %27 = arith.addi %4, %c1_i32_20 : i32
      %c0_21 = arith.constant 0 : index
      %28 = arith.index_cast %27 : i32 to index
      %c0_22 = arith.constant 0 : index
      %c0_23 = arith.constant 0 : index
      %29 = vector.load %arg1[%c0_21, %28, %c0_22, %c0_23] : memref<1x33x16x33xbf16, #tpu.memory_space<vmem>>, vector<1x8x16x33xbf16>
      %30 = vector.shape_cast %29 : vector<1x8x16x33xbf16> to vector<8x16x33xbf16>
      %c1_i32_24 = arith.constant 1 : i32
      %31 = arith.addi %4, %c1_i32_24 : i32
      %c0_25 = arith.constant 0 : index
      %32 = arith.index_cast %31 : i32 to index
      %c0_26 = arith.constant 0 : index
      %c0_27 = arith.constant 0 : index
      %33 = vector.load %arg2[%c0_25, %32, %c0_26, %c0_27] : memref<1x33x16x33xbf16, #tpu.memory_space<vmem>>, vector<1x8x16x33xbf16>
      %34 = vector.shape_cast %33 : vector<1x8x16x33xbf16> to vector<8x16x33xbf16>
      %35 = vector.extract_strided_slice %30 {offsets = [0, 0, 0], sizes = [8, 16, 32], strides = [1, 1, 1]} : vector<8x16x33xbf16> to vector<8x16x32xbf16>
      %36 = vector.extract_strided_slice %34 {offsets = [0, 0, 0], sizes = [8, 16, 32], strides = [1, 1, 1]} : vector<8x16x33xbf16> to vector<8x16x32xbf16>
      %37 = vector.extract_strided_slice %30 {offsets = [0, 0, 1], sizes = [8, 16, 32], strides = [1, 1, 1]} : vector<8x16x33xbf16> to vector<8x16x32xbf16>
      %38 = tpu.concatenate %13, %14, %15, %24, %25, %26, %35, %36, %37 in 1 : vector<8x16x32xbf16>, vector<8x16x32xbf16>, vector<8x16x32xbf16>, vector<8x16x32xbf16>, vector<8x16x32xbf16>, vector<8x16x32xbf16>, vector<8x16x32xbf16>, vector<8x16x32xbf16>, vector<8x16x32xbf16> -> vector<8x144x32xbf16>
      %39 = vector.extract_strided_slice %38 {offsets = [0, 0, 0], sizes = [1, 144, 32], strides = [1, 1, 1]} : vector<8x144x32xbf16> to vector<1x144x32xbf16>
      %40 = vector.shape_cast %39 : vector<1x144x32xbf16> to vector<144x32xbf16>
      %cst = arith.constant dense<0.000000e+00> : vector<16x32xf32>
      %41 = tpu.matmul %0, %40, %cst {dimension_numbers = #tpu.dot_dimension_numbers<[1], [0], [0], [1], [0, 0, 1, 1], [], []>} : vector<16x144xbf16>, vector<144x32xbf16>, vector<16x32xf32> -> vector<16x32xf32>
      %42 = vector.broadcast %1 : vector<16x1xf32> to vector<16x32xf32>
      %43 = arith.addf %41, %42 : vector<16x32xf32>
      %cst_28 = arith.constant 0.000000e+00 : f32
      %44 = vector.broadcast %cst_28 : f32 to vector<16x32xf32>
      %45 = arith.maximumf %43, %44 : vector<16x32xf32>
      %46 = arith.truncf %45 : vector<16x32xf32> to vector<16x32xbf16>
      %c0_i32_29 = arith.constant 0 : i32
      %47 = arith.addi %4, %c0_i32_29 : i32
      %c0_30 = arith.constant 0 : index
      %48 = arith.index_cast %47 : i32 to index
      %c0_31 = arith.constant 0 : index
      %c0_32 = arith.constant 0 : index
      %49 = vector.load %arg7[%c0_30, %48, %c0_31, %c0_32] : memref<1x32x16x32xbf16, #tpu.memory_space<vmem>>, vector<1x1x16x32xbf16>
      %50 = vector.shape_cast %49 : vector<1x1x16x32xbf16> to vector<16x32xbf16>
      %51 = vector.shape_cast %46 : vector<16x32xbf16> to vector<1x1x16x32xbf16>
      tpu.vector_store %arg7[%c0_30, %48, %c0_31, %c0_32], %51 {strides = array<i32>} : memref<1x32x16x32xbf16, #tpu.memory_space<vmem>>, vector<1x1x16x32xbf16>,
      %52 = vector.extract_strided_slice %38 {offsets = [1, 0, 0], sizes = [1, 144, 32], strides = [1, 1, 1]} : vector<8x144x32xbf16> to vector<1x144x32xbf16>
      %53 = vector.shape_cast %52 : vector<1x144x32xbf16> to vector<144x32xbf16>
      %cst_33 = arith.constant dense<0.000000e+00> : vector<16x32xf32>
      %54 = tpu.matmul %0, %53, %cst_33 {dimension_numbers = #tpu.dot_dimension_numbers<[1], [0], [0], [1], [0, 0, 1, 1], [], []>} : vector<16x144xbf16>, vector<144x32xbf16>, vector<16x32xf32> -> vector<16x32xf32>
      %55 = vector.broadcast %1 : vector<16x1xf32> to vector<16x32xf32>
      %56 = arith.addf %54, %55 : vector<16x32xf32>
      %cst_34 = arith.constant 0.000000e+00 : f32
      %57 = vector.broadcast %cst_34 : f32 to vector<16x32xf32>
      %58 = arith.maximumf %56, %57 : vector<16x32xf32>
      %59 = arith.truncf %58 : vector<16x32xf32> to vector<16x32xbf16>
      %c1_i32_35 = arith.constant 1 : i32
      %60 = arith.addi %4, %c1_i32_35 : i32
      %c0_36 = arith.constant 0 : index
      %61 = arith.index_cast %60 : i32 to index
      %c0_37 = arith.constant 0 : index
      %c0_38 = arith.constant 0 : index
      %62 = vector.load %arg7[%c0_36, %61, %c0_37, %c0_38] : memref<1x32x16x32xbf16, #tpu.memory_space<vmem>>, vector<1x1x16x32xbf16>
      %63 = vector.shape_cast %62 : vector<1x1x16x32xbf16> to vector<16x32xbf16>
      %64 = vector.shape_cast %59 : vector<16x32xbf16> to vector<1x1x16x32xbf16>
      tpu.vector_store %arg7[%c0_36, %61, %c0_37, %c0_38], %64 {strides = array<i32>} : memref<1x32x16x32xbf16, #tpu.memory_space<vmem>>, vector<1x1x16x32xbf16>,
      %65 = vector.extract_strided_slice %38 {offsets = [2, 0, 0], sizes = [1, 144, 32], strides = [1, 1, 1]} : vector<8x144x32xbf16> to vector<1x144x32xbf16>
      %66 = vector.shape_cast %65 : vector<1x144x32xbf16> to vector<144x32xbf16>
      %cst_39 = arith.constant dense<0.000000e+00> : vector<16x32xf32>
      %67 = tpu.matmul %0, %66, %cst_39 {dimension_numbers = #tpu.dot_dimension_numbers<[1], [0], [0], [1], [0, 0, 1, 1], [], []>} : vector<16x144xbf16>, vector<144x32xbf16>, vector<16x32xf32> -> vector<16x32xf32>
      %68 = vector.broadcast %1 : vector<16x1xf32> to vector<16x32xf32>
      %69 = arith.addf %67, %68 : vector<16x32xf32>
      %cst_40 = arith.constant 0.000000e+00 : f32
      %70 = vector.broadcast %cst_40 : f32 to vector<16x32xf32>
      %71 = arith.maximumf %69, %70 : vector<16x32xf32>
      %72 = arith.truncf %71 : vector<16x32xf32> to vector<16x32xbf16>
      %c2_i32 = arith.constant 2 : i32
      %73 = arith.addi %4, %c2_i32 : i32
      %c0_41 = arith.constant 0 : index
      %74 = arith.index_cast %73 : i32 to index
      %c0_42 = arith.constant 0 : index
      %c0_43 = arith.constant 0 : index
      %75 = vector.load %arg7[%c0_41, %74, %c0_42, %c0_43] : memref<1x32x16x32xbf16, #tpu.memory_space<vmem>>, vector<1x1x16x32xbf16>
      %76 = vector.shape_cast %75 : vector<1x1x16x32xbf16> to vector<16x32xbf16>
      %77 = vector.shape_cast %72 : vector<16x32xbf16> to vector<1x1x16x32xbf16>
      tpu.vector_store %arg7[%c0_41, %74, %c0_42, %c0_43], %77 {strides = array<i32>} : memref<1x32x16x32xbf16, #tpu.memory_space<vmem>>, vector<1x1x16x32xbf16>,
      %78 = vector.extract_strided_slice %38 {offsets = [3, 0, 0], sizes = [1, 144, 32], strides = [1, 1, 1]} : vector<8x144x32xbf16> to vector<1x144x32xbf16>
      %79 = vector.shape_cast %78 : vector<1x144x32xbf16> to vector<144x32xbf16>
      %cst_44 = arith.constant dense<0.000000e+00> : vector<16x32xf32>
      %80 = tpu.matmul %0, %79, %cst_44 {dimension_numbers = #tpu.dot_dimension_numbers<[1], [0], [0], [1], [0, 0, 1, 1], [], []>} : vector<16x144xbf16>, vector<144x32xbf16>, vector<16x32xf32> -> vector<16x32xf32>
      %81 = vector.broadcast %1 : vector<16x1xf32> to vector<16x32xf32>
      %82 = arith.addf %80, %81 : vector<16x32xf32>
      %cst_45 = arith.constant 0.000000e+00 : f32
      %83 = vector.broadcast %cst_45 : f32 to vector<16x32xf32>
      %84 = arith.maximumf %82, %83 : vector<16x32xf32>
      %85 = arith.truncf %84 : vector<16x32xf32> to vector<16x32xbf16>
      %c3_i32 = arith.constant 3 : i32
      %86 = arith.addi %4, %c3_i32 : i32
      %c0_46 = arith.constant 0 : index
      %87 = arith.index_cast %86 : i32 to index
      %c0_47 = arith.constant 0 : index
      %c0_48 = arith.constant 0 : index
      %88 = vector.load %arg7[%c0_46, %87, %c0_47, %c0_48] : memref<1x32x16x32xbf16, #tpu.memory_space<vmem>>, vector<1x1x16x32xbf16>
      %89 = vector.shape_cast %88 : vector<1x1x16x32xbf16> to vector<16x32xbf16>
      %90 = vector.shape_cast %85 : vector<16x32xbf16> to vector<1x1x16x32xbf16>
      tpu.vector_store %arg7[%c0_46, %87, %c0_47, %c0_48], %90 {strides = array<i32>} : memref<1x32x16x32xbf16, #tpu.memory_space<vmem>>, vector<1x1x16x32xbf16>,
      %91 = vector.extract_strided_slice %38 {offsets = [4, 0, 0], sizes = [1, 144, 32], strides = [1, 1, 1]} : vector<8x144x32xbf16> to vector<1x144x32xbf16>
      %92 = vector.shape_cast %91 : vector<1x144x32xbf16> to vector<144x32xbf16>
      %cst_49 = arith.constant dense<0.000000e+00> : vector<16x32xf32>
      %93 = tpu.matmul %0, %92, %cst_49 {dimension_numbers = #tpu.dot_dimension_numbers<[1], [0], [0], [1], [0, 0, 1, 1], [], []>} : vector<16x144xbf16>, vector<144x32xbf16>, vector<16x32xf32> -> vector<16x32xf32>
      %94 = vector.broadcast %1 : vector<16x1xf32> to vector<16x32xf32>
      %95 = arith.addf %93, %94 : vector<16x32xf32>
      %cst_50 = arith.constant 0.000000e+00 : f32
      %96 = vector.broadcast %cst_50 : f32 to vector<16x32xf32>
      %97 = arith.maximumf %95, %96 : vector<16x32xf32>
      %98 = arith.truncf %97 : vector<16x32xf32> to vector<16x32xbf16>
      %c4_i32_51 = arith.constant 4 : i32
      %99 = arith.addi %4, %c4_i32_51 : i32
      %c0_52 = arith.constant 0 : index
      %100 = arith.index_cast %99 : i32 to index
      %c0_53 = arith.constant 0 : index
      %c0_54 = arith.constant 0 : index
      %101 = vector.load %arg7[%c0_52, %100, %c0_53, %c0_54] : memref<1x32x16x32xbf16, #tpu.memory_space<vmem>>, vector<1x1x16x32xbf16>
      %102 = vector.shape_cast %101 : vector<1x1x16x32xbf16> to vector<16x32xbf16>
      %103 = vector.shape_cast %98 : vector<16x32xbf16> to vector<1x1x16x32xbf16>
      tpu.vector_store %arg7[%c0_52, %100, %c0_53, %c0_54], %103 {strides = array<i32>} : memref<1x32x16x32xbf16, #tpu.memory_space<vmem>>, vector<1x1x16x32xbf16>,
      %104 = vector.extract_strided_slice %38 {offsets = [5, 0, 0], sizes = [1, 144, 32], strides = [1, 1, 1]} : vector<8x144x32xbf16> to vector<1x144x32xbf16>
      %105 = vector.shape_cast %104 : vector<1x144x32xbf16> to vector<144x32xbf16>
      %cst_55 = arith.constant dense<0.000000e+00> : vector<16x32xf32>
      %106 = tpu.matmul %0, %105, %cst_55 {dimension_numbers = #tpu.dot_dimension_numbers<[1], [0], [0], [1], [0, 0, 1, 1], [], []>} : vector<16x144xbf16>, vector<144x32xbf16>, vector<16x32xf32> -> vector<16x32xf32>
      %107 = vector.broadcast %1 : vector<16x1xf32> to vector<16x32xf32>
      %108 = arith.addf %106, %107 : vector<16x32xf32>
      %cst_56 = arith.constant 0.000000e+00 : f32
      %109 = vector.broadcast %cst_56 : f32 to vector<16x32xf32>
      %110 = arith.maximumf %108, %109 : vector<16x32xf32>
      %111 = arith.truncf %110 : vector<16x32xf32> to vector<16x32xbf16>
      %c5_i32 = arith.constant 5 : i32
      %112 = arith.addi %4, %c5_i32 : i32
      %c0_57 = arith.constant 0 : index
      %113 = arith.index_cast %112 : i32 to index
      %c0_58 = arith.constant 0 : index
      %c0_59 = arith.constant 0 : index
      %114 = vector.load %arg7[%c0_57, %113, %c0_58, %c0_59] : memref<1x32x16x32xbf16, #tpu.memory_space<vmem>>, vector<1x1x16x32xbf16>
      %115 = vector.shape_cast %114 : vector<1x1x16x32xbf16> to vector<16x32xbf16>
      %116 = vector.shape_cast %111 : vector<16x32xbf16> to vector<1x1x16x32xbf16>
      tpu.vector_store %arg7[%c0_57, %113, %c0_58, %c0_59], %116 {strides = array<i32>} : memref<1x32x16x32xbf16, #tpu.memory_space<vmem>>, vector<1x1x16x32xbf16>,
      %117 = vector.extract_strided_slice %38 {offsets = [6, 0, 0], sizes = [1, 144, 32], strides = [1, 1, 1]} : vector<8x144x32xbf16> to vector<1x144x32xbf16>
      %118 = vector.shape_cast %117 : vector<1x144x32xbf16> to vector<144x32xbf16>
      %cst_60 = arith.constant dense<0.000000e+00> : vector<16x32xf32>
      %119 = tpu.matmul %0, %118, %cst_60 {dimension_numbers = #tpu.dot_dimension_numbers<[1], [0], [0], [1], [0, 0, 1, 1], [], []>} : vector<16x144xbf16>, vector<144x32xbf16>, vector<16x32xf32> -> vector<16x32xf32>
      %120 = vector.broadcast %1 : vector<16x1xf32> to vector<16x32xf32>
      %121 = arith.addf %119, %120 : vector<16x32xf32>
      %cst_61 = arith.constant 0.000000e+00 : f32
      %122 = vector.broadcast %cst_61 : f32 to vector<16x32xf32>
      %123 = arith.maximumf %121, %122 : vector<16x32xf32>
      %124 = arith.truncf %123 : vector<16x32xf32> to vector<16x32xbf16>
      %c6_i32 = arith.constant 6 : i32
      %125 = arith.addi %4, %c6_i32 : i32
      %c0_62 = arith.constant 0 : index
      %126 = arith.index_cast %125 : i32 to index
      %c0_63 = arith.constant 0 : index
      %c0_64 = arith.constant 0 : index
      %127 = vector.load %arg7[%c0_62, %126, %c0_63, %c0_64] : memref<1x32x16x32xbf16, #tpu.memory_space<vmem>>, vector<1x1x16x32xbf16>
      %128 = vector.shape_cast %127 : vector<1x1x16x32xbf16> to vector<16x32xbf16>
      %129 = vector.shape_cast %124 : vector<16x32xbf16> to vector<1x1x16x32xbf16>
      tpu.vector_store %arg7[%c0_62, %126, %c0_63, %c0_64], %129 {strides = array<i32>} : memref<1x32x16x32xbf16, #tpu.memory_space<vmem>>, vector<1x1x16x32xbf16>,
      %130 = vector.extract_strided_slice %38 {offsets = [7, 0, 0], sizes = [1, 144, 32], strides = [1, 1, 1]} : vector<8x144x32xbf16> to vector<1x144x32xbf16>
      %131 = vector.shape_cast %130 : vector<1x144x32xbf16> to vector<144x32xbf16>
      %cst_65 = arith.constant dense<0.000000e+00> : vector<16x32xf32>
      %132 = tpu.matmul %0, %131, %cst_65 {dimension_numbers = #tpu.dot_dimension_numbers<[1], [0], [0], [1], [0, 0, 1, 1], [], []>} : vector<16x144xbf16>, vector<144x32xbf16>, vector<16x32xf32> -> vector<16x32xf32>
      %133 = vector.broadcast %1 : vector<16x1xf32> to vector<16x32xf32>
      %134 = arith.addf %132, %133 : vector<16x32xf32>
      %cst_66 = arith.constant 0.000000e+00 : f32
      %135 = vector.broadcast %cst_66 : f32 to vector<16x32xf32>
      %136 = arith.maximumf %134, %135 : vector<16x32xf32>
      %137 = arith.truncf %136 : vector<16x32xf32> to vector<16x32xbf16>
      %c7_i32 = arith.constant 7 : i32
      %138 = arith.addi %4, %c7_i32 : i32
      %c0_67 = arith.constant 0 : index
      %139 = arith.index_cast %138 : i32 to index
      %c0_68 = arith.constant 0 : index
      %c0_69 = arith.constant 0 : index
      %140 = vector.load %arg7[%c0_67, %139, %c0_68, %c0_69] : memref<1x32x16x32xbf16, #tpu.memory_space<vmem>>, vector<1x1x16x32xbf16>
      %141 = vector.shape_cast %140 : vector<1x1x16x32xbf16> to vector<16x32xbf16>
      %142 = vector.shape_cast %137 : vector<16x32xbf16> to vector<1x1x16x32xbf16>
      tpu.vector_store %arg7[%c0_67, %139, %c0_68, %c0_69], %142 {strides = array<i32>} : memref<1x32x16x32xbf16, #tpu.memory_space<vmem>>, vector<1x1x16x32xbf16>,
    }
    %c4_i32_3 = arith.constant 4 : i32
    return
  }
  func.func @transform_0(%arg0: i32) -> (i32, i32, i32, i32) {
    %c0_i32 = arith.constant 0 : i32
    %c0_i32_0 = arith.constant 0 : i32
    %c0_i32_1 = arith.constant 0 : i32
    %c0_i32_2 = arith.constant 0 : i32
    return %arg0, %c0_i32, %c0_i32_0, %c0_i32_1 : i32, i32, i32, i32
  }
  func.func @transform_1(%arg0: i32) -> (i32, i32, i32, i32) {
    %c0_i32 = arith.constant 0 : i32
    %c0_i32_0 = arith.constant 0 : i32
    %c0_i32_1 = arith.constant 0 : i32
    %c0_i32_2 = arith.constant 0 : i32
    return %arg0, %c0_i32, %c0_i32_0, %c0_i32_1 : i32, i32, i32, i32
  }
  func.func @transform_2(%arg0: i32) -> (i32, i32, i32, i32) {
    %c0_i32 = arith.constant 0 : i32
    %c0_i32_0 = arith.constant 0 : i32
    %c0_i32_1 = arith.constant 0 : i32
    %c0_i32_2 = arith.constant 0 : i32
    return %arg0, %c0_i32, %c0_i32_0, %c0_i32_1 : i32, i32, i32, i32
  }
  func.func @transform_3(%arg0: i32) -> (i32, i32, i32, i32) {
    %c0_i32 = arith.constant 0 : i32
    %c0_i32_0 = arith.constant 0 : i32
    %c0_i32_1 = arith.constant 0 : i32
    %c0_i32_2 = arith.constant 0 : i32
    return %arg0, %c0_i32, %c0_i32_0, %c0_i32_1 : i32, i32, i32, i32
  }
  func.func @transform_4(%arg0: i32) -> (i32, i32) {
    %c0_i32 = arith.constant 0 : i32
    %c0_i32_0 = arith.constant 0 : i32
    %c0_i32_1 = arith.constant 0 : i32
    return %c0_i32, %c0_i32_0 : i32, i32
  }
  func.func @transform_5(%arg0: i32) -> (i32, i32) {
    %c0_i32 = arith.constant 0 : i32
    %c0_i32_0 = arith.constant 0 : i32
    %c0_i32_1 = arith.constant 0 : i32
    return %c0_i32, %c0_i32_0 : i32, i32
  }
  func.func @transform_6(%arg0: i32) -> (i32, i32, i32, i32) {
    %c0_i32 = arith.constant 0 : i32
    %c0_i32_0 = arith.constant 0 : i32
    %c0_i32_1 = arith.constant 0 : i32
    %c0_i32_2 = arith.constant 0 : i32
    return %arg0, %c0_i32, %c0_i32_0, %c0_i32_1 : i32, i32, i32, i32
  }
}

module attributes {stable_mosaic.version = 11 : i64} {
  func.func @_conv3x3_s2_p1_relu_kernel(%arg0: i32, %arg1: memref<1x17x16x17xbf16, #tpu.memory_space<vmem>>, %arg2: memref<1x17x16x17xbf16, #tpu.memory_space<vmem>>, %arg3: memref<1x17x16x17xbf16, #tpu.memory_space<vmem>>, %arg4: memref<1x17x16x17xbf16, #tpu.memory_space<vmem>>, %arg5: memref<32x144xbf16, #tpu.memory_space<vmem>>, %arg6: memref<32x1xf32, #tpu.memory_space<vmem>>, %arg7: memref<1x16x32x16xbf16, #tpu.memory_space<vmem>>) attributes {dimension_semantics = [#tpu.dimension_semantics<parallel>], iteration_bounds = array<i64: 2>, scalar_prefetch = 0 : i64, scratch_operands = 0 : i64, tpu.core_type = #tpu.core_type<tc>, window_params = [{transform_indices = @transform_0, window_bounds = array<i64: 1, 17, 16, 17>}, {transform_indices = @transform_1, window_bounds = array<i64: 1, 17, 16, 17>}, {transform_indices = @transform_2, window_bounds = array<i64: 1, 17, 16, 17>}, {transform_indices = @transform_3, window_bounds = array<i64: 1, 17, 16, 17>}, {pipeline_mode = #tpu.pipeline_mode<synchronous>, transform_indices = @transform_4, window_bounds = array<i64: 32, 144>}, {pipeline_mode = #tpu.pipeline_mode<synchronous>, transform_indices = @transform_5, window_bounds = array<i64: 32, 1>}, {transform_indices = @transform_6, window_bounds = array<i64: 1, 16, 32, 16>}]} {
    %c0 = arith.constant 0 : index
    %c0_0 = arith.constant 0 : index
    %0 = vector.load %arg5[%c0, %c0_0] : memref<32x144xbf16, #tpu.memory_space<vmem>>, vector<32x144xbf16>
    %c0_1 = arith.constant 0 : index
    %c0_2 = arith.constant 0 : index
    %1 = vector.load %arg6[%c0_1, %c0_2] : memref<32x1xf32, #tpu.memory_space<vmem>>, vector<32x1xf32>
    %c0_i32 = arith.constant 0 : i32
    %c2_i32 = arith.constant 2 : i32
    %2 = arith.addi %c0_i32, %c2_i32 : i32
    %c1_i32 = arith.constant 1 : i32
    scf.for %arg8 = %c0_i32 to %2 step %c1_i32  : i32 {
      %c8_i32 = arith.constant 8 : i32
      %3 = arith.muli %arg8, %c8_i32 : i32
      %4 = tpu.assume_multiple %3, 8 : i32
      %c0_i32_4 = arith.constant 0 : i32
      %5 = arith.addi %4, %c0_i32_4 : i32
      %c0_5 = arith.constant 0 : index
      %6 = arith.index_cast %5 : i32 to index
      %c0_6 = arith.constant 0 : index
      %c0_7 = arith.constant 0 : index
      %7 = vector.load %arg1[%c0_5, %6, %c0_6, %c0_7] : memref<1x17x16x17xbf16, #tpu.memory_space<vmem>>, vector<1x8x16x17xbf16>
      %8 = vector.shape_cast %7 : vector<1x8x16x17xbf16> to vector<8x16x17xbf16>
      %c0_i32_8 = arith.constant 0 : i32
      %9 = arith.addi %4, %c0_i32_8 : i32
      %c0_9 = arith.constant 0 : index
      %10 = arith.index_cast %9 : i32 to index
      %c0_10 = arith.constant 0 : index
      %c0_11 = arith.constant 0 : index
      %11 = vector.load %arg2[%c0_9, %10, %c0_10, %c0_11] : memref<1x17x16x17xbf16, #tpu.memory_space<vmem>>, vector<1x8x16x17xbf16>
      %12 = vector.shape_cast %11 : vector<1x8x16x17xbf16> to vector<8x16x17xbf16>
      %13 = vector.extract_strided_slice %8 {offsets = [0, 0, 0], sizes = [8, 16, 16], strides = [1, 1, 1]} : vector<8x16x17xbf16> to vector<8x16x16xbf16>
      %14 = vector.extract_strided_slice %12 {offsets = [0, 0, 0], sizes = [8, 16, 16], strides = [1, 1, 1]} : vector<8x16x17xbf16> to vector<8x16x16xbf16>
      %15 = vector.extract_strided_slice %8 {offsets = [0, 0, 1], sizes = [8, 16, 16], strides = [1, 1, 1]} : vector<8x16x17xbf16> to vector<8x16x16xbf16>
      %c0_i32_12 = arith.constant 0 : i32
      %16 = arith.addi %4, %c0_i32_12 : i32
      %c0_13 = arith.constant 0 : index
      %17 = arith.index_cast %16 : i32 to index
      %c0_14 = arith.constant 0 : index
      %c0_15 = arith.constant 0 : index
      %18 = vector.load %arg3[%c0_13, %17, %c0_14, %c0_15] : memref<1x17x16x17xbf16, #tpu.memory_space<vmem>>, vector<1x8x16x17xbf16>
      %19 = vector.shape_cast %18 : vector<1x8x16x17xbf16> to vector<8x16x17xbf16>
      %c0_i32_16 = arith.constant 0 : i32
      %20 = arith.addi %4, %c0_i32_16 : i32
      %c0_17 = arith.constant 0 : index
      %21 = arith.index_cast %20 : i32 to index
      %c0_18 = arith.constant 0 : index
      %c0_19 = arith.constant 0 : index
      %22 = vector.load %arg4[%c0_17, %21, %c0_18, %c0_19] : memref<1x17x16x17xbf16, #tpu.memory_space<vmem>>, vector<1x8x16x17xbf16>
      %23 = vector.shape_cast %22 : vector<1x8x16x17xbf16> to vector<8x16x17xbf16>
      %24 = vector.extract_strided_slice %19 {offsets = [0, 0, 0], sizes = [8, 16, 16], strides = [1, 1, 1]} : vector<8x16x17xbf16> to vector<8x16x16xbf16>
      %25 = vector.extract_strided_slice %23 {offsets = [0, 0, 0], sizes = [8, 16, 16], strides = [1, 1, 1]} : vector<8x16x17xbf16> to vector<8x16x16xbf16>
      %26 = vector.extract_strided_slice %19 {offsets = [0, 0, 1], sizes = [8, 16, 16], strides = [1, 1, 1]} : vector<8x16x17xbf16> to vector<8x16x16xbf16>
      %c1_i32_20 = arith.constant 1 : i32
      %27 = arith.addi %4, %c1_i32_20 : i32
      %c0_21 = arith.constant 0 : index
      %28 = arith.index_cast %27 : i32 to index
      %c0_22 = arith.constant 0 : index
      %c0_23 = arith.constant 0 : index
      %29 = vector.load %arg1[%c0_21, %28, %c0_22, %c0_23] : memref<1x17x16x17xbf16, #tpu.memory_space<vmem>>, vector<1x8x16x17xbf16>
      %30 = vector.shape_cast %29 : vector<1x8x16x17xbf16> to vector<8x16x17xbf16>
      %c1_i32_24 = arith.constant 1 : i32
      %31 = arith.addi %4, %c1_i32_24 : i32
      %c0_25 = arith.constant 0 : index
      %32 = arith.index_cast %31 : i32 to index
      %c0_26 = arith.constant 0 : index
      %c0_27 = arith.constant 0 : index
      %33 = vector.load %arg2[%c0_25, %32, %c0_26, %c0_27] : memref<1x17x16x17xbf16, #tpu.memory_space<vmem>>, vector<1x8x16x17xbf16>
      %34 = vector.shape_cast %33 : vector<1x8x16x17xbf16> to vector<8x16x17xbf16>
      %35 = vector.extract_strided_slice %30 {offsets = [0, 0, 0], sizes = [8, 16, 16], strides = [1, 1, 1]} : vector<8x16x17xbf16> to vector<8x16x16xbf16>
      %36 = vector.extract_strided_slice %34 {offsets = [0, 0, 0], sizes = [8, 16, 16], strides = [1, 1, 1]} : vector<8x16x17xbf16> to vector<8x16x16xbf16>
      %37 = vector.extract_strided_slice %30 {offsets = [0, 0, 1], sizes = [8, 16, 16], strides = [1, 1, 1]} : vector<8x16x17xbf16> to vector<8x16x16xbf16>
      %38 = tpu.concatenate %13, %14, %15, %24, %25, %26, %35, %36, %37 in 1 : vector<8x16x16xbf16>, vector<8x16x16xbf16>, vector<8x16x16xbf16>, vector<8x16x16xbf16>, vector<8x16x16xbf16>, vector<8x16x16xbf16>, vector<8x16x16xbf16>, vector<8x16x16xbf16>, vector<8x16x16xbf16> -> vector<8x144x16xbf16>
      %39 = vector.extract_strided_slice %38 {offsets = [0, 0, 0], sizes = [1, 144, 16], strides = [1, 1, 1]} : vector<8x144x16xbf16> to vector<1x144x16xbf16>
      %40 = vector.shape_cast %39 : vector<1x144x16xbf16> to vector<144x16xbf16>
      %cst = arith.constant dense<0.000000e+00> : vector<32x16xf32>
      %41 = tpu.matmul %0, %40, %cst {dimension_numbers = #tpu.dot_dimension_numbers<[1], [0], [0], [1], [0, 0, 1, 1], [], []>} : vector<32x144xbf16>, vector<144x16xbf16>, vector<32x16xf32> -> vector<32x16xf32>
      %42 = vector.broadcast %1 : vector<32x1xf32> to vector<32x16xf32>
      %43 = arith.addf %41, %42 : vector<32x16xf32>
      %cst_28 = arith.constant 0.000000e+00 : f32
      %44 = vector.broadcast %cst_28 : f32 to vector<32x16xf32>
      %45 = arith.maximumf %43, %44 : vector<32x16xf32>
      %46 = arith.truncf %45 : vector<32x16xf32> to vector<32x16xbf16>
      %c0_i32_29 = arith.constant 0 : i32
      %47 = arith.addi %4, %c0_i32_29 : i32
      %c0_30 = arith.constant 0 : index
      %48 = arith.index_cast %47 : i32 to index
      %c0_31 = arith.constant 0 : index
      %c0_32 = arith.constant 0 : index
      %49 = vector.load %arg7[%c0_30, %48, %c0_31, %c0_32] : memref<1x16x32x16xbf16, #tpu.memory_space<vmem>>, vector<1x1x32x16xbf16>
      %50 = vector.shape_cast %49 : vector<1x1x32x16xbf16> to vector<32x16xbf16>
      %51 = vector.shape_cast %46 : vector<32x16xbf16> to vector<1x1x32x16xbf16>
      tpu.vector_store %arg7[%c0_30, %48, %c0_31, %c0_32], %51 {strides = array<i32>} : memref<1x16x32x16xbf16, #tpu.memory_space<vmem>>, vector<1x1x32x16xbf16>,
      %52 = vector.extract_strided_slice %38 {offsets = [1, 0, 0], sizes = [1, 144, 16], strides = [1, 1, 1]} : vector<8x144x16xbf16> to vector<1x144x16xbf16>
      %53 = vector.shape_cast %52 : vector<1x144x16xbf16> to vector<144x16xbf16>
      %cst_33 = arith.constant dense<0.000000e+00> : vector<32x16xf32>
      %54 = tpu.matmul %0, %53, %cst_33 {dimension_numbers = #tpu.dot_dimension_numbers<[1], [0], [0], [1], [0, 0, 1, 1], [], []>} : vector<32x144xbf16>, vector<144x16xbf16>, vector<32x16xf32> -> vector<32x16xf32>
      %55 = vector.broadcast %1 : vector<32x1xf32> to vector<32x16xf32>
      %56 = arith.addf %54, %55 : vector<32x16xf32>
      %cst_34 = arith.constant 0.000000e+00 : f32
      %57 = vector.broadcast %cst_34 : f32 to vector<32x16xf32>
      %58 = arith.maximumf %56, %57 : vector<32x16xf32>
      %59 = arith.truncf %58 : vector<32x16xf32> to vector<32x16xbf16>
      %c1_i32_35 = arith.constant 1 : i32
      %60 = arith.addi %4, %c1_i32_35 : i32
      %c0_36 = arith.constant 0 : index
      %61 = arith.index_cast %60 : i32 to index
      %c0_37 = arith.constant 0 : index
      %c0_38 = arith.constant 0 : index
      %62 = vector.load %arg7[%c0_36, %61, %c0_37, %c0_38] : memref<1x16x32x16xbf16, #tpu.memory_space<vmem>>, vector<1x1x32x16xbf16>
      %63 = vector.shape_cast %62 : vector<1x1x32x16xbf16> to vector<32x16xbf16>
      %64 = vector.shape_cast %59 : vector<32x16xbf16> to vector<1x1x32x16xbf16>
      tpu.vector_store %arg7[%c0_36, %61, %c0_37, %c0_38], %64 {strides = array<i32>} : memref<1x16x32x16xbf16, #tpu.memory_space<vmem>>, vector<1x1x32x16xbf16>,
      %65 = vector.extract_strided_slice %38 {offsets = [2, 0, 0], sizes = [1, 144, 16], strides = [1, 1, 1]} : vector<8x144x16xbf16> to vector<1x144x16xbf16>
      %66 = vector.shape_cast %65 : vector<1x144x16xbf16> to vector<144x16xbf16>
      %cst_39 = arith.constant dense<0.000000e+00> : vector<32x16xf32>
      %67 = tpu.matmul %0, %66, %cst_39 {dimension_numbers = #tpu.dot_dimension_numbers<[1], [0], [0], [1], [0, 0, 1, 1], [], []>} : vector<32x144xbf16>, vector<144x16xbf16>, vector<32x16xf32> -> vector<32x16xf32>
      %68 = vector.broadcast %1 : vector<32x1xf32> to vector<32x16xf32>
      %69 = arith.addf %67, %68 : vector<32x16xf32>
      %cst_40 = arith.constant 0.000000e+00 : f32
      %70 = vector.broadcast %cst_40 : f32 to vector<32x16xf32>
      %71 = arith.maximumf %69, %70 : vector<32x16xf32>
      %72 = arith.truncf %71 : vector<32x16xf32> to vector<32x16xbf16>
      %c2_i32_41 = arith.constant 2 : i32
      %73 = arith.addi %4, %c2_i32_41 : i32
      %c0_42 = arith.constant 0 : index
      %74 = arith.index_cast %73 : i32 to index
      %c0_43 = arith.constant 0 : index
      %c0_44 = arith.constant 0 : index
      %75 = vector.load %arg7[%c0_42, %74, %c0_43, %c0_44] : memref<1x16x32x16xbf16, #tpu.memory_space<vmem>>, vector<1x1x32x16xbf16>
      %76 = vector.shape_cast %75 : vector<1x1x32x16xbf16> to vector<32x16xbf16>
      %77 = vector.shape_cast %72 : vector<32x16xbf16> to vector<1x1x32x16xbf16>
      tpu.vector_store %arg7[%c0_42, %74, %c0_43, %c0_44], %77 {strides = array<i32>} : memref<1x16x32x16xbf16, #tpu.memory_space<vmem>>, vector<1x1x32x16xbf16>,
      %78 = vector.extract_strided_slice %38 {offsets = [3, 0, 0], sizes = [1, 144, 16], strides = [1, 1, 1]} : vector<8x144x16xbf16> to vector<1x144x16xbf16>
      %79 = vector.shape_cast %78 : vector<1x144x16xbf16> to vector<144x16xbf16>
      %cst_45 = arith.constant dense<0.000000e+00> : vector<32x16xf32>
      %80 = tpu.matmul %0, %79, %cst_45 {dimension_numbers = #tpu.dot_dimension_numbers<[1], [0], [0], [1], [0, 0, 1, 1], [], []>} : vector<32x144xbf16>, vector<144x16xbf16>, vector<32x16xf32> -> vector<32x16xf32>
      %81 = vector.broadcast %1 : vector<32x1xf32> to vector<32x16xf32>
      %82 = arith.addf %80, %81 : vector<32x16xf32>
      %cst_46 = arith.constant 0.000000e+00 : f32
      %83 = vector.broadcast %cst_46 : f32 to vector<32x16xf32>
      %84 = arith.maximumf %82, %83 : vector<32x16xf32>
      %85 = arith.truncf %84 : vector<32x16xf32> to vector<32x16xbf16>
      %c3_i32 = arith.constant 3 : i32
      %86 = arith.addi %4, %c3_i32 : i32
      %c0_47 = arith.constant 0 : index
      %87 = arith.index_cast %86 : i32 to index
      %c0_48 = arith.constant 0 : index
      %c0_49 = arith.constant 0 : index
      %88 = vector.load %arg7[%c0_47, %87, %c0_48, %c0_49] : memref<1x16x32x16xbf16, #tpu.memory_space<vmem>>, vector<1x1x32x16xbf16>
      %89 = vector.shape_cast %88 : vector<1x1x32x16xbf16> to vector<32x16xbf16>
      %90 = vector.shape_cast %85 : vector<32x16xbf16> to vector<1x1x32x16xbf16>
      tpu.vector_store %arg7[%c0_47, %87, %c0_48, %c0_49], %90 {strides = array<i32>} : memref<1x16x32x16xbf16, #tpu.memory_space<vmem>>, vector<1x1x32x16xbf16>,
      %91 = vector.extract_strided_slice %38 {offsets = [4, 0, 0], sizes = [1, 144, 16], strides = [1, 1, 1]} : vector<8x144x16xbf16> to vector<1x144x16xbf16>
      %92 = vector.shape_cast %91 : vector<1x144x16xbf16> to vector<144x16xbf16>
      %cst_50 = arith.constant dense<0.000000e+00> : vector<32x16xf32>
      %93 = tpu.matmul %0, %92, %cst_50 {dimension_numbers = #tpu.dot_dimension_numbers<[1], [0], [0], [1], [0, 0, 1, 1], [], []>} : vector<32x144xbf16>, vector<144x16xbf16>, vector<32x16xf32> -> vector<32x16xf32>
      %94 = vector.broadcast %1 : vector<32x1xf32> to vector<32x16xf32>
      %95 = arith.addf %93, %94 : vector<32x16xf32>
      %cst_51 = arith.constant 0.000000e+00 : f32
      %96 = vector.broadcast %cst_51 : f32 to vector<32x16xf32>
      %97 = arith.maximumf %95, %96 : vector<32x16xf32>
      %98 = arith.truncf %97 : vector<32x16xf32> to vector<32x16xbf16>
      %c4_i32 = arith.constant 4 : i32
      %99 = arith.addi %4, %c4_i32 : i32
      %c0_52 = arith.constant 0 : index
      %100 = arith.index_cast %99 : i32 to index
      %c0_53 = arith.constant 0 : index
      %c0_54 = arith.constant 0 : index
      %101 = vector.load %arg7[%c0_52, %100, %c0_53, %c0_54] : memref<1x16x32x16xbf16, #tpu.memory_space<vmem>>, vector<1x1x32x16xbf16>
      %102 = vector.shape_cast %101 : vector<1x1x32x16xbf16> to vector<32x16xbf16>
      %103 = vector.shape_cast %98 : vector<32x16xbf16> to vector<1x1x32x16xbf16>
      tpu.vector_store %arg7[%c0_52, %100, %c0_53, %c0_54], %103 {strides = array<i32>} : memref<1x16x32x16xbf16, #tpu.memory_space<vmem>>, vector<1x1x32x16xbf16>,
      %104 = vector.extract_strided_slice %38 {offsets = [5, 0, 0], sizes = [1, 144, 16], strides = [1, 1, 1]} : vector<8x144x16xbf16> to vector<1x144x16xbf16>
      %105 = vector.shape_cast %104 : vector<1x144x16xbf16> to vector<144x16xbf16>
      %cst_55 = arith.constant dense<0.000000e+00> : vector<32x16xf32>
      %106 = tpu.matmul %0, %105, %cst_55 {dimension_numbers = #tpu.dot_dimension_numbers<[1], [0], [0], [1], [0, 0, 1, 1], [], []>} : vector<32x144xbf16>, vector<144x16xbf16>, vector<32x16xf32> -> vector<32x16xf32>
      %107 = vector.broadcast %1 : vector<32x1xf32> to vector<32x16xf32>
      %108 = arith.addf %106, %107 : vector<32x16xf32>
      %cst_56 = arith.constant 0.000000e+00 : f32
      %109 = vector.broadcast %cst_56 : f32 to vector<32x16xf32>
      %110 = arith.maximumf %108, %109 : vector<32x16xf32>
      %111 = arith.truncf %110 : vector<32x16xf32> to vector<32x16xbf16>
      %c5_i32 = arith.constant 5 : i32
      %112 = arith.addi %4, %c5_i32 : i32
      %c0_57 = arith.constant 0 : index
      %113 = arith.index_cast %112 : i32 to index
      %c0_58 = arith.constant 0 : index
      %c0_59 = arith.constant 0 : index
      %114 = vector.load %arg7[%c0_57, %113, %c0_58, %c0_59] : memref<1x16x32x16xbf16, #tpu.memory_space<vmem>>, vector<1x1x32x16xbf16>
      %115 = vector.shape_cast %114 : vector<1x1x32x16xbf16> to vector<32x16xbf16>
      %116 = vector.shape_cast %111 : vector<32x16xbf16> to vector<1x1x32x16xbf16>
      tpu.vector_store %arg7[%c0_57, %113, %c0_58, %c0_59], %116 {strides = array<i32>} : memref<1x16x32x16xbf16, #tpu.memory_space<vmem>>, vector<1x1x32x16xbf16>,
      %117 = vector.extract_strided_slice %38 {offsets = [6, 0, 0], sizes = [1, 144, 16], strides = [1, 1, 1]} : vector<8x144x16xbf16> to vector<1x144x16xbf16>
      %118 = vector.shape_cast %117 : vector<1x144x16xbf16> to vector<144x16xbf16>
      %cst_60 = arith.constant dense<0.000000e+00> : vector<32x16xf32>
      %119 = tpu.matmul %0, %118, %cst_60 {dimension_numbers = #tpu.dot_dimension_numbers<[1], [0], [0], [1], [0, 0, 1, 1], [], []>} : vector<32x144xbf16>, vector<144x16xbf16>, vector<32x16xf32> -> vector<32x16xf32>
      %120 = vector.broadcast %1 : vector<32x1xf32> to vector<32x16xf32>
      %121 = arith.addf %119, %120 : vector<32x16xf32>
      %cst_61 = arith.constant 0.000000e+00 : f32
      %122 = vector.broadcast %cst_61 : f32 to vector<32x16xf32>
      %123 = arith.maximumf %121, %122 : vector<32x16xf32>
      %124 = arith.truncf %123 : vector<32x16xf32> to vector<32x16xbf16>
      %c6_i32 = arith.constant 6 : i32
      %125 = arith.addi %4, %c6_i32 : i32
      %c0_62 = arith.constant 0 : index
      %126 = arith.index_cast %125 : i32 to index
      %c0_63 = arith.constant 0 : index
      %c0_64 = arith.constant 0 : index
      %127 = vector.load %arg7[%c0_62, %126, %c0_63, %c0_64] : memref<1x16x32x16xbf16, #tpu.memory_space<vmem>>, vector<1x1x32x16xbf16>
      %128 = vector.shape_cast %127 : vector<1x1x32x16xbf16> to vector<32x16xbf16>
      %129 = vector.shape_cast %124 : vector<32x16xbf16> to vector<1x1x32x16xbf16>
      tpu.vector_store %arg7[%c0_62, %126, %c0_63, %c0_64], %129 {strides = array<i32>} : memref<1x16x32x16xbf16, #tpu.memory_space<vmem>>, vector<1x1x32x16xbf16>,
      %130 = vector.extract_strided_slice %38 {offsets = [7, 0, 0], sizes = [1, 144, 16], strides = [1, 1, 1]} : vector<8x144x16xbf16> to vector<1x144x16xbf16>
      %131 = vector.shape_cast %130 : vector<1x144x16xbf16> to vector<144x16xbf16>
      %cst_65 = arith.constant dense<0.000000e+00> : vector<32x16xf32>
      %132 = tpu.matmul %0, %131, %cst_65 {dimension_numbers = #tpu.dot_dimension_numbers<[1], [0], [0], [1], [0, 0, 1, 1], [], []>} : vector<32x144xbf16>, vector<144x16xbf16>, vector<32x16xf32> -> vector<32x16xf32>
      %133 = vector.broadcast %1 : vector<32x1xf32> to vector<32x16xf32>
      %134 = arith.addf %132, %133 : vector<32x16xf32>
      %cst_66 = arith.constant 0.000000e+00 : f32
      %135 = vector.broadcast %cst_66 : f32 to vector<32x16xf32>
      %136 = arith.maximumf %134, %135 : vector<32x16xf32>
      %137 = arith.truncf %136 : vector<32x16xf32> to vector<32x16xbf16>
      %c7_i32 = arith.constant 7 : i32
      %138 = arith.addi %4, %c7_i32 : i32
      %c0_67 = arith.constant 0 : index
      %139 = arith.index_cast %138 : i32 to index
      %c0_68 = arith.constant 0 : index
      %c0_69 = arith.constant 0 : index
      %140 = vector.load %arg7[%c0_67, %139, %c0_68, %c0_69] : memref<1x16x32x16xbf16, #tpu.memory_space<vmem>>, vector<1x1x32x16xbf16>
      %141 = vector.shape_cast %140 : vector<1x1x32x16xbf16> to vector<32x16xbf16>
      %142 = vector.shape_cast %137 : vector<32x16xbf16> to vector<1x1x32x16xbf16>
      tpu.vector_store %arg7[%c0_67, %139, %c0_68, %c0_69], %142 {strides = array<i32>} : memref<1x16x32x16xbf16, #tpu.memory_space<vmem>>, vector<1x1x32x16xbf16>,
    }
    %c2_i32_3 = arith.constant 2 : i32
    return
  }
  func.func @transform_0(%arg0: i32) -> (i32, i32, i32, i32) {
    %c0_i32 = arith.constant 0 : i32
    %c0_i32_0 = arith.constant 0 : i32
    %c0_i32_1 = arith.constant 0 : i32
    %c0_i32_2 = arith.constant 0 : i32
    return %arg0, %c0_i32, %c0_i32_0, %c0_i32_1 : i32, i32, i32, i32
  }
  func.func @transform_1(%arg0: i32) -> (i32, i32, i32, i32) {
    %c0_i32 = arith.constant 0 : i32
    %c0_i32_0 = arith.constant 0 : i32
    %c0_i32_1 = arith.constant 0 : i32
    %c0_i32_2 = arith.constant 0 : i32
    return %arg0, %c0_i32, %c0_i32_0, %c0_i32_1 : i32, i32, i32, i32
  }
  func.func @transform_2(%arg0: i32) -> (i32, i32, i32, i32) {
    %c0_i32 = arith.constant 0 : i32
    %c0_i32_0 = arith.constant 0 : i32
    %c0_i32_1 = arith.constant 0 : i32
    %c0_i32_2 = arith.constant 0 : i32
    return %arg0, %c0_i32, %c0_i32_0, %c0_i32_1 : i32, i32, i32, i32
  }
  func.func @transform_3(%arg0: i32) -> (i32, i32, i32, i32) {
    %c0_i32 = arith.constant 0 : i32
    %c0_i32_0 = arith.constant 0 : i32
    %c0_i32_1 = arith.constant 0 : i32
    %c0_i32_2 = arith.constant 0 : i32
    return %arg0, %c0_i32, %c0_i32_0, %c0_i32_1 : i32, i32, i32, i32
  }
  func.func @transform_4(%arg0: i32) -> (i32, i32) {
    %c0_i32 = arith.constant 0 : i32
    %c0_i32_0 = arith.constant 0 : i32
    %c0_i32_1 = arith.constant 0 : i32
    return %c0_i32, %c0_i32_0 : i32, i32
  }
  func.func @transform_5(%arg0: i32) -> (i32, i32) {
    %c0_i32 = arith.constant 0 : i32
    %c0_i32_0 = arith.constant 0 : i32
    %c0_i32_1 = arith.constant 0 : i32
    return %c0_i32, %c0_i32_0 : i32, i32
  }
  func.func @transform_6(%arg0: i32) -> (i32, i32, i32, i32) {
    %c0_i32 = arith.constant 0 : i32
    %c0_i32_0 = arith.constant 0 : i32
    %c0_i32_1 = arith.constant 0 : i32
    %c0_i32_2 = arith.constant 0 : i32
    return %arg0, %c0_i32, %c0_i32_0, %c0_i32_1 : i32, i32, i32, i32
  }
}

module attributes {stable_mosaic.version = 11 : i64} {
  func.func @_fc1_partial_kernel(%arg0: i32, %arg1: i32, %arg2: memref<2x4096xbf16, #tpu.memory_space<vmem>>, %arg3: memref<4096x128xbf16, #tpu.memory_space<vmem>>, %arg4: memref<1x2x128xf32, #tpu.memory_space<vmem>>) attributes {dimension_semantics = [#tpu.dimension_semantics<parallel>, #tpu.dimension_semantics<arbitrary>], iteration_bounds = array<i64: 2, 1>, scalar_prefetch = 0 : i64, scratch_operands = 0 : i64, tpu.core_type = #tpu.core_type<tc>, window_params = [{transform_indices = @transform_0, window_bounds = array<i64: 2, 4096>}, {transform_indices = @transform_1, window_bounds = array<i64: 4096, 128>}, {transform_indices = @transform_2, window_bounds = array<i64: 1, 2, 128>}]} {
    %c0_i32 = arith.constant 0 : i32
    %0 = arith.cmpi eq, %arg1, %c0_i32 : i32
    %1 = arith.extui %0 : i1 to i32
    %c0_i32_0 = arith.constant 0 : i32
    %2 = arith.cmpi ne, %1, %c0_i32_0 : i32
    scf.if %2 {
      %cst_10 = arith.constant 0.000000e+00 : f32
      %12 = vector.broadcast %cst_10 : f32 to vector<2x128xf32>
      %c0_11 = arith.constant 0 : index
      %c0_12 = arith.constant 0 : index
      %c0_13 = arith.constant 0 : index
      %13 = vector.load %arg4[%c0_11, %c0_12, %c0_13] : memref<1x2x128xf32, #tpu.memory_space<vmem>>, vector<1x2x128xf32>
      %14 = vector.shape_cast %13 : vector<1x2x128xf32> to vector<2x128xf32>
      %15 = vector.shape_cast %12 : vector<2x128xf32> to vector<1x2x128xf32>
      tpu.vector_store %arg4[%c0_11, %c0_12, %c0_13], %15 {strides = array<i32>} : memref<1x2x128xf32, #tpu.memory_space<vmem>>, vector<1x2x128xf32>,
    } else {
    }
    %c0 = arith.constant 0 : index
    %c0_1 = arith.constant 0 : index
    %c0_2 = arith.constant 0 : index
    %3 = vector.load %arg4[%c0, %c0_1, %c0_2] : memref<1x2x128xf32, #tpu.memory_space<vmem>>, vector<1x2x128xf32>
    %4 = vector.shape_cast %3 : vector<1x2x128xf32> to vector<2x128xf32>
    %c0_3 = arith.constant 0 : index
    %c0_4 = arith.constant 0 : index
    %5 = vector.load %arg2[%c0_3, %c0_4] : memref<2x4096xbf16, #tpu.memory_space<vmem>>, vector<2x4096xbf16>
    %c0_5 = arith.constant 0 : index
    %c0_6 = arith.constant 0 : index
    %6 = vector.load %arg3[%c0_5, %c0_6] : memref<4096x128xbf16, #tpu.memory_space<vmem>>, vector<4096x128xbf16>
    %cst = arith.constant dense<0.000000e+00> : vector<2x128xf32>
    %7 = tpu.matmul %5, %6, %cst {dimension_numbers = #tpu.dot_dimension_numbers<[1], [0], [0], [1], [0, 0, 1, 1], [], []>} : vector<2x4096xbf16>, vector<4096x128xbf16>, vector<2x128xf32> -> vector<2x128xf32>
    %8 = arith.addf %4, %7 : vector<2x128xf32>
    %c0_7 = arith.constant 0 : index
    %c0_8 = arith.constant 0 : index
    %c0_9 = arith.constant 0 : index
    %9 = vector.load %arg4[%c0_7, %c0_8, %c0_9] : memref<1x2x128xf32, #tpu.memory_space<vmem>>, vector<1x2x128xf32>
    %10 = vector.shape_cast %9 : vector<1x2x128xf32> to vector<2x128xf32>
    %11 = vector.shape_cast %8 : vector<2x128xf32> to vector<1x2x128xf32>
    tpu.vector_store %arg4[%c0_7, %c0_8, %c0_9], %11 {strides = array<i32>} : memref<1x2x128xf32, #tpu.memory_space<vmem>>, vector<1x2x128xf32>,
    return
  }
  func.func @transform_0(%arg0: i32, %arg1: i32) -> (i32, i32) {
    %c1_i32 = arith.constant 1 : i32
    %0 = arith.muli %arg0, %c1_i32 : i32
    %1 = arith.addi %0, %arg1 : i32
    %c0_i32 = arith.constant 0 : i32
    %c0_i32_0 = arith.constant 0 : i32
    return %c0_i32, %1 : i32, i32
  }
  func.func @transform_1(%arg0: i32, %arg1: i32) -> (i32, i32) {
    %c1_i32 = arith.constant 1 : i32
    %0 = arith.muli %arg0, %c1_i32 : i32
    %1 = arith.addi %0, %arg1 : i32
    %c0_i32 = arith.constant 0 : i32
    %c0_i32_0 = arith.constant 0 : i32
    return %1, %c0_i32 : i32, i32
  }
  func.func @transform_2(%arg0: i32, %arg1: i32) -> (i32, i32, i32) {
    %c0_i32 = arith.constant 0 : i32
    %c0_i32_0 = arith.constant 0 : i32
    %c0_i32_1 = arith.constant 0 : i32
    return %arg0, %c0_i32, %c0_i32_0 : i32, i32, i32
  }
}

module attributes {stable_mosaic.version = 11 : i64} {
  func.func @_combine_heads_kernel(%arg0: i32, %arg1: memref<2x2x128xf32, #tpu.memory_space<vmem>>, %arg2: memref<1x128xf32, #tpu.memory_space<vmem>>, %arg3: memref<128x2xbf16, #tpu.memory_space<vmem>>, %arg4: memref<1x2xf32, #tpu.memory_space<vmem>>, %arg5: memref<2x2xf32, #tpu.memory_space<vmem>>) attributes {dimension_semantics = [#tpu.dimension_semantics<arbitrary>], iteration_bounds = array<i64: 1>, scalar_prefetch = 0 : i64, scratch_operands = 0 : i64, tpu.core_type = #tpu.core_type<tc>, window_params = [{pipeline_mode = #tpu.pipeline_mode<synchronous>, transform_indices = @transform_0, window_bounds = array<i64: 2, 2, 128>}, {pipeline_mode = #tpu.pipeline_mode<synchronous>, transform_indices = @transform_1, window_bounds = array<i64: 1, 128>}, {pipeline_mode = #tpu.pipeline_mode<synchronous>, transform_indices = @transform_2, window_bounds = array<i64: 128, 2>}, {pipeline_mode = #tpu.pipeline_mode<synchronous>, transform_indices = @transform_3, window_bounds = array<i64: 1, 2>}, {pipeline_mode = #tpu.pipeline_mode<synchronous>, transform_indices = @transform_4, window_bounds = array<i64: 2, 2>}]} {
    %c0 = arith.constant 0 : index
    %c0_0 = arith.constant 0 : index
    %c0_1 = arith.constant 0 : index
    %0 = vector.load %arg1[%c0, %c0_0, %c0_1] : memref<2x2x128xf32, #tpu.memory_space<vmem>>, vector<2x2x128xf32>
    %cst = arith.constant dense<0.000000e+00> : vector<2x128xf32>
    %1 = vector.multi_reduction <add>, %0, %cst [0] : vector<2x2x128xf32> to vector<2x128xf32>
    %c0_2 = arith.constant 0 : index
    %c0_3 = arith.constant 0 : index
    %2 = vector.load %arg2[%c0_2, %c0_3] : memref<1x128xf32, #tpu.memory_space<vmem>>, vector<1x128xf32>
    %3 = vector.broadcast %2 : vector<1x128xf32> to vector<2x128xf32>
    %4 = arith.addf %1, %3 : vector<2x128xf32>
    %cst_4 = arith.constant 0.000000e+00 : f32
    %5 = vector.broadcast %cst_4 : f32 to vector<2x128xf32>
    %6 = arith.maximumf %4, %5 : vector<2x128xf32>
    %7 = arith.truncf %6 : vector<2x128xf32> to vector<2x128xbf16>
    %c0_5 = arith.constant 0 : index
    %c0_6 = arith.constant 0 : index
    %8 = vector.load %arg3[%c0_5, %c0_6] : memref<128x2xbf16, #tpu.memory_space<vmem>>, vector<128x2xbf16>
    %cst_7 = arith.constant dense<0.000000e+00> : vector<2x2xf32>
    %9 = tpu.matmul %7, %8, %cst_7 {dimension_numbers = #tpu.dot_dimension_numbers<[1], [0], [0], [1], [0, 0, 1, 1], [], []>} : vector<2x128xbf16>, vector<128x2xbf16>, vector<2x2xf32> -> vector<2x2xf32>
    %c0_8 = arith.constant 0 : index
    %c0_9 = arith.constant 0 : index
    %10 = vector.load %arg4[%c0_8, %c0_9] : memref<1x2xf32, #tpu.memory_space<vmem>>, vector<1x2xf32>
    %11 = vector.broadcast %10 : vector<1x2xf32> to vector<2x2xf32>
    %12 = arith.addf %9, %11 : vector<2x2xf32>
    %13 = tpu.iota {dimensions = array<i32: 1>} : vector<2x2xi32>
    %c0_i32 = arith.constant 0 : i32
    %14 = vector.broadcast %c0_i32 : i32 to vector<2x2xi32>
    %15 = arith.cmpi eq, %13, %14 : vector<2x2xi32>
    %16 = arith.negf %12 : vector<2x2xf32>
    %17 = math.exp %16 : vector<2x2xf32>
    %cst_10 = arith.constant 1.000000e+00 : f32
    %18 = vector.broadcast %cst_10 : f32 to vector<2x2xf32>
    %19 = arith.addf %18, %17 : vector<2x2xf32>
    %20 = arith.divf %18, %19 : vector<2x2xf32>
    %21 = arith.select %15, %20, %12 : vector<2x2xi1>, vector<2x2xf32>
    %c0_11 = arith.constant 0 : index
    %c0_12 = arith.constant 0 : index
    %22 = vector.load %arg5[%c0_11, %c0_12] : memref<2x2xf32, #tpu.memory_space<vmem>>, vector<2x2xf32>
    tpu.vector_store %arg5[%c0_11, %c0_12], %21 {strides = array<i32>} : memref<2x2xf32, #tpu.memory_space<vmem>>, vector<2x2xf32>,
    return
  }
  func.func @transform_0(%arg0: i32) -> (i32, i32, i32) {
    %c0_i32 = arith.constant 0 : i32
    %c0_i32_0 = arith.constant 0 : i32
    %c0_i32_1 = arith.constant 0 : i32
    %c0_i32_2 = arith.constant 0 : i32
    return %c0_i32, %c0_i32_0, %c0_i32_1 : i32, i32, i32
  }
  func.func @transform_1(%arg0: i32) -> (i32, i32) {
    %c0_i32 = arith.constant 0 : i32
    %c0_i32_0 = arith.constant 0 : i32
    %c0_i32_1 = arith.constant 0 : i32
    return %c0_i32, %c0_i32_0 : i32, i32
  }
  func.func @transform_2(%arg0: i32) -> (i32, i32) {
    %c0_i32 = arith.constant 0 : i32
    %c0_i32_0 = arith.constant 0 : i32
    %c0_i32_1 = arith.constant 0 : i32
    return %c0_i32, %c0_i32_0 : i32, i32
  }
  func.func @transform_3(%arg0: i32) -> (i32, i32) {
    %c0_i32 = arith.constant 0 : i32
    %c0_i32_0 = arith.constant 0 : i32
    %c0_i32_1 = arith.constant 0 : i32
    return %c0_i32, %c0_i32_0 : i32, i32
  }
  func.func @transform_4(%arg0: i32) -> (i32, i32) {
    %c0_i32 = arith.constant 0 : i32
    %c0_i32_0 = arith.constant 0 : i32
    %c0_i32_1 = arith.constant 0 : i32
    return %c0_i32, %c0_i32_0 : i32, i32
  }
}

</mosaic_0001>

<bundles_post_ra>
// kernel: custom_cnn_forward.4
= control target key start
LH: loop header
LB: loop body
LE: loop exit
PB: predicated region body
PF: predicated region fallthrough
CT: control target
= control target key end

     0   :  { %s1725_s21 = smov 0   ;;  %s2146_s0 = inlined_call_operand.vmem [shape: bf16[2,33,16,33], index: 0, kind: input, shape index: {}]   ;;  %s2147_s1 = inlined_call_operand.vmem [shape: bf16[2,33,16,33], index: 1, kind: input, shape index: {}]   ;;  %s2148_s2 = inlined_call_operand.vmem [shape: bf16[2,33,16,33], index: 2, kind: input, shape index: {}]   ;;  %s2149_s3 = inlined_call_operand.vmem [shape: bf16[2,33,16,33], index: 3, kind: input, shape index: {}]   ;;  %s2150_s4 = inlined_call_operand.vmem [shape: bf16[16,144], index: 4, kind: input, shape index: {}]   ;;  %s2151_s5 = inlined_call_operand.vmem [shape: f32[16,1], index: 5, kind: input, shape index: {}]   ;;  %s2152_s6 = inlined_call_operand.vmem [shape: bf16[2,32,16,32], index: 6, kind: output, shape index: {}]  }
   0x1 LB: > { %s1413_s22 = sadd.s32 4294967295, %s1682_s21   ;;  %p1417_p0 = scmp.ge.s32.totalorder %s1682_s21, 1  ;;  %s1682_s21 = sphi %s1725_s21, %s16_s21  }
   0x2   : > { %p242_p1 = scmp.lt.s32.totalorder %s1682_s21, 3 }
   0x4   : > { %p243_p2 = pnand %p1417_p0, %p242_p1 }
   0x5   : > { %p287_p3 = scmp.lt.s32.totalorder (!%p243_p2), %s1413_s22, 1  ;;  %v1736_v0 = vld [vmem:[%s2150_s4] sm:$0xff] (!%p243_p2)  ;;  %v1741_v1 = vld [vmem:[%s2150_s4 + $0x8] sm:$0xff] (!%p243_p2)  ;;  %s1776_s25 = smov (!%p243_p2), 0  }
   0x6   : > { %246 = sbr.rel (%p243_p2) target bundleno = 496 (0x1f0), region = 44  ;;  %v1746_v2 = vld [vmem:[%s2151_s5] sm:$0xff] (!%p243_p2)  ;;  %v1751_v3 = vld [vmem:[%s2151_s5 + $0x8] sm:$0xff] (!%p243_p2) }
   0xd   : > { %s2154_s22 = smov (!%p287_p3, %s1413_s22), 1 }
   0xe   : > { %s1753_s7 = smul.u32 264, %s2154_s22  ;;  %s1571_s8 = sshll.u32 %s2154_s22, 8 }
   0xf   : > { %s1758_s11 = scalar_lea.vmem %s2152_s6, %s1571_s8 }
  0x10   : > { %s291_s14 = scalar_lea.vmem %s2146_s0, %s1753_s7  ;;  %s296_s17 = scalar_lea.vmem %s2147_s1, %s1753_s7 }
  0x11   : > { %s301_s20 = scalar_lea.vmem %s2148_s2, %s1753_s7  ;;  %s306_s22 = scalar_lea.vmem %s2149_s3, %s1753_s7 }
  0x12 LB: >> { %v1688_v4 = vmov 0   ;;  %s1784_s26 = sshll.u32 %s1686_s25, 6  ;;  %s1689_s10 = smov 127   ;;  %v1843_v14 = vcombine.high %v1736_v0, %v1741_v1  ;;  %vm814_vm0 = vcmask 130048   ;;  %v1971_v41 = vcombine.low %v1736_v0, %v1741_v1  ;;  %s1686_s25 = sphi %s1776_s25, %s322_s25  }
  0x13   : >> { %818 = vmatprep.subr.bf16.mxu0 %v1688_v4  ;;  %874 = vmatprep.subr.bf16.mxu1 %v1688_v4  ;;  %s1794_s29 = scalar_lea.vmem %s291_s14, %s1784_s26  ;;  %s1802_s9 = scalar_lea.vmem %s301_s20, %s1784_s26  ;;  %vm871_vm1 = vcmask 257024  }
  0x14   : >> { %1623 = vset.pattern.permute.xlu1 %v1688_v4  ;;  %1622 = vset.pattern.permute.xlu0 %v1688_v4  ;;  %v1624_v5 = vld [vmem:[%s1794_s29] sm:$0xff]   ;;  %v1625_v6 = vld [vmem:[%s1794_s29 + $0x8] sm:$0xff]   ;;  %v1824_v10 = vld [vmem:[%s1794_s29 + $0x10] sm:$0xff]   ;;  %s1856_s15 = scalar_lea.vmem %s296_s17, %s1784_s26  ;;  %s1886_s19 = scalar_lea.vmem %s306_s22, %s1784_s26 }
  0x15   : >> { %531 = vrot.lane.b32.xlu0 %v1624_v5, %s1689_s10  ;;  %v1808_v7 = vld [vmem:[%s1802_s9] sm:$0xff]   ;;  %819 = vmatpush1.bf16.msra.mxu0 %v1624_v5  ;;  %v1814_v8 = vld [vmem:[%s1802_s9 + $0x8] sm:$0xff]   ;;  %v1829_v11 = vld [vmem:[%s1794_s29 + $0x10] sm:$0xff]   ;;  %s2092_s23 = scalar_lea.vmem %s1758_s11, %s1784_s26  ;;  %s322_s25 = sadd.s32 1, %s1686_s25  }
  0x16   : >> { %820 = vmatprep.subr.bf16.mxu0 %v1688_v4  ;;  %875 = vmatpush1.bf16.msra.mxu1 %v1625_v6  ;;  %v1819_v9 = vld [vmem:[%s1794_s29 + $0x8] sm:$0xff]   ;;  %v1834_v12 = vld [vmem:[%s1794_s29 + $0x18] sm:$0xff]   ;;  %v1839_v13 = vld [vmem:[%s1802_s9 + $0x10] sm:$0xff]   ;;  %p319_p4 = scmp.ge.s32.totalorder %s322_s25, 4  }
  0x17   : >> { %651 = vrot.lane.b32.xlu1 %v1808_v7, %s1689_s10  ;;  %876 = vmatprep.subr.bf16.mxu1 %v1688_v4  ;;  %v1848_v15 = vld [vmem:[%s1802_s9 + $0x18] sm:$0xff]   ;;  %v1643_v17 = vld [vmem:[%s1856_s15] sm:$0xff]   ;;  %v1645_v19 = vld [vmem:[%s1856_s15 + $0x8] sm:$0xff]  }
  0x18   : >> { %1516 = vmatprep.mubr.msk.bf16.mxu0 %vm814_vm0, %v1843_v14  ;;  %1520 = vmatprep.mubr.msk.bf16.mxu1 %vm814_vm0, %v1843_v14  ;;  %v1865_v16 = vld [vmem:[%s1794_s29 + $0x18] sm:$0xff]   ;;  %v1871_v18 = vld [vmem:[%s1794_s29 + $0x20] sm:$0xff]   ;;  %v1891_v21 = vld [vmem:[%s1794_s29 + $0x28] sm:$0xff]  }
  0x19   : >> { %533 = vrot.lane.b32.xlu0 %v1625_v6, %s1689_s10  ;;  %821 = vmatpush1.bf16.msra.mxu0 %v1643_v17  ;;  %v1877_v20 = vld [vmem:[%s1794_s29 + $0x20] sm:$0xff]   ;;  %v1902_v23 = vld [vmem:[%s1802_s9 + $0x28] sm:$0xff]   ;;  %v1910_v25 = vld [vmem:[%s1794_s29 + $0x30] sm:$0xff]  }
  0x1a   : >> { %822 = vmatprep.subr.bf16.mxu0 %v1688_v4  ;;  %877 = vmatpush1.bf16.msra.mxu1 %v1645_v19  ;;  %v1897_v22 = vld [vmem:[%s1802_s9 + $0x20] sm:$0xff]   ;;  %v1907_v24 = vld [vmem:[%s1794_s29 + $0x28] sm:$0xff]   ;;  %v1915_v26 = vld [vmem:[%s1794_s29 + $0x30] sm:$0xff]  }
  0x1b   : >> { %653 = vrot.lane.b32.xlu1 %v1814_v8, %s1689_s10  ;;  %878 = vmatprep.subr.bf16.mxu1 %v1688_v4  ;;  %v1920_v27 = vld [vmem:[%s1794_s29 + $0x38] sm:$0xff]   ;;  %v1925_v28 = vld [vmem:[%s1802_s9 + $0x30] sm:$0xff]   ;;  %v1942_v31 = vld [vmem:[%s1794_s29 + $0x40] sm:$0xff]  }
  0x1c   : >> { %v1930_v29 = vld [vmem:[%s1802_s9 + $0x38] sm:$0xff]   ;;  %v1647_v34 = vld [vmem:[%s1886_s19] sm:$0xff]   ;;  %v1649_v36 = vld [vmem:[%s1886_s19 + $0x8] sm:$0xff]  }
  0x1d   : >> { %771 = vrot.lane.b32.xlu0 %v1819_v9, %s1689_s10  ;;  %v1935_v30 = vld [vmem:[%s1794_s29 + $0x38] sm:$0xff]   ;;  %v1652_v38 = vld [vmem:[%s1856_s15 + $0x8] sm:$0xff]   ;;  %v1653_v39 = vld [vmem:[%s1856_s15 + $0x10] sm:$0xff]  }
  0x1e   : >> { %v1654_v43 = vld [vmem:[%s1856_s15 + $0x10] sm:$0xff]   ;;  %v1655_v44 = vld [vmem:[%s1856_s15 + $0x18] sm:$0xff]   ;;  %v1659_v52 = vld [vmem:[%s1856_s15 + $0x20] sm:$0xff]  }
  0x1f   : >> { %773 = vrot.lane.b32.xlu1 %v1824_v10, %s1689_s10  ;;  %v1656_v47 = vld [vmem:[%s1886_s19 + $0x10] sm:$0xff]   ;;  %v1657_v48 = vld [vmem:[%s1886_s19 + $0x18] sm:$0xff]   ;;  %v1660_v55 = vld [vmem:[%s1856_s15 + $0x20] sm:$0xff]  }
  0x20   : >> { %v1658_v51 = vld [vmem:[%s1856_s15 + $0x18] sm:$0xff]   ;;  %v1661_v56 = vld [vmem:[%s1856_s15 + $0x28] sm:$0xff]   ;;  %v1662_v59 = vld [vmem:[%s1886_s19 + $0x20] sm:$0xff]  }
  0x21   : >> { %535 = vrot.lane.b32.xlu0 %v1829_v11, %s1689_s10  ;;  %v1663_v60 = vld [vmem:[%s1886_s19 + $0x28] sm:$0xff]   ;;  %v1665_v5 = vld [vmem:[%s1856_s15 + $0x30] sm:$0xff]   ;;  %v1671_v17 = vld [vmem:[%s1856_s15 + $0x40] sm:$0xff]  }
  0x22   : >> { %v1664_v63 = vld [vmem:[%s1856_s15 + $0x28] sm:$0xff]  }
  0x23   : >> { %537 = vrot.lane.b32.xlu1 %v1834_v12, %s1689_s10 }
  0x25   : >> { %655 = vrot.lane.b32.xlu0 %v1839_v13, %s1689_s10 }
  0x27   : >> { %657 = vrot.lane.b32.xlu1 %v1848_v15, %s1689_s10 }
  0x29   : >> { %775 = vrot.lane.b32.xlu0 %v1865_v16, %s1689_s10 }
  0x2b   : >> { %777 = vrot.lane.b32.xlu1 %v1871_v18, %s1689_s10 }
  0x2d   : >> { %539 = vrot.lane.b32.xlu0 %v1877_v20, %s1689_s10 }
  0x2f   : >> { %541 = vrot.lane.b32.xlu1 %v1891_v21, %s1689_s10 }
  0x31   : >> { %659 = vrot.lane.b32.xlu0 %v1897_v22, %s1689_s10 }
  0x33   : >> { %661 = vrot.lane.b32.xlu1 %v1902_v23, %s1689_s10 }
  0x35   : >> { %779 = vrot.lane.b32.xlu0 %v1907_v24, %s1689_s10 }
  0x37   : >> { %781 = vrot.lane.b32.xlu1 %v1910_v25, %s1689_s10 }
  0x39   : >> { %543 = vrot.lane.b32.xlu0 %v1915_v26, %s1689_s10 }
  0x3b   : >> { %545 = vrot.lane.b32.xlu1 %v1920_v27, %s1689_s10 }
  0x3d   : >> { %663 = vrot.lane.b32.xlu0 %v1925_v28, %s1689_s10 }
  0x3f   : >> { %665 = vrot.lane.b32.xlu1 %v1930_v29, %s1689_s10 }
  0x41   : >> { %783 = vrot.lane.b32.xlu0 %v1935_v30, %s1689_s10 }
  0x43   : >> { %785 = vrot.lane.b32.xlu1 %v1942_v31, %s1689_s10 }
  0x45   : >> { %797 = vperm.xlu0 %1622, %v1746_v2  }
  0x47   : >> { %802 = vperm.xlu1 %1623, %v1751_v3  }
  0x87   : >> { %v532_v32 = vpop.permute.xlu0 %531 }
  0x88   : >> { %823 = vmatpush1.bf16.msra.mxu0 %v532_v32 }
  0x89   : >> { %824 = vmatprep.subr.bf16.mxu0 %v1688_v4  ;;  %v652_v35 = vpop.permute.xlu1 %651 }
  0x8b   : >> { %v534_v33 = vpop.permute.xlu0 %533 }
  0x8c   : >> { %825 = vmatpush1.bf16.msra.mxu0 %v1808_v7  ;;  %879 = vmatpush1.bf16.msra.mxu1 %v534_v33 }
  0x8d   : >> { %826 = vmatprep.subr.bf16.mxu0 %v1688_v4  ;;  %880 = vmatprep.subr.bf16.mxu1 %v1688_v4  ;;  %v654_v37 = vpop.permute.xlu1 %653 }
  0x8f   : >> { %v772_v40 = vpop.permute.xlu0 %771 }
  0x90   : >> { %827 = vmatpush1.bf16.msra.mxu0 %v1647_v34  ;;  %881 = vmatpush1.bf16.msra.mxu1 %v1814_v8  ;;  %v1666_v8 = vld [vmem:[%s1856_s15 + $0x30] sm:$0xff]  }
  0x91   : >> { %828 = vmatprep.subr.bf16.mxu0 %v1688_v4  ;;  %882 = vmatprep.subr.bf16.mxu1 %v1688_v4  ;;  %v774_v42 = vpop.permute.xlu1 %773 }
  0x93   : >> { %v536_v45 = vpop.permute.xlu0 %535 }
  0x94   : >> { %829 = vmatpush1.bf16.msra.mxu0 %v652_v35  ;;  %883 = vmatpush1.bf16.msra.mxu1 %v1649_v36 }
  0x95   : >> { %884 = vmatprep.subr.bf16.mxu1 %v1688_v4  ;;  %830 = vmatprep.subr.bf16.mxu0 %v1688_v4  ;;  %v538_v46 = vpop.permute.xlu1 %537 }
  0x97   : >> { %v656_v49 = vpop.permute.xlu0 %655 }
  0x98   : >> { %885 = vmatpush1.bf16.msra.mxu1 %v654_v37  ;;  %831 = vmatpush1.bf16.msra.mxu0 %v1819_v9  ;;  %v1667_v9 = vld [vmem:[%s1856_s15 + $0x38] sm:$0xff]  }
  0x99   : >> { %886 = vmatprep.subr.bf16.mxu1 %v1688_v4  ;;  %832 = vmatprep.subr.bf16.mxu0 %v1688_v4  ;;  %v658_v50 = vpop.permute.xlu1 %657 }
  0x9b   : >> { %v776_v53 = vpop.permute.xlu0 %775 }
  0x9c   : >> { %887 = vmatpush1.bf16.msra.mxu1 %v1824_v10  ;;  %833 = vmatpush1.bf16.msra.mxu0 %v1652_v38 }
  0x9d   : >> { %888 = vmatprep.subr.bf16.mxu1 %v1688_v4  ;;  %834 = vmatprep.subr.bf16.mxu0 %v1688_v4  ;;  %v778_v54 = vpop.permute.xlu1 %777 }
  0x9f   : >> { %v540_v57 = vpop.permute.xlu0 %539 }
  0xa0   : >> { %889 = vmatpush1.bf16.msra.mxu1 %v1653_v39  ;;  %835 = vmatpush1.bf16.msra.mxu0 %v772_v40 }
  0xa1   : >> { %890 = vmatprep.subr.bf16.mxu1 %v1688_v4  ;;  %929 = vmatprep.subr.bf16.mxu0 %v1688_v4  ;;  %v542_v58 = vpop.permute.xlu1 %541 }
  0xa3   : >> { %851 = vmatmul.mubr.bf16.vlgmr.msra.gmra.mrb[0].mxu0 %v1971_v41  ;;  %v660_v61 = vpop.permute.xlu0 %659 }
  0xa4   : >> { %891 = vmatpush1.bf16.msra.mxu1 %v774_v42  ;;  %930 = vmatpush1.bf16.msra.mxu0 %v1829_v11 }
  0xa5   : >> { %986 = vmatprep.subr.bf16.mxu1 %v1688_v4  ;;  %931 = vmatprep.subr.bf16.mxu0 %v1688_v4  ;;  %v662_v62 = vpop.permute.xlu1 %661 }
  0xa6   : >> { %1527 = vmatprep.mubr.msk.bf16.mxu0 %vm814_vm0, %v1843_v14 }
  0xa7   : >> { %907 = vmatmul.mubr.bf16.vlgmr.msra.gmra.mrb[0].mxu1 %v1971_v41  ;;  %v780_v6 = vpop.permute.xlu0 %779 }
  0xa8   : >> { %987 = vmatpush1.bf16.msra.mxu1 %v1834_v12  ;;  %932 = vmatpush1.bf16.msra.mxu0 %v1654_v43  ;;  %v1668_v12 = vld [vmem:[%s1886_s19 + $0x30] sm:$0xff]  }
  0xa9   : >> { %988 = vmatprep.subr.bf16.mxu1 %v1688_v4  ;;  %933 = vmatprep.subr.bf16.mxu0 %v1688_v4  ;;  %v782_v7 = vpop.permute.xlu1 %781 }
  0xaa   : >> { %1534 = vmatprep.mubr.msk.bf16.mxu1 %vm814_vm0, %v1843_v14 }
  0xab   : >> { %v544_v10 = vpop.permute.xlu0 %543 }
  0xac   : >> { %989 = vmatpush1.bf16.msra.mxu1 %v1655_v44  ;;  %934 = vmatpush1.bf16.msra.mxu0 %v536_v45 }
  0xad   : >> { %990 = vmatprep.subr.bf16.mxu1 %v1688_v4  ;;  %935 = vmatprep.subr.bf16.mxu0 %v1688_v4  ;;  %v546_v11 = vpop.permute.xlu1 %545 }
  0xb0   : >> { %991 = vmatpush1.bf16.msra.mxu1 %v538_v46  ;;  %936 = vmatpush1.bf16.msra.mxu0 %v1839_v13  ;;  %v1669_v13 = vld [vmem:[%s1886_s19 + $0x38] sm:$0xff]  }
  0xb1   : >> { %992 = vmatprep.subr.bf16.mxu1 %v1688_v4  ;;  %937 = vmatprep.subr.bf16.mxu0 %v1688_v4 }
  0xb4   : >> { %993 = vmatpush1.bf16.msra.mxu1 %v1848_v15  ;;  %938 = vmatpush1.bf16.msra.mxu0 %v1656_v47  ;;  %v666_v15 = vpop.permute.xlu1 %665 }
  0xb5   : >> { %994 = vmatprep.subr.bf16.mxu1 %v1688_v4  ;;  %939 = vmatprep.subr.bf16.mxu0 %v1688_v4 }
  0xb8   : >> { %995 = vmatpush1.bf16.msra.mxu1 %v1657_v48  ;;  %940 = vmatpush1.bf16.msra.mxu0 %v656_v49  ;;  %v786_v19 = vpop.permute.xlu1 %785 }
  0xb9   : >> { %996 = vmatprep.subr.bf16.mxu1 %v1688_v4  ;;  %941 = vmatprep.subr.bf16.mxu0 %v1688_v4 }
  0xbc   : >> { %997 = vmatpush1.bf16.msra.mxu1 %v658_v50  ;;  %942 = vmatpush1.bf16.msra.mxu0 %v1865_v16  ;;  %v1670_v16 = vld [vmem:[%s1856_s15 + $0x38] sm:$0xff]  }
  0xbd   : >> { %998 = vmatprep.subr.bf16.mxu1 %v1688_v4  ;;  %943 = vmatprep.subr.bf16.mxu0 %v1688_v4 }
  0xc0   : >> { %999 = vmatpush1.bf16.msra.mxu1 %v1871_v18  ;;  %944 = vmatpush1.bf16.msra.mxu0 %v1658_v51 }
  0xc1   : >> { %1000 = vmatprep.subr.bf16.mxu1 %v1688_v4  ;;  %945 = vmatprep.subr.bf16.mxu0 %v1688_v4 }
  0xc4   : >> { %1001 = vmatpush1.bf16.msra.mxu1 %v1659_v52  ;;  %946 = vmatpush1.bf16.msra.mxu0 %v776_v53 }
  0xc5   : >> { %1002 = vmatprep.subr.bf16.mxu1 %v1688_v4  ;;  %1043 = vmatprep.subr.bf16.mxu0 %v1688_v4 }
  0xc7   : >> { %962 = vmatmul.mubr.bf16.vlgmr.msra.gmra.mrb[4].mxu0 %v1971_v41 }
  0xc8   : >> { %1003 = vmatpush1.bf16.msra.mxu1 %v778_v54  ;;  %1044 = vmatpush1.bf16.msra.mxu0 %v1877_v20 }
  0xc9   : >> { %1100 = vmatprep.subr.bf16.mxu1 %v1688_v4  ;;  %1045 = vmatprep.subr.bf16.mxu0 %v1688_v4 }
  0xca   : >> { %1541 = vmatprep.mubr.msk.bf16.mxu0 %vm814_vm0, %v1843_v14 }
  0xcb   : >> { %1019 = vmatmul.mubr.bf16.vlgmr.msra.gmra.mrb[4].mxu1 %v1971_v41 }
  0xcc   : >> { %1101 = vmatpush1.bf16.msra.mxu1 %v1891_v21  ;;  %1046 = vmatpush1.bf16.msra.mxu0 %v1660_v55 }
  0xcd   : >> { %1102 = vmatprep.subr.bf16.mxu1 %v1688_v4  ;;  %1047 = vmatprep.subr.bf16.mxu0 %v1688_v4 }
  0xce   : >> { %1548 = vmatprep.mubr.msk.bf16.mxu1 %vm814_vm0, %v1843_v14 }
  0xd0   : >> { %1103 = vmatpush1.bf16.msra.mxu1 %v1661_v56  ;;  %1048 = vmatpush1.bf16.msra.mxu0 %v540_v57 }
  0xd1   : >> { %1104 = vmatprep.subr.bf16.mxu1 %v1688_v4  ;;  %1049 = vmatprep.subr.bf16.mxu0 %v1688_v4 }
  0xd4   : >> { %1105 = vmatpush1.bf16.msra.mxu1 %v542_v58  ;;  %1050 = vmatpush1.bf16.msra.mxu0 %v1897_v22  ;;  %v2086_v22 = vpop.permute.xlu1 %802 }
  0xd5   : >> { %1106 = vmatprep.subr.bf16.mxu1 %v1688_v4  ;;  %1051 = vmatprep.subr.bf16.mxu0 %v1688_v4 }
  0xd8   : >> { %1107 = vmatpush1.bf16.msra.mxu1 %v1902_v23  ;;  %1052 = vmatpush1.bf16.msra.mxu0 %v1662_v59 }
  0xd9   : >> { %1108 = vmatprep.subr.bf16.mxu1 %v1688_v4  ;;  %1053 = vmatprep.subr.bf16.mxu0 %v1688_v4 }
  0xdc   : >> { %1109 = vmatpush1.bf16.msra.mxu1 %v1663_v60  ;;  %1054 = vmatpush1.bf16.msra.mxu0 %v660_v61 }
  0xdd   : >> { %1110 = vmatprep.subr.bf16.mxu1 %v1688_v4  ;;  %1055 = vmatprep.subr.bf16.mxu0 %v1688_v4 }
  0xe0   : >> { %1111 = vmatpush1.bf16.msra.mxu1 %v662_v62  ;;  %1056 = vmatpush1.bf16.msra.mxu0 %v1907_v24 }
  0xe1   : >> { %1112 = vmatprep.subr.bf16.mxu1 %v1688_v4  ;;  %1057 = vmatprep.subr.bf16.mxu0 %v1688_v4 }
  0xe4   : >> { %1113 = vmatpush1.bf16.msra.mxu1 %v1910_v25  ;;  %1058 = vmatpush1.bf16.msra.mxu0 %v1664_v63 }
  0xe5   : >> { %1114 = vmatprep.subr.bf16.mxu1 %v1688_v4  ;;  %1059 = vmatprep.subr.bf16.mxu0 %v1688_v4 }
  0xe8   : >> { %1115 = vmatpush1.bf16.msra.mxu1 %v1665_v5  ;;  %1060 = vmatpush1.bf16.msra.mxu0 %v780_v6 }
  0xe9   : >> { %1116 = vmatprep.subr.bf16.mxu1 %v1688_v4  ;;  %1157 = vmatprep.subr.bf16.mxu0 %v1688_v4 }
  0xeb   : >> { %1076 = vmatmul.mubr.bf16.vlgmr.msra.gmra.mrb[8].mxu0 %v1971_v41 }
  0xec   : >> { %1117 = vmatpush1.bf16.msra.mxu1 %v782_v7  ;;  %1158 = vmatpush1.bf16.msra.mxu0 %v1915_v26 }
  0xed   : >> { %1214 = vmatprep.subr.bf16.mxu1 %v1688_v4  ;;  %1159 = vmatprep.subr.bf16.mxu0 %v1688_v4 }
  0xee   : >> { %1555 = vmatprep.mubr.msk.bf16.mxu0 %vm814_vm0, %v1843_v14 }
  0xef   : >> { %1133 = vmatmul.mubr.bf16.vlgmr.msra.gmra.mrb[8].mxu1 %v1971_v41 }
  0xf0   : >> { %1215 = vmatpush1.bf16.msra.mxu1 %v1920_v27  ;;  %1160 = vmatpush1.bf16.msra.mxu0 %v1666_v8 }
  0xf1   : >> { %1216 = vmatprep.subr.bf16.mxu1 %v1688_v4  ;;  %1161 = vmatprep.subr.bf16.mxu0 %v1688_v4 }
  0xf2   : >> { %1562 = vmatprep.mubr.msk.bf16.mxu1 %vm814_vm0, %v1843_v14  ;;  %v664_v14 = vpop.permute.xlu0 %663 }
  0xf4   : >> { %1217 = vmatpush1.bf16.msra.mxu1 %v1667_v9  ;;  %1162 = vmatpush1.bf16.msra.mxu0 %v544_v10 }
  0xf5   : >> { %1218 = vmatprep.subr.bf16.mxu1 %v1688_v4  ;;  %1163 = vmatprep.subr.bf16.mxu0 %v1688_v4 }
  0xf6   : >> { %v784_v18 = vpop.permute.xlu0 %783 }
  0xf8   : >> { %1219 = vmatpush1.bf16.msra.mxu1 %v546_v11  ;;  %1164 = vmatpush1.bf16.msra.mxu0 %v1925_v28 }
  0xf9   : >> { %1220 = vmatprep.subr.bf16.mxu1 %v1688_v4  ;;  %1165 = vmatprep.subr.bf16.mxu0 %v1688_v4 }
  0xfa   : >> { %v2084_v20 = vpop.permute.xlu0 %797 }
  0xfc   : >> { %1221 = vmatpush1.bf16.msra.mxu1 %v1930_v29  ;;  %1166 = vmatpush1.bf16.msra.mxu0 %v1668_v12 }
  0xfd   : >> { %1222 = vmatprep.subr.bf16.mxu1 %v1688_v4  ;;  %1167 = vmatprep.subr.bf16.mxu0 %v1688_v4 }
 0x100   : >> { %1223 = vmatpush1.bf16.msra.mxu1 %v1669_v13  ;;  %1168 = vmatpush1.bf16.msra.mxu0 %v664_v14 }
 0x101   : >> { %1224 = vmatprep.subr.bf16.mxu1 %v1688_v4  ;;  %1169 = vmatprep.subr.bf16.mxu0 %v1688_v4 }
 0x104   : >> { %1225 = vmatpush1.bf16.msra.mxu1 %v666_v15  ;;  %1170 = vmatpush1.bf16.msra.mxu0 %v1935_v30 }
 0x105   : >> { %1226 = vmatprep.subr.bf16.mxu1 %v1688_v4  ;;  %1171 = vmatprep.subr.bf16.mxu0 %v1688_v4 }
 0x108   : >> { %1227 = vmatpush1.bf16.msra.mxu1 %v1942_v31  ;;  %1172 = vmatpush1.bf16.msra.mxu0 %v1670_v16 }
 0x109   : >> { %1228 = vmatprep.subr.bf16.mxu1 %v1688_v4  ;;  %1173 = vmatprep.subr.bf16.mxu0 %v1688_v4 }
 0x10c   : >> { %1229 = vmatpush1.bf16.msra.mxu1 %v1671_v17  ;;  %1174 = vmatpush1.bf16.msra.mxu0 %v784_v18 }
 0x10d   : >> { %1230 = vmatprep.subr.bf16.mxu1 %v1688_v4 }
 0x10f   : >> { %1190 = vmatmul.mubr.bf16.vlgmr.msra.gmra.mrb[12].mxu0 %v1971_v41 }
 0x110   : >> { %1231 = vmatpush1.bf16.msra.mxu1 %v786_v19 }
 0x113   : >> { %1247 = vmatmul.mubr.bf16.vlgmr.msra.gmra.mrb[12].mxu1 %v1971_v41 }
 0x176   : >> { %v852_v21 = vpop.f32.mrb[0].mxu0 }
 0x177   : >> { %v854_v23 = vpop.f32.mrb[1].mxu0  ;;  %v853_v24 = vadd.f32 %v852_v21, %v2084_v20 }
 0x178   : >> { %v855_v25 = vpop.f32.mrb[2].mxu0 }
 0x179   : >> { %v856_v26 = vadd.f32 %v855_v25, %v2086_v22  ;;  %v859_v27 = vmax.f32 %v853_v24, 0.0  ;;  %v857_v28 = vpop.f32.mrb[3].mxu0 }
 0x17a   : >> { %v908_v29 = vpop.f32.mrb[0].mxu1 }
 0x17b   : >> { %v860_v4 = vmax.f32 %v856_v26, 0.0  ;;  %v910_v30 = vpop.f32.mrb[1].mxu1  ;;  %v1579_v31 = vpack.c.bf16 %v859_v27, %v859_v27  ;;  %v909_v32 = vadd.f32 %v908_v29, %v2084_v20 }
 0x17c   : >> { %v911_v33 = vpop.f32.mrb[2].mxu1 }
 0x17d   : >> { %v1580_v34 = vpack.c.bf16 %v860_v4, %v860_v4  ;;  %872 = vst.msk [vmem:[%s2092_s23] sm:$0xf] %vm871_vm1, %v1579_v31  ;;  %v915_v35 = vmax.f32 %v909_v32, 0.0  ;;  %v912_v36 = vadd.f32 %v911_v33, %v2086_v22  ;;  %v913_v37 = vpop.f32.mrb[3].mxu1 }
 0x17f   : >> { %873 = vst.msk [vmem:[%s2092_s23 + $0x4] sm:$0xf] %vm871_vm1, %v1580_v34  ;;  %v1582_v38 = vpack.c.bf16 %v915_v35, %v915_v35  ;;  %v916_v39 = vmax.f32 %v912_v36, 0.0 }
 0x181   : >> { %1525 = vst.msk [vmem:[%s2092_s23 + $0x8] sm:$0xf] %vm871_vm1, %v1582_v38  ;;  %v1583_v40 = vpack.c.bf16 %v916_v39, %v916_v39 }
 0x183   : >> { %1526 = vst.msk [vmem:[%s2092_s23 + $0xc] sm:$0xf] %vm871_vm1, %v1583_v40 }
 0x19a   : >> { %v963_v41 = vpop.f32.mrb[4].mxu0 }
 0x19b   : >> { %v964_v42 = vadd.f32 %v963_v41, %v2084_v20  ;;  %v965_v43 = vpop.f32.mrb[5].mxu0 }
 0x19c   : >> { %v966_v44 = vpop.f32.mrb[6].mxu0 }
 0x19d   : >> { %v970_v45 = vmax.f32 %v964_v42, 0.0  ;;  %v967_v46 = vadd.f32 %v966_v44, %v2086_v22  ;;  %v968_v47 = vpop.f32.mrb[7].mxu0 }
 0x19e   : >> { %v1020_v48 = vpop.f32.mrb[4].mxu1 }
 0x19f   : >> { %v1585_v49 = vpack.c.bf16 %v970_v45, %v970_v45  ;;  %v971_v50 = vmax.f32 %v967_v46, 0.0  ;;  %v1021_v51 = vadd.f32 %v1020_v48, %v2084_v20  ;;  %v1022_v52 = vpop.f32.mrb[5].mxu1 }
 0x1a0   : >> { %v1023_v53 = vpop.f32.mrb[6].mxu1 }
 0x1a1   : >> { %1532 = vst.msk [vmem:[%s2092_s23 + $0x10] sm:$0xf] %vm871_vm1, %v1585_v49  ;;  %v1586_v54 = vpack.c.bf16 %v971_v50, %v971_v50  ;;  %v1027_v55 = vmax.f32 %v1021_v51, 0.0  ;;  %v1024_v56 = vadd.f32 %v1023_v53, %v2086_v22  ;;  %v1025_v57 = vpop.f32.mrb[7].mxu1 }
 0x1a3   : >> { %1533 = vst.msk [vmem:[%s2092_s23 + $0x14] sm:$0xf] %vm871_vm1, %v1586_v54  ;;  %v1588_v58 = vpack.c.bf16 %v1027_v55, %v1027_v55  ;;  %v1028_v59 = vmax.f32 %v1024_v56, 0.0 }
 0x1a5   : >> { %1539 = vst.msk [vmem:[%s2092_s23 + $0x18] sm:$0xf] %vm871_vm1, %v1588_v58  ;;  %v1589_v60 = vpack.c.bf16 %v1028_v59, %v1028_v59 }
 0x1a7   : >> { %1540 = vst.msk [vmem:[%s2092_s23 + $0x1c] sm:$0xf] %vm871_vm1, %v1589_v60 }
 0x1be   : >> { %v1077_v61 = vpop.f32.mrb[8].mxu0 }
 0x1bf   : >> { %v1078_v62 = vadd.f32 %v1077_v61, %v2084_v20  ;;  %v1079_v63 = vpop.f32.mrb[9].mxu0 }
 0x1c0   : >> { %v1080_v5 = vpop.f32.mrb[10].mxu0 }
 0x1c1   : >> { %v1084_v6 = vmax.f32 %v1078_v62, 0.0  ;;  %v1081_v7 = vadd.f32 %v1080_v5, %v2086_v22  ;;  %v1082_v8 = vpop.f32.mrb[11].mxu0 }
 0x1c2   : >> { %v1134_v9 = vpop.f32.mrb[8].mxu1 }
 0x1c3   : >> { %v1591_v10 = vpack.c.bf16 %v1084_v6, %v1084_v6  ;;  %v1085_v11 = vmax.f32 %v1081_v7, 0.0  ;;  %v1135_v12 = vadd.f32 %v1134_v9, %v2084_v20  ;;  %v1136_v13 = vpop.f32.mrb[9].mxu1 }
 0x1c4   : >> { %v1137_v14 = vpop.f32.mrb[10].mxu1 }
 0x1c5   : >> { %1546 = vst.msk [vmem:[%s2092_s23 + $0x20] sm:$0xf] %vm871_vm1, %v1591_v10  ;;  %v1592_v15 = vpack.c.bf16 %v1085_v11, %v1085_v11  ;;  %v1141_v16 = vmax.f32 %v1135_v12, 0.0  ;;  %v1138_v17 = vadd.f32 %v1137_v14, %v2086_v22  ;;  %v1139_v18 = vpop.f32.mrb[11].mxu1 }
 0x1c7   : >> { %1547 = vst.msk [vmem:[%s2092_s23 + $0x24] sm:$0xf] %vm871_vm1, %v1592_v15  ;;  %v1594_v19 = vpack.c.bf16 %v1141_v16, %v1141_v16  ;;  %v1142_v21 = vmax.f32 %v1138_v17, 0.0 }
 0x1c9   : >> { %1553 = vst.msk [vmem:[%s2092_s23 + $0x28] sm:$0xf] %vm871_vm1, %v1594_v19  ;;  %v1595_v23 = vpack.c.bf16 %v1142_v21, %v1142_v21 }
 0x1cb   : >> { %1554 = vst.msk [vmem:[%s2092_s23 + $0x2c] sm:$0xf] %vm871_vm1, %v1595_v23 }
 0x1e2   : >> { %v1191_v24 = vpop.f32.mrb[12].mxu0 }
 0x1e3   : >> { %v1192_v25 = vadd.f32 %v1191_v24, %v2084_v20  ;;  %v1193_v26 = vpop.f32.mrb[13].mxu0 }
 0x1e4   : >> { %v1194_v27 = vpop.f32.mrb[14].mxu0 }
 0x1e5   : >> { %v1198_v28 = vmax.f32 %v1192_v25, 0.0  ;;  %v1195_v29 = vadd.f32 %v1194_v27, %v2086_v22  ;;  %v1196_v4 = vpop.f32.mrb[15].mxu0 }
 0x1e6   : >> { %v1248_v30 = vpop.f32.mrb[12].mxu1 }
 0x1e7   : >> { %v1597_v31 = vpack.c.bf16 %v1198_v28, %v1198_v28  ;;  %v1199_v32 = vmax.f32 %v1195_v29, 0.0  ;;  %v1249_v33 = vadd.f32 %v1248_v30, %v2084_v20  ;;  %v1250_v34 = vpop.f32.mrb[13].mxu1 }
 0x1e8   : >> { %v1251_v35 = vpop.f32.mrb[14].mxu1 }
 0x1e9   : >> { %1560 = vst.msk [vmem:[%s2092_s23 + $0x30] sm:$0xf] %vm871_vm1, %v1597_v31  ;;  %v1598_v36 = vpack.c.bf16 %v1199_v32, %v1199_v32  ;;  %v1255_v37 = vmax.f32 %v1249_v33, 0.0  ;;  %v1252_v38 = vadd.f32 %v1251_v35, %v2086_v22  ;;  %v1253_v39 = vpop.f32.mrb[15].mxu1  ;;  %321 = sbr.rel (!%p319_p4) target bundleno = 18 (0x12), region = 104 }
 0x1eb   : >> { %1561 = vst.msk [vmem:[%s2092_s23 + $0x34] sm:$0xf] %vm871_vm1, %v1598_v36  ;;  %v1600_v40 = vpack.c.bf16 %v1255_v37, %v1255_v37  ;;  %v1256_v41 = vmax.f32 %v1252_v38, 0.0 }
 0x1ed   : >> { %1567 = vst.msk [vmem:[%s2092_s23 + $0x38] sm:$0xf] %vm871_vm1, %v1600_v40  ;;  %v1601_v42 = vpack.c.bf16 %v1256_v41, %v1256_v41 }
 0x1ef   : >> { %1568 = vst.msk [vmem:[%s2092_s23 + $0x3c] sm:$0xf] %vm871_vm1, %v1601_v42 }
 0x1f0 PF: > { %s16_s21 = sadd.s32 1, %s1682_s21  }
 0x1f1   : > { %p13_p5 = scmp.ge.s32.totalorder %s16_s21, 4  }
 0x1f3   :  { %15 = sbr.rel (!%p13_p5) target bundleno = 1 (0x1), region = 115 }

// kernel: custom_cnn_forward.5
= control target key start
LH: loop header
LB: loop body
LE: loop exit
PB: predicated region body
PF: predicated region fallthrough
CT: control target
= control target key end

     0   :  { %s1971_s21 = smov 0   ;;  %s2498_s0 = inlined_call_operand.vmem [shape: bf16[2,17,16,17], index: 0, kind: input, shape index: {}]   ;;  %s2499_s1 = inlined_call_operand.vmem [shape: bf16[2,17,16,17], index: 1, kind: input, shape index: {}]   ;;  %s2500_s2 = inlined_call_operand.vmem [shape: bf16[2,17,16,17], index: 2, kind: input, shape index: {}]   ;;  %s2501_s3 = inlined_call_operand.vmem [shape: bf16[2,17,16,17], index: 3, kind: input, shape index: {}]   ;;  %s2502_s4 = inlined_call_operand.vmem [shape: bf16[32,144], index: 4, kind: input, shape index: {}]   ;;  %s2503_s5 = inlined_call_operand.vmem [shape: f32[32,1], index: 5, kind: input, shape index: {}]   ;;  %s2504_s6 = inlined_call_operand.vmem [shape: bf16[2,16,32,16], index: 6, kind: output, shape index: {}]  }
   0x1 LB: > { %s1601_s22 = sadd.s32 4294967295, %s1928_s21   ;;  %p1605_p0 = scmp.ge.s32.totalorder %s1928_s21, 1  ;;  %s1928_s21 = sphi %s1971_s21, %s16_s21  }
   0x2   : > { %p242_p1 = scmp.lt.s32.totalorder %s1928_s21, 3 }
   0x4   : > { %p243_p2 = pnand %p1605_p0, %p242_p1 }
   0x5   : > { %p287_p3 = scmp.lt.s32.totalorder (!%p243_p2), %s1601_s22, 1  ;;  %v1982_v0 = vld [vmem:[%s2502_s4] sm:$0xff] (!%p243_p2)  ;;  %v1987_v1 = vld [vmem:[%s2502_s4 + $0x8] sm:$0xff] (!%p243_p2)  ;;  %v1992_v2 = vld [vmem:[%s2502_s4 + $0x10] sm:$0xff] (!%p243_p2)  ;;  %s2042_s9 = smov (!%p243_p2), 0  }
   0x6   : > { %246 = sbr.rel (%p243_p2) target bundleno = 504 (0x1f8), region = 44  ;;  %v1997_v3 = vld [vmem:[%s2502_s4 + $0x18] sm:$0xff] (!%p243_p2)  ;;  %v2002_v4 = vld [vmem:[%s2503_s5] sm:$0xff] (!%p243_p2)  ;;  %v2007_v5 = vld [vmem:[%s2503_s5 + $0x8] sm:$0xff] (!%p243_p2) }
   0x7   : > { %v2012_v6 = vld [vmem:[%s2503_s5 + $0x10] sm:$0xff] (!%p243_p2)  ;;  %v2017_v7 = vld [vmem:[%s2503_s5 + $0x18] sm:$0xff] (!%p243_p2) }
   0xd   : > { %s2506_s22 = smov (!%p287_p3, %s1601_s22), 1 }
   0xe   : > { %s2019_s15 = smul.u32 136, %s2506_s22  ;;  %s1800_s16 = sshll.u32 %s2506_s22, 8 }
   0xf   : > { %s2024_s19 = scalar_lea.vmem %s2504_s6, %s1800_s16 }
  0x10   : > { %s291_s24 = scalar_lea.vmem %s2498_s0, %s2019_s15  ;;  %s296_s27 = scalar_lea.vmem %s2499_s1, %s2019_s15 }
  0x11   : > { %s301_s30 = scalar_lea.vmem %s2500_s2, %s2019_s15  ;;  %s306_s22 = scalar_lea.vmem %s2501_s3, %s2019_s15 }
  0x12 LB: >> { %v1934_v8 = vmov 0   ;;  %s2050_s10 = sshll.u32 %s1932_s9, 6  ;;  %s1935_s18 = smov 127   ;;  %v2104_v17 = vcombine.high %v1982_v0, %v1987_v1  ;;  %vm837_vm0 = vcmask 130048   ;;  %v2239_v45 = vcombine.low %v1982_v0, %v1987_v1  ;;  %s1932_s9 = sphi %s2042_s9, %s326_s9  }
  0x13   : >> { %844 = vmatprep.subr.bf16.mxu0 %v1934_v8  ;;  %921 = vmatprep.subr.bf16.mxu1 %v1934_v8  ;;  %s2060_s13 = scalar_lea.vmem %s291_s24, %s2050_s10  ;;  %s2068_s17 = scalar_lea.vmem %s301_s30, %s2050_s10  ;;  %v2245_v47 = vcombine.high %v1992_v2, %v1997_v3  ;;  %v2257_v49 = vcombine.low %v1992_v2, %v1997_v3  ;;  %vm916_vm1 = vcmask 125952  }
  0x14   : >> { %1869 = vset.pattern.permute.xlu1 %v1934_v8  ;;  %1868 = vset.pattern.permute.xlu0 %v1934_v8  ;;  %v1870_v9 = vld [vmem:[%s2060_s13] sm:$0xff]   ;;  %v1871_v10 = vld [vmem:[%s2060_s13 + $0x8] sm:$0xff]   ;;  %v2090_v14 = vld [vmem:[%s2060_s13 + $0x10] sm:$0xff]   ;;  %s2126_s25 = scalar_lea.vmem %s296_s27, %s2050_s10  ;;  %s2152_s29 = scalar_lea.vmem %s306_s22, %s2050_s10 }
  0x15   : >> { %535 = vrot.lane.b32.xlu0 %v1870_v9, %s1935_s18  ;;  %v2074_v11 = vld [vmem:[%s2068_s17] sm:$0xff]   ;;  %845 = vmatpush1.bf16.msra.mxu0 %v1870_v9  ;;  %v2080_v12 = vld [vmem:[%s2068_s17 + $0x8] sm:$0xff]   ;;  %v2095_v15 = vld [vmem:[%s2060_s13 + $0x10] sm:$0xff]   ;;  %s1813_s7 = sshll.u32 %s1932_s9, 7  ;;  %s326_s9 = sadd.s32 1, %s1932_s9  }
  0x16   : >> { %846 = vmatprep.subr.bf16.mxu0 %v1934_v8  ;;  %922 = vmatpush1.bf16.msra.mxu1 %v1871_v10  ;;  %v2085_v13 = vld [vmem:[%s2060_s13 + $0x8] sm:$0xff]   ;;  %v2100_v16 = vld [vmem:[%s2060_s13 + $0x18] sm:$0xff]   ;;  %v2109_v18 = vld [vmem:[%s2068_s17 + $0x10] sm:$0xff]   ;;  %s2392_s8 = scalar_lea.vmem %s2024_s19, %s1813_s7  ;;  %p323_p4 = scmp.ge.s32.totalorder %s326_s9, 2  }
  0x17   : >> { %655 = vrot.lane.b32.xlu1 %v2074_v11, %s1935_s18  ;;  %923 = vmatprep.subr.bf16.mxu1 %v1934_v8  ;;  %v2118_v19 = vld [vmem:[%s2068_s17 + $0x18] sm:$0xff]   ;;  %v1889_v21 = vld [vmem:[%s2126_s25] sm:$0xff]   ;;  %v1891_v23 = vld [vmem:[%s2126_s25 + $0x8] sm:$0xff]  }
  0x18   : >> { %1706 = vmatprep.mubr.msk.bf16.mxu0 %vm837_vm0, %v2104_v17  ;;  %1714 = vmatprep.mubr.msk.bf16.mxu1 %vm837_vm0, %v2104_v17  ;;  %v2131_v20 = vld [vmem:[%s2060_s13 + $0x18] sm:$0xff]   ;;  %v2137_v22 = vld [vmem:[%s2060_s13 + $0x20] sm:$0xff]   ;;  %v2157_v25 = vld [vmem:[%s2060_s13 + $0x28] sm:$0xff]  }
  0x19   : >> { %537 = vrot.lane.b32.xlu0 %v1871_v10, %s1935_s18  ;;  %847 = vmatpush1.bf16.msra.mxu0 %v1889_v21  ;;  %v2143_v24 = vld [vmem:[%s2060_s13 + $0x20] sm:$0xff]   ;;  %v2168_v27 = vld [vmem:[%s2068_s17 + $0x28] sm:$0xff]   ;;  %v2176_v29 = vld [vmem:[%s2060_s13 + $0x30] sm:$0xff]  }
  0x1a   : >> { %848 = vmatprep.subr.bf16.mxu0 %v1934_v8  ;;  %924 = vmatpush1.bf16.msra.mxu1 %v1891_v23  ;;  %v2163_v26 = vld [vmem:[%s2068_s17 + $0x20] sm:$0xff]   ;;  %v2173_v28 = vld [vmem:[%s2060_s13 + $0x28] sm:$0xff]   ;;  %v2181_v30 = vld [vmem:[%s2060_s13 + $0x30] sm:$0xff]  }
  0x1b   : >> { %657 = vrot.lane.b32.xlu1 %v2080_v12, %s1935_s18  ;;  %925 = vmatprep.subr.bf16.mxu1 %v1934_v8  ;;  %v2186_v31 = vld [vmem:[%s2060_s13 + $0x38] sm:$0xff]   ;;  %v2191_v32 = vld [vmem:[%s2068_s17 + $0x30] sm:$0xff]   ;;  %v2208_v35 = vld [vmem:[%s2060_s13 + $0x40] sm:$0xff]  }
  0x1c   : >> { %v2196_v33 = vld [vmem:[%s2068_s17 + $0x38] sm:$0xff]   ;;  %v1893_v38 = vld [vmem:[%s2152_s29] sm:$0xff]   ;;  %v1895_v40 = vld [vmem:[%s2152_s29 + $0x8] sm:$0xff]  }
  0x1d   : >> { %775 = vrot.lane.b32.xlu0 %v2085_v13, %s1935_s18  ;;  %v2203_v34 = vld [vmem:[%s2060_s13 + $0x38] sm:$0xff]   ;;  %v1897_v42 = vld [vmem:[%s2126_s25 + $0x8] sm:$0xff]   ;;  %v1899_v43 = vld [vmem:[%s2126_s25 + $0x10] sm:$0xff]  }
  0x1e   : >> { %v1900_v48 = vld [vmem:[%s2126_s25 + $0x10] sm:$0xff]   ;;  %v1901_v50 = vld [vmem:[%s2126_s25 + $0x18] sm:$0xff]   ;;  %v1905_v58 = vld [vmem:[%s2126_s25 + $0x20] sm:$0xff]  }
  0x1f   : >> { %777 = vrot.lane.b32.xlu1 %v2090_v14, %s1935_s18  ;;  %v1902_v53 = vld [vmem:[%s2152_s29 + $0x10] sm:$0xff]   ;;  %v1903_v54 = vld [vmem:[%s2152_s29 + $0x18] sm:$0xff]   ;;  %v1906_v61 = vld [vmem:[%s2126_s25 + $0x20] sm:$0xff]  }
  0x20   : >> { %v1904_v57 = vld [vmem:[%s2126_s25 + $0x18] sm:$0xff]   ;;  %v1907_v62 = vld [vmem:[%s2126_s25 + $0x28] sm:$0xff]   ;;  %v1908_v10 = vld [vmem:[%s2152_s29 + $0x20] sm:$0xff]  }
  0x21   : >> { %539 = vrot.lane.b32.xlu0 %v2095_v15, %s1935_s18  ;;  %v1914_v23 = vld [vmem:[%s2152_s29 + $0x30] sm:$0xff]  }
  0x23   : >> { %541 = vrot.lane.b32.xlu1 %v2100_v16, %s1935_s18 }
  0x25   : >> { %659 = vrot.lane.b32.xlu0 %v2109_v18, %s1935_s18 }
  0x27   : >> { %661 = vrot.lane.b32.xlu1 %v2118_v19, %s1935_s18 }
  0x29   : >> { %779 = vrot.lane.b32.xlu0 %v2131_v20, %s1935_s18 }
  0x2b   : >> { %781 = vrot.lane.b32.xlu1 %v2137_v22, %s1935_s18 }
  0x2d   : >> { %543 = vrot.lane.b32.xlu0 %v2143_v24, %s1935_s18 }
  0x2f   : >> { %545 = vrot.lane.b32.xlu1 %v2157_v25, %s1935_s18 }
  0x31   : >> { %663 = vrot.lane.b32.xlu0 %v2163_v26, %s1935_s18 }
  0x33   : >> { %665 = vrot.lane.b32.xlu1 %v2168_v27, %s1935_s18 }
  0x35   : >> { %783 = vrot.lane.b32.xlu0 %v2173_v28, %s1935_s18 }
  0x37   : >> { %785 = vrot.lane.b32.xlu1 %v2176_v29, %s1935_s18 }
  0x39   : >> { %547 = vrot.lane.b32.xlu0 %v2181_v30, %s1935_s18 }
  0x3b   : >> { %549 = vrot.lane.b32.xlu1 %v2186_v31, %s1935_s18 }
  0x3d   : >> { %667 = vrot.lane.b32.xlu0 %v2191_v32, %s1935_s18 }
  0x3f   : >> { %669 = vrot.lane.b32.xlu1 %v2196_v33, %s1935_s18 }
  0x41   : >> { %787 = vrot.lane.b32.xlu0 %v2203_v34, %s1935_s18 }
  0x43   : >> { %789 = vrot.lane.b32.xlu1 %v2208_v35, %s1935_s18 }
  0x45   : >> { %801 = vperm.xlu0 %1868, %v2002_v4  }
  0x47   : >> { %806 = vperm.xlu1 %1869, %v2007_v5  }
  0x49   : >> { %816 = vperm.xlu0 %1868, %v2017_v7  }
  0x4b   : >> { %811 = vperm.xlu1 %1869, %v2012_v6  }
  0x87   : >> { %v536_v36 = vpop.permute.xlu0 %535 }
  0x88   : >> { %849 = vmatpush1.bf16.msra.mxu0 %v536_v36 }
  0x89   : >> { %850 = vmatprep.subr.bf16.mxu0 %v1934_v8  ;;  %v656_v39 = vpop.permute.xlu1 %655 }
  0x8b   : >> { %v538_v37 = vpop.permute.xlu0 %537 }
  0x8c   : >> { %851 = vmatpush1.bf16.msra.mxu0 %v2074_v11  ;;  %926 = vmatpush1.bf16.msra.mxu1 %v538_v37  ;;  %v1909_v11 = vld [vmem:[%s2152_s29 + $0x28] sm:$0xff]  }
  0x8d   : >> { %852 = vmatprep.subr.bf16.mxu0 %v1934_v8  ;;  %927 = vmatprep.subr.bf16.mxu1 %v1934_v8  ;;  %v658_v41 = vpop.permute.xlu1 %657 }
  0x8f   : >> { %v776_v44 = vpop.permute.xlu0 %775 }
  0x90   : >> { %853 = vmatpush1.bf16.msra.mxu0 %v1893_v38  ;;  %928 = vmatpush1.bf16.msra.mxu1 %v2080_v12 }
  0x91   : >> { %854 = vmatprep.subr.bf16.mxu0 %v1934_v8  ;;  %929 = vmatprep.subr.bf16.mxu1 %v1934_v8  ;;  %v778_v46 = vpop.permute.xlu1 %777 }
  0x93   : >> { %v540_v51 = vpop.permute.xlu0 %539 }
  0x94   : >> { %855 = vmatpush1.bf16.msra.mxu0 %v656_v39  ;;  %930 = vmatpush1.bf16.msra.mxu1 %v1895_v40 }
  0x95   : >> { %856 = vmatprep.subr.bf16.mxu0 %v1934_v8  ;;  %931 = vmatprep.subr.bf16.mxu1 %v1934_v8  ;;  %v542_v52 = vpop.permute.xlu1 %541 }
  0x97   : >> { %v660_v55 = vpop.permute.xlu0 %659 }
  0x98   : >> { %857 = vmatpush1.bf16.msra.mxu0 %v2085_v13  ;;  %932 = vmatpush1.bf16.msra.mxu1 %v658_v41 }
  0x99   : >> { %858 = vmatprep.subr.bf16.mxu0 %v1934_v8  ;;  %933 = vmatprep.subr.bf16.mxu1 %v1934_v8  ;;  %v662_v56 = vpop.permute.xlu1 %661 }
  0x9b   : >> { %v780_v59 = vpop.permute.xlu0 %779 }
  0x9c   : >> { %859 = vmatpush1.bf16.msra.mxu0 %v1897_v42  ;;  %934 = vmatpush1.bf16.msra.mxu1 %v2090_v14  ;;  %v1910_v14 = vld [vmem:[%s2126_s25 + $0x28] sm:$0xff]  }
  0x9d   : >> { %935 = vmatprep.subr.bf16.mxu1 %v1934_v8  ;;  %860 = vmatprep.subr.bf16.mxu0 %v1934_v8  ;;  %v782_v60 = vpop.permute.xlu1 %781 }
  0x9f   : >> { %v544_v63 = vpop.permute.xlu0 %543 }
  0xa0   : >> { %861 = vmatpush1.bf16.msra.mxu0 %v776_v44  ;;  %936 = vmatpush1.bf16.msra.mxu1 %v1899_v43 }
  0xa1   : >> { %937 = vmatprep.subr.bf16.mxu1 %v1934_v8  ;;  %997 = vmatprep.subr.bf16.mxu0 %v1934_v8  ;;  %v546_v9 = vpop.permute.xlu1 %545 }
  0xa3   : >> { %877 = vmatmul.mubr.bf16.vlgmr.msra.gmra.mrb[0].mxu0 %v2239_v45  ;;  %v664_v12 = vpop.permute.xlu0 %663 }
  0xa4   : >> { %938 = vmatpush1.bf16.msra.mxu1 %v778_v46  ;;  %998 = vmatpush1.bf16.msra.mxu0 %v2095_v15  ;;  %v1911_v15 = vld [vmem:[%s2126_s25 + $0x30] sm:$0xff]  }
  0xa5   : >> { %999 = vmatprep.subr.bf16.mxu0 %v1934_v8  ;;  %1074 = vmatprep.subr.bf16.mxu1 %v1934_v8  ;;  %v666_v13 = vpop.permute.xlu1 %665 }
  0xa6   : >> { %1707 = vmatprep.mubr.msk.bf16.mxu0 %vm837_vm0, %v2245_v47 }
  0xa7   : >> { %954 = vmatmul.mubr.bf16.vlgmr.msra.gmra.mrb[0].mxu1 %v2239_v45 }
  0xa8   : >> { %1000 = vmatpush1.bf16.msra.mxu0 %v1900_v48  ;;  %1075 = vmatpush1.bf16.msra.mxu1 %v2100_v16  ;;  %v784_v16 = vpop.permute.xlu0 %783 }
  0xa9   : >> { %1076 = vmatprep.subr.bf16.mxu1 %v1934_v8  ;;  %1001 = vmatprep.subr.bf16.mxu0 %v1934_v8 }
  0xaa   : >> { %1715 = vmatprep.mubr.msk.bf16.mxu1 %vm837_vm0, %v2245_v47 }
  0xab   : >> { %885 = vmatmul.mubr.bf16.gmra.mrb[4].mxu0 %v2257_v49 }
  0xac   : >> { %1002 = vmatpush1.bf16.msra.mxu0 %v540_v51  ;;  %1077 = vmatpush1.bf16.msra.mxu1 %v1901_v50  ;;  %v548_v21 = vpop.permute.xlu0 %547 }
  0xad   : >> { %1003 = vmatprep.subr.bf16.mxu0 %v1934_v8  ;;  %1078 = vmatprep.subr.bf16.mxu1 %v1934_v8 }
  0xae   : >> { %1726 = vmatprep.mubr.msk.bf16.mxu0 %vm837_vm0, %v2104_v17 }
  0xaf   : >> { %962 = vmatmul.mubr.bf16.gmra.mrb[4].mxu1 %v2257_v49 }
  0xb0   : >> { %1004 = vmatpush1.bf16.msra.mxu0 %v2109_v18  ;;  %1079 = vmatpush1.bf16.msra.mxu1 %v542_v52  ;;  %v786_v18 = vpop.permute.xlu1 %785 }
  0xb1   : >> { %1005 = vmatprep.subr.bf16.mxu0 %v1934_v8  ;;  %1080 = vmatprep.subr.bf16.mxu1 %v1934_v8 }
  0xb2   : >> { %1738 = vmatprep.mubr.msk.bf16.mxu1 %vm837_vm0, %v2104_v17 }
  0xb4   : >> { %1006 = vmatpush1.bf16.msra.mxu0 %v1902_v53  ;;  %1081 = vmatpush1.bf16.msra.mxu1 %v2118_v19  ;;  %v1912_v19 = vld [vmem:[%s2126_s25 + $0x30] sm:$0xff]  }
  0xb5   : >> { %1082 = vmatprep.subr.bf16.mxu1 %v1934_v8  ;;  %1007 = vmatprep.subr.bf16.mxu0 %v1934_v8 }
  0xb8   : >> { %1008 = vmatpush1.bf16.msra.mxu0 %v660_v55  ;;  %1083 = vmatpush1.bf16.msra.mxu1 %v1903_v54 }
  0xb9   : >> { %1009 = vmatprep.subr.bf16.mxu0 %v1934_v8  ;;  %1084 = vmatprep.subr.bf16.mxu1 %v1934_v8 }
  0xbc   : >> { %1010 = vmatpush1.bf16.msra.mxu0 %v2131_v20  ;;  %1085 = vmatpush1.bf16.msra.mxu1 %v662_v56  ;;  %v1913_v20 = vld [vmem:[%s2126_s25 + $0x38] sm:$0xff]  }
  0xbd   : >> { %1011 = vmatprep.subr.bf16.mxu0 %v1934_v8  ;;  %1086 = vmatprep.subr.bf16.mxu1 %v1934_v8 }
  0xc0   : >> { %1012 = vmatpush1.bf16.msra.mxu0 %v1904_v57  ;;  %1087 = vmatpush1.bf16.msra.mxu1 %v2137_v22  ;;  %v550_v22 = vpop.permute.xlu1 %549 }
  0xc1   : >> { %1088 = vmatprep.subr.bf16.mxu1 %v1934_v8  ;;  %1013 = vmatprep.subr.bf16.mxu0 %v1934_v8 }
  0xc4   : >> { %1014 = vmatpush1.bf16.msra.mxu0 %v780_v59  ;;  %1089 = vmatpush1.bf16.msra.mxu1 %v1905_v58 }
  0xc5   : >> { %1090 = vmatprep.subr.bf16.mxu1 %v1934_v8  ;;  %1151 = vmatprep.subr.bf16.mxu0 %v1934_v8 }
  0xc7   : >> { %1030 = vmatmul.mubr.bf16.vlgmr.msra.gmra.mrb[8].mxu0 %v2239_v45 }
  0xc8   : >> { %1091 = vmatpush1.bf16.msra.mxu1 %v782_v60  ;;  %1152 = vmatpush1.bf16.msra.mxu0 %v2143_v24  ;;  %v1915_v24 = vld [vmem:[%s2152_s29 + $0x38] sm:$0xff]  }
  0xc9   : >> { %1153 = vmatprep.subr.bf16.mxu0 %v1934_v8  ;;  %1228 = vmatprep.subr.bf16.mxu1 %v1934_v8 }
  0xca   : >> { %1727 = vmatprep.mubr.msk.bf16.mxu0 %vm837_vm0, %v2245_v47 }
  0xcb   : >> { %1107 = vmatmul.mubr.bf16.vlgmr.msra.gmra.mrb[8].mxu1 %v2239_v45 }
  0xcc   : >> { %1154 = vmatpush1.bf16.msra.mxu0 %v1906_v61  ;;  %1229 = vmatpush1.bf16.msra.mxu1 %v2157_v25  ;;  %v668_v25 = vpop.permute.xlu0 %667 }
  0xcd   : >> { %1230 = vmatprep.subr.bf16.mxu1 %v1934_v8  ;;  %1155 = vmatprep.subr.bf16.mxu0 %v1934_v8 }
  0xce   : >> { %1739 = vmatprep.mubr.msk.bf16.mxu1 %vm837_vm0, %v2245_v47 }
  0xcf   : >> { %1038 = vmatmul.mubr.bf16.gmra.mrb[12].mxu0 %v2257_v49 }
  0xd0   : >> { %1156 = vmatpush1.bf16.msra.mxu0 %v544_v63  ;;  %1231 = vmatpush1.bf16.msra.mxu1 %v1907_v62 }
  0xd1   : >> { %1157 = vmatprep.subr.bf16.mxu0 %v1934_v8  ;;  %1232 = vmatprep.subr.bf16.mxu1 %v1934_v8 }
  0xd2   : >> { %1750 = vmatprep.mubr.msk.bf16.mxu0 %vm837_vm0, %v2104_v17 }
  0xd3   : >> { %1115 = vmatmul.mubr.bf16.gmra.mrb[12].mxu1 %v2257_v49 }
  0xd4   : >> { %1158 = vmatpush1.bf16.msra.mxu0 %v2163_v26  ;;  %1233 = vmatpush1.bf16.msra.mxu1 %v546_v9  ;;  %v670_v26 = vpop.permute.xlu1 %669 }
  0xd5   : >> { %1159 = vmatprep.subr.bf16.mxu0 %v1934_v8  ;;  %1234 = vmatprep.subr.bf16.mxu1 %v1934_v8 }
  0xd6   : >> { %1762 = vmatprep.mubr.msk.bf16.mxu1 %vm837_vm0, %v2104_v17 }
  0xd8   : >> { %1160 = vmatpush1.bf16.msra.mxu0 %v1908_v10  ;;  %1235 = vmatpush1.bf16.msra.mxu1 %v2168_v27  ;;  %v1917_v27 = vld [vmem:[%s2126_s25 + $0x40] sm:$0xff]  }
  0xd9   : >> { %1236 = vmatprep.subr.bf16.mxu1 %v1934_v8  ;;  %1161 = vmatprep.subr.bf16.mxu0 %v1934_v8 }
  0xdc   : >> { %1162 = vmatpush1.bf16.msra.mxu0 %v664_v12  ;;  %1237 = vmatpush1.bf16.msra.mxu1 %v1909_v11 }
  0xdd   : >> { %1163 = vmatprep.subr.bf16.mxu0 %v1934_v8  ;;  %1238 = vmatprep.subr.bf16.mxu1 %v1934_v8 }
  0xe0   : >> { %1164 = vmatpush1.bf16.msra.mxu0 %v2173_v28  ;;  %1239 = vmatpush1.bf16.msra.mxu1 %v666_v13  ;;  %v788_v28 = vpop.permute.xlu0 %787 }
  0xe1   : >> { %1165 = vmatprep.subr.bf16.mxu0 %v1934_v8  ;;  %1240 = vmatprep.subr.bf16.mxu1 %v1934_v8 }
  0xe4   : >> { %1166 = vmatpush1.bf16.msra.mxu0 %v1910_v14  ;;  %1241 = vmatpush1.bf16.msra.mxu1 %v2176_v29  ;;  %v790_v29 = vpop.permute.xlu1 %789 }
  0xe5   : >> { %1242 = vmatprep.subr.bf16.mxu1 %v1934_v8  ;;  %1167 = vmatprep.subr.bf16.mxu0 %v1934_v8 }
  0xe8   : >> { %1168 = vmatpush1.bf16.msra.mxu0 %v784_v16  ;;  %1243 = vmatpush1.bf16.msra.mxu1 %v1911_v15 }
  0xe9   : >> { %1244 = vmatprep.subr.bf16.mxu1 %v1934_v8  ;;  %1305 = vmatprep.subr.bf16.mxu0 %v1934_v8 }
  0xeb   : >> { %1184 = vmatmul.mubr.bf16.vlgmr.msra.gmra.mrb[16].mxu0 %v2239_v45 }
  0xec   : >> { %1245 = vmatpush1.bf16.msra.mxu1 %v786_v18  ;;  %1306 = vmatpush1.bf16.msra.mxu0 %v2181_v30  ;;  %v2384_v30 = vpop.permute.xlu0 %801 }
  0xed   : >> { %1307 = vmatprep.subr.bf16.mxu0 %v1934_v8  ;;  %1382 = vmatprep.subr.bf16.mxu1 %v1934_v8 }
  0xee   : >> { %1751 = vmatprep.mubr.msk.bf16.mxu0 %vm837_vm0, %v2245_v47 }
  0xef   : >> { %1261 = vmatmul.mubr.bf16.vlgmr.msra.gmra.mrb[16].mxu1 %v2239_v45 }
  0xf0   : >> { %1308 = vmatpush1.bf16.msra.mxu0 %v1912_v19  ;;  %1383 = vmatpush1.bf16.msra.mxu1 %v2186_v31  ;;  %v2400_v50 = vpop.permute.xlu0 %816 }
  0xf1   : >> { %1384 = vmatprep.subr.bf16.mxu1 %v1934_v8  ;;  %1309 = vmatprep.subr.bf16.mxu0 %v1934_v8 }
  0xf2   : >> { %1763 = vmatprep.mubr.msk.bf16.mxu1 %vm837_vm0, %v2245_v47 }
  0xf3   : >> { %1192 = vmatmul.mubr.bf16.gmra.mrb[20].mxu0 %v2257_v49 }
  0xf4   : >> { %1310 = vmatpush1.bf16.msra.mxu0 %v548_v21  ;;  %1385 = vmatpush1.bf16.msra.mxu1 %v1913_v20 }
  0xf5   : >> { %1311 = vmatprep.subr.bf16.mxu0 %v1934_v8  ;;  %1386 = vmatprep.subr.bf16.mxu1 %v1934_v8 }
  0xf6   : >> { %1774 = vmatprep.mubr.msk.bf16.mxu0 %vm837_vm0, %v2104_v17 }
  0xf7   : >> { %1269 = vmatmul.mubr.bf16.gmra.mrb[20].mxu1 %v2257_v49 }
  0xf8   : >> { %1312 = vmatpush1.bf16.msra.mxu0 %v2191_v32  ;;  %1387 = vmatpush1.bf16.msra.mxu1 %v550_v22 }
  0xf9   : >> { %1313 = vmatprep.subr.bf16.mxu0 %v1934_v8  ;;  %1388 = vmatprep.subr.bf16.mxu1 %v1934_v8 }
  0xfa   : >> { %1786 = vmatprep.mubr.msk.bf16.mxu1 %vm837_vm0, %v2104_v17  ;;  %v1916_v17 = vld [vmem:[%s2126_s25 + $0x38] sm:$0xff]  }
  0xfc   : >> { %1314 = vmatpush1.bf16.msra.mxu0 %v1914_v23  ;;  %1389 = vmatpush1.bf16.msra.mxu1 %v2196_v33 }
  0xfd   : >> { %1390 = vmatprep.subr.bf16.mxu1 %v1934_v8  ;;  %1315 = vmatprep.subr.bf16.mxu0 %v1934_v8 }
 0x100   : >> { %1316 = vmatpush1.bf16.msra.mxu0 %v668_v25  ;;  %1391 = vmatpush1.bf16.msra.mxu1 %v1915_v24 }
 0x101   : >> { %1317 = vmatprep.subr.bf16.mxu0 %v1934_v8  ;;  %1392 = vmatprep.subr.bf16.mxu1 %v1934_v8 }
 0x104   : >> { %1318 = vmatpush1.bf16.msra.mxu0 %v2203_v34  ;;  %1393 = vmatpush1.bf16.msra.mxu1 %v670_v26 }
 0x105   : >> { %1319 = vmatprep.subr.bf16.mxu0 %v1934_v8  ;;  %1394 = vmatprep.subr.bf16.mxu1 %v1934_v8 }
 0x108   : >> { %1320 = vmatpush1.bf16.msra.mxu0 %v1916_v17  ;;  %1395 = vmatpush1.bf16.msra.mxu1 %v2208_v35 }
 0x109   : >> { %1396 = vmatprep.subr.bf16.mxu1 %v1934_v8  ;;  %1321 = vmatprep.subr.bf16.mxu0 %v1934_v8 }
 0x10c   : >> { %1322 = vmatpush1.bf16.msra.mxu0 %v788_v28  ;;  %1397 = vmatpush1.bf16.msra.mxu1 %v1917_v27 }
 0x10d   : >> { %1398 = vmatprep.subr.bf16.mxu1 %v1934_v8  ;;  %v2386_v8 = vpop.permute.xlu1 %806 }
 0x10f   : >> { %1338 = vmatmul.mubr.bf16.vlgmr.msra.gmra.mrb[24].mxu0 %v2239_v45 }
 0x110   : >> { %1399 = vmatpush1.bf16.msra.mxu1 %v790_v29  ;;  %1775 = vmatprep.mubr.msk.bf16.mxu0 %vm837_vm0, %v2245_v47 }
 0x111   : >> { %v2395_v44 = vpop.permute.xlu1 %811 }
 0x113   : >> { %1415 = vmatmul.mubr.bf16.vlgmr.msra.gmra.mrb[24].mxu1 %v2239_v45 }
 0x114   : >> { %1787 = vmatprep.mubr.msk.bf16.mxu1 %vm837_vm0, %v2245_v47 }
 0x117   : >> { %1346 = vmatmul.mubr.bf16.gmra.mrb[28].mxu0 %v2257_v49 }
 0x11b   : >> { %1423 = vmatmul.mubr.bf16.gmra.mrb[28].mxu1 %v2257_v49 }
 0x176   : >> { %v878_v31 = vpop.f32.mrb[0].mxu0 }
 0x177   : >> { %v880_v32 = vpop.f32.mrb[1].mxu0  ;;  %v879_v33 = vadd.f32 %v878_v31, %v2384_v30 }
 0x178   : >> { %v881_v34 = vpop.f32.mrb[2].mxu0 }
 0x179   : >> { %v882_v35 = vadd.f32 %v881_v34, %v2386_v8  ;;  %v893_v36 = vmax.f32 %v879_v33, 0.0  ;;  %v883_v37 = vpop.f32.mrb[3].mxu0 }
 0x17a   : >> { %v955_v38 = vpop.f32.mrb[0].mxu1 }
 0x17b   : >> { %v894_v39 = vmax.f32 %v882_v35, 0.0  ;;  %v957_v40 = vpop.f32.mrb[1].mxu1  ;;  %v1808_v41 = vpack.c.bf16 %v893_v36, %v893_v36  ;;  %v956_v42 = vadd.f32 %v955_v38, %v2384_v30 }
 0x17c   : >> { %v958_v43 = vpop.f32.mrb[2].mxu1 }
 0x17d   : >> { %v1809_v45 = vpack.c.bf16 %v894_v39, %v894_v39  ;;  %917 = vst.msk [vmem:[%s2392_s8] sm:$0xf] %vm916_vm1, %v1808_v41  ;;  %v970_v46 = vmax.f32 %v956_v42, 0.0  ;;  %v959_v47 = vadd.f32 %v958_v43, %v2386_v8  ;;  %v960_v48 = vpop.f32.mrb[3].mxu1 }
 0x17e   : >> { %v886_v49 = vpop.f32.mrb[4].mxu0 }
 0x17f   : >> { %918 = vst.msk [vmem:[%s2392_s8 + $0x4] sm:$0xf] %vm916_vm1, %v1809_v45  ;;  %v1814_v51 = vpack.c.bf16 %v970_v46, %v970_v46  ;;  %v971_v52 = vmax.f32 %v959_v47, 0.0  ;;  %v888_v53 = vpop.f32.mrb[5].mxu0  ;;  %v887_v54 = vadd.f32 %v886_v49, %v2395_v44 }
 0x180   : >> { %v889_v55 = vpop.f32.mrb[6].mxu0 }
 0x181   : >> { %1722 = vst.msk [vmem:[%s2392_s8 + $0x10] sm:$0xf] %vm916_vm1, %v1814_v51  ;;  %v1815_v56 = vpack.c.bf16 %v971_v52, %v971_v52  ;;  %v895_v57 = vmax.f32 %v887_v54, 0.0  ;;  %v890_v58 = vadd.f32 %v889_v55, %v2400_v50  ;;  %v891_v59 = vpop.f32.mrb[7].mxu0 }
 0x182   : >> { %v963_v60 = vpop.f32.mrb[4].mxu1 }
 0x183   : >> { %1723 = vst.msk [vmem:[%s2392_s8 + $0x14] sm:$0xf] %vm916_vm1, %v1815_v56  ;;  %v965_v61 = vpop.f32.mrb[5].mxu1  ;;  %v1810_v62 = vpack.c.bf16 %v895_v57, %v895_v57  ;;  %v964_v63 = vadd.f32 %v963_v60, %v2395_v44  ;;  %v896_v9 = vmax.f32 %v890_v58, 0.0 }
 0x184   : >> { %v966_v10 = vpop.f32.mrb[6].mxu1 }
 0x185   : >> { %919 = vst.msk [vmem:[%s2392_s8 + $0x8] sm:$0xf] %vm916_vm1, %v1810_v62  ;;  %v972_v11 = vmax.f32 %v964_v63, 0.0  ;;  %v968_v12 = vpop.f32.mrb[7].mxu1  ;;  %v1811_v13 = vpack.c.bf16 %v896_v9, %v896_v9  ;;  %v967_v14 = vadd.f32 %v966_v10, %v2400_v50 }
 0x187   : >> { %v1816_v15 = vpack.c.bf16 %v972_v11, %v972_v11  ;;  %920 = vst.msk [vmem:[%s2392_s8 + $0xc] sm:$0xf] %vm916_vm1, %v1811_v13  ;;  %v973_v16 = vmax.f32 %v967_v14, 0.0 }
 0x189   : >> { %1724 = vst.msk [vmem:[%s2392_s8 + $0x18] sm:$0xf] %vm916_vm1, %v1816_v15  ;;  %v1817_v18 = vpack.c.bf16 %v973_v16, %v973_v16 }
 0x18b   : >> { %1725 = vst.msk [vmem:[%s2392_s8 + $0x1c] sm:$0xf] %vm916_vm1, %v1817_v18 }
 0x19a   : >> { %v1031_v19 = vpop.f32.mrb[8].mxu0 }
 0x19b   : >> { %v1032_v20 = vadd.f32 %v1031_v19, %v2384_v30  ;;  %v1033_v21 = vpop.f32.mrb[9].mxu0 }
 0x19c   : >> { %v1034_v22 = vpop.f32.mrb[10].mxu0 }
 0x19d   : >> { %v1046_v23 = vmax.f32 %v1032_v20, 0.0  ;;  %v1035_v24 = vadd.f32 %v1034_v22, %v2386_v8  ;;  %v1036_v25 = vpop.f32.mrb[11].mxu0 }
 0x19e   : >> { %v1108_v26 = vpop.f32.mrb[8].mxu1 }
 0x19f   : >> { %v1819_v17 = vpack.c.bf16 %v1046_v23, %v1046_v23  ;;  %v1047_v27 = vmax.f32 %v1035_v24, 0.0  ;;  %v1109_v28 = vadd.f32 %v1108_v26, %v2384_v30  ;;  %v1110_v29 = vpop.f32.mrb[9].mxu1 }
 0x1a0   : >> { %v1111_v31 = vpop.f32.mrb[10].mxu1 }
 0x1a1   : >> { %1734 = vst.msk [vmem:[%s2392_s8 + $0x20] sm:$0xf] %vm916_vm1, %v1819_v17  ;;  %v1820_v32 = vpack.c.bf16 %v1047_v27, %v1047_v27  ;;  %v1123_v33 = vmax.f32 %v1109_v28, 0.0  ;;  %v1112_v34 = vadd.f32 %v1111_v31, %v2386_v8  ;;  %v1113_v35 = vpop.f32.mrb[11].mxu1 }
 0x1a2   : >> { %v1039_v36 = vpop.f32.mrb[12].mxu0 }
 0x1a3   : >> { %1735 = vst.msk [vmem:[%s2392_s8 + $0x24] sm:$0xf] %vm916_vm1, %v1820_v32  ;;  %v1824_v37 = vpack.c.bf16 %v1123_v33, %v1123_v33  ;;  %v1124_v38 = vmax.f32 %v1112_v34, 0.0  ;;  %v1040_v39 = vadd.f32 %v1039_v36, %v2395_v44  ;;  %v1041_v40 = vpop.f32.mrb[13].mxu0 }
 0x1a4   : >> { %v1042_v41 = vpop.f32.mrb[14].mxu0 }
 0x1a5   : >> { %1746 = vst.msk [vmem:[%s2392_s8 + $0x30] sm:$0xf] %vm916_vm1, %v1824_v37  ;;  %v1825_v42 = vpack.c.bf16 %v1124_v38, %v1124_v38  ;;  %v1048_v43 = vmax.f32 %v1040_v39, 0.0  ;;  %v1043_v45 = vadd.f32 %v1042_v41, %v2400_v50  ;;  %v1044_v46 = vpop.f32.mrb[15].mxu0 }
 0x1a6   : >> { %v1116_v47 = vpop.f32.mrb[12].mxu1 }
 0x1a7   : >> { %1747 = vst.msk [vmem:[%s2392_s8 + $0x34] sm:$0xf] %vm916_vm1, %v1825_v42  ;;  %v1821_v48 = vpack.c.bf16 %v1048_v43, %v1048_v43  ;;  %v1117_v49 = vadd.f32 %v1116_v47, %v2395_v44  ;;  %v1118_v51 = vpop.f32.mrb[13].mxu1  ;;  %v1049_v52 = vmax.f32 %v1043_v45, 0.0 }
 0x1a8   : >> { %v1119_v53 = vpop.f32.mrb[14].mxu1 }
 0x1a9   : >> { %1736 = vst.msk [vmem:[%s2392_s8 + $0x28] sm:$0xf] %vm916_vm1, %v1821_v48  ;;  %v1125_v54 = vmax.f32 %v1117_v49, 0.0  ;;  %v1822_v55 = vpack.c.bf16 %v1049_v52, %v1049_v52  ;;  %v1120_v56 = vadd.f32 %v1119_v53, %v2400_v50  ;;  %v1121_v57 = vpop.f32.mrb[15].mxu1 }
 0x1ab   : >> { %v1826_v58 = vpack.c.bf16 %v1125_v54, %v1125_v54  ;;  %1737 = vst.msk [vmem:[%s2392_s8 + $0x2c] sm:$0xf] %vm916_vm1, %v1822_v55  ;;  %v1126_v59 = vmax.f32 %v1120_v56, 0.0 }
 0x1ad   : >> { %1748 = vst.msk [vmem:[%s2392_s8 + $0x38] sm:$0xf] %vm916_vm1, %v1826_v58  ;;  %v1827_v60 = vpack.c.bf16 %v1126_v59, %v1126_v59 }
 0x1af   : >> { %1749 = vst.msk [vmem:[%s2392_s8 + $0x3c] sm:$0xf] %vm916_vm1, %v1827_v60 }
 0x1be   : >> { %v1185_v61 = vpop.f32.mrb[16].mxu0 }
 0x1bf   : >> { %v1186_v62 = vadd.f32 %v1185_v61, %v2384_v30  ;;  %v1187_v63 = vpop.f32.mrb[17].mxu0 }
 0x1c0   : >> { %v1188_v9 = vpop.f32.mrb[18].mxu0 }
 0x1c1   : >> { %v1200_v10 = vmax.f32 %v1186_v62, 0.0  ;;  %v1189_v11 = vadd.f32 %v1188_v9, %v2386_v8  ;;  %v1190_v12 = vpop.f32.mrb[19].mxu0 }
 0x1c2   : >> { %v1262_v13 = vpop.f32.mrb[16].mxu1 }
 0x1c3   : >> { %v1829_v14 = vpack.c.bf16 %v1200_v10, %v1200_v10  ;;  %v1201_v15 = vmax.f32 %v1189_v11, 0.0  ;;  %v1263_v16 = vadd.f32 %v1262_v13, %v2384_v30  ;;  %v1264_v18 = vpop.f32.mrb[17].mxu1 }
 0x1c4   : >> { %v1265_v19 = vpop.f32.mrb[18].mxu1 }
 0x1c5   : >> { %1758 = vst.msk [vmem:[%s2392_s8 + $0x40] sm:$0xf] %vm916_vm1, %v1829_v14  ;;  %v1830_v20 = vpack.c.bf16 %v1201_v15, %v1201_v15  ;;  %v1277_v21 = vmax.f32 %v1263_v16, 0.0  ;;  %v1266_v22 = vadd.f32 %v1265_v19, %v2386_v8  ;;  %v1267_v23 = vpop.f32.mrb[19].mxu1 }
 0x1c6   : >> { %v1193_v24 = vpop.f32.mrb[20].mxu0 }
 0x1c7   : >> { %1759 = vst.msk [vmem:[%s2392_s8 + $0x44] sm:$0xf] %vm916_vm1, %v1830_v20  ;;  %v1834_v25 = vpack.c.bf16 %v1277_v21, %v1277_v21  ;;  %v1278_v26 = vmax.f32 %v1266_v22, 0.0  ;;  %v1194_v17 = vadd.f32 %v1193_v24, %v2395_v44  ;;  %v1195_v27 = vpop.f32.mrb[21].mxu0 }
 0x1c8   : >> { %v1196_v28 = vpop.f32.mrb[22].mxu0 }
 0x1c9   : >> { %1770 = vst.msk [vmem:[%s2392_s8 + $0x50] sm:$0xf] %vm916_vm1, %v1834_v25  ;;  %v1835_v29 = vpack.c.bf16 %v1278_v26, %v1278_v26  ;;  %v1202_v31 = vmax.f32 %v1194_v17, 0.0  ;;  %v1197_v32 = vadd.f32 %v1196_v28, %v2400_v50  ;;  %v1198_v33 = vpop.f32.mrb[23].mxu0 }
 0x1ca   : >> { %v1270_v34 = vpop.f32.mrb[20].mxu1 }
 0x1cb   : >> { %1771 = vst.msk [vmem:[%s2392_s8 + $0x54] sm:$0xf] %vm916_vm1, %v1835_v29  ;;  %v1831_v35 = vpack.c.bf16 %v1202_v31, %v1202_v31  ;;  %v1271_v36 = vadd.f32 %v1270_v34, %v2395_v44  ;;  %v1272_v37 = vpop.f32.mrb[21].mxu1  ;;  %v1203_v38 = vmax.f32 %v1197_v32, 0.0 }
 0x1cc   : >> { %v1273_v39 = vpop.f32.mrb[22].mxu1 }
 0x1cd   : >> { %1760 = vst.msk [vmem:[%s2392_s8 + $0x48] sm:$0xf] %vm916_vm1, %v1831_v35  ;;  %v1279_v40 = vmax.f32 %v1271_v36, 0.0  ;;  %v1832_v41 = vpack.c.bf16 %v1203_v38, %v1203_v38  ;;  %v1274_v42 = vadd.f32 %v1273_v39, %v2400_v50  ;;  %v1275_v43 = vpop.f32.mrb[23].mxu1 }
 0x1cf   : >> { %v1836_v45 = vpack.c.bf16 %v1279_v40, %v1279_v40  ;;  %1761 = vst.msk [vmem:[%s2392_s8 + $0x4c] sm:$0xf] %vm916_vm1, %v1832_v41  ;;  %v1280_v46 = vmax.f32 %v1274_v42, 0.0 }
 0x1d1   : >> { %1772 = vst.msk [vmem:[%s2392_s8 + $0x58] sm:$0xf] %vm916_vm1, %v1836_v45  ;;  %v1837_v47 = vpack.c.bf16 %v1280_v46, %v1280_v46 }
 0x1d3   : >> { %1773 = vst.msk [vmem:[%s2392_s8 + $0x5c] sm:$0xf] %vm916_vm1, %v1837_v47 }
 0x1e2   : >> { %v1339_v48 = vpop.f32.mrb[24].mxu0 }
 0x1e3   : >> { %v1340_v49 = vadd.f32 %v1339_v48, %v2384_v30  ;;  %v1341_v51 = vpop.f32.mrb[25].mxu0 }
 0x1e4   : >> { %v1342_v52 = vpop.f32.mrb[26].mxu0 }
 0x1e5   : >> { %v1354_v53 = vmax.f32 %v1340_v49, 0.0  ;;  %v1343_v54 = vadd.f32 %v1342_v52, %v2386_v8  ;;  %v1344_v55 = vpop.f32.mrb[27].mxu0 }
 0x1e6   : >> { %v1416_v56 = vpop.f32.mrb[24].mxu1 }
 0x1e7   : >> { %v1839_v57 = vpack.c.bf16 %v1354_v53, %v1354_v53  ;;  %v1355_v58 = vmax.f32 %v1343_v54, 0.0  ;;  %v1417_v59 = vadd.f32 %v1416_v56, %v2384_v30  ;;  %v1418_v60 = vpop.f32.mrb[25].mxu1 }
 0x1e8   : >> { %v1419_v61 = vpop.f32.mrb[26].mxu1 }
 0x1e9   : >> { %1782 = vst.msk [vmem:[%s2392_s8 + $0x60] sm:$0xf] %vm916_vm1, %v1839_v57  ;;  %v1840_v62 = vpack.c.bf16 %v1355_v58, %v1355_v58  ;;  %v1431_v63 = vmax.f32 %v1417_v59, 0.0  ;;  %v1420_v9 = vadd.f32 %v1419_v61, %v2386_v8  ;;  %v1421_v10 = vpop.f32.mrb[27].mxu1 }
 0x1ea   : >> { %v1347_v11 = vpop.f32.mrb[28].mxu0 }
 0x1eb   : >> { %1783 = vst.msk [vmem:[%s2392_s8 + $0x64] sm:$0xf] %vm916_vm1, %v1840_v62  ;;  %v1844_v12 = vpack.c.bf16 %v1431_v63, %v1431_v63  ;;  %v1432_v13 = vmax.f32 %v1420_v9, 0.0  ;;  %v1348_v14 = vadd.f32 %v1347_v11, %v2395_v44  ;;  %v1349_v15 = vpop.f32.mrb[29].mxu0 }
 0x1ec   : >> { %v1350_v30 = vpop.f32.mrb[30].mxu0 }
 0x1ed   : >> { %1794 = vst.msk [vmem:[%s2392_s8 + $0x70] sm:$0xf] %vm916_vm1, %v1844_v12  ;;  %v1845_v16 = vpack.c.bf16 %v1432_v13, %v1432_v13  ;;  %v1356_v18 = vmax.f32 %v1348_v14, 0.0  ;;  %v1351_v19 = vadd.f32 %v1350_v30, %v2400_v50  ;;  %v1352_v20 = vpop.f32.mrb[31].mxu0 }
 0x1ee   : >> { %v1424_v8 = vpop.f32.mrb[28].mxu1 }
 0x1ef   : >> { %1795 = vst.msk [vmem:[%s2392_s8 + $0x74] sm:$0xf] %vm916_vm1, %v1845_v16  ;;  %v1841_v21 = vpack.c.bf16 %v1356_v18, %v1356_v18  ;;  %v1357_v22 = vmax.f32 %v1351_v19, 0.0  ;;  %v1425_v23 = vadd.f32 %v1424_v8, %v2395_v44  ;;  %v1426_v24 = vpop.f32.mrb[29].mxu1 }
 0x1f0   : >> { %v1427_v25 = vpop.f32.mrb[30].mxu1 }
 0x1f1   : >> { %1784 = vst.msk [vmem:[%s2392_s8 + $0x68] sm:$0xf] %vm916_vm1, %v1841_v21  ;;  %v1842_v26 = vpack.c.bf16 %v1357_v22, %v1357_v22  ;;  %v1433_v17 = vmax.f32 %v1425_v23, 0.0  ;;  %v1428_v27 = vadd.f32 %v1427_v25, %v2400_v50  ;;  %v1429_v28 = vpop.f32.mrb[31].mxu1  ;;  %325 = sbr.rel (!%p323_p4) target bundleno = 18 (0x12), region = 104 }
 0x1f3   : >> { %1785 = vst.msk [vmem:[%s2392_s8 + $0x6c] sm:$0xf] %vm916_vm1, %v1842_v26  ;;  %v1846_v29 = vpack.c.bf16 %v1433_v17, %v1433_v17  ;;  %v1434_v31 = vmax.f32 %v1428_v27, 0.0 }
 0x1f5   : >> { %1796 = vst.msk [vmem:[%s2392_s8 + $0x78] sm:$0xf] %vm916_vm1, %v1846_v29  ;;  %v1847_v32 = vpack.c.bf16 %v1434_v31, %v1434_v31 }
 0x1f7   : >> { %1797 = vst.msk [vmem:[%s2392_s8 + $0x7c] sm:$0xf] %vm916_vm1, %v1847_v32 }
 0x1f8 PF: > { %s16_s21 = sadd.s32 1, %s1928_s21  }
 0x1f9   : > { %p13_p5 = scmp.ge.s32.totalorder %s16_s21, 4  }
 0x1fb   :  { %15 = sbr.rel (!%p13_p5) target bundleno = 1 (0x1), region = 115 }

// kernel: custom_cnn_forward.7
= control target key start
LH: loop header
LB: loop body
LE: loop exit
PB: predicated region body
PF: predicated region fallthrough
CT: control target
= control target key end

     0   :  { %v215_v0 = vmov 0.0   ;;  %vm216_vm0 = vmmov 0   ;;  %vm20_vm1 = vcmask 1041408   ;;  %v145_v27 = vlaneseq  ;;  %s281_s2 = inlined_call_operand.vmem [shape: bf16[128,2], index: 2, kind: input, shape index: {}]   ;;  %s282_s0 = inlined_call_operand.vmem [shape: f32[2,2,128], index: 0, kind: input, shape index: {}]   ;;  %s283_s1 = inlined_call_operand.vmem [shape: f32[1,128], index: 1, kind: input, shape index: {}]   ;;  %s284_s3 = inlined_call_operand.vmem [shape: f32[1,2], index: 3, kind: input, shape index: {}]   ;;  %s285_s4 = inlined_call_operand.vmem [shape: f32[2,2], index: 4, kind: output, shape index: {}]  }
   0x1   :  { %181 = vmatprep.subr.bf16.mxu0 %v215_v0  ;;  %v203_v1 = vld [vmem:[%s281_s2] sm:$0xff]   ;;  %197 = vmatprep.mubr.msk.bf16.mxu0 %vm216_vm0, %v215_v0  ;;  %v204_v2 = vld [vmem:[%s281_s2 + $0x8] sm:$0xff]   ;;  %v205_v3 = vld [vmem:[%s281_s2 + $0x10] sm:$0xff]   ;;  %vm155_vm3 = vcmask 9216  }
   0x2   :  { %182 = vmatpush3.bf16.msra.mxu0 %v203_v1  ;;  %v206_v4 = vld [vmem:[%s281_s2 + $0x18] sm:$0xff]   ;;  %v18_v5 = vld [vmem:[%s282_s0] sm:$0x3]  ;;  %v19_v6 = vld [vmem:[%s282_s0 + $0x2] sm:$0x3]  ;;  %v146_v28 = vand.u32 127, %v145_v27 }
   0x3   :  { %183 = vmatprep.subr.bf16.mxu0 %v215_v0  ;;  %v207_v7 = vld [vmem:[%s281_s2 + $0x20] sm:$0xff]   ;;  %v21_v8 = vsel %vm20_vm1, %v18_v5, 0.0  ;;  %v22_v9 = vsel %vm20_vm1, %v19_v6, 0.0  ;;  %v208_v11 = vld [vmem:[%s281_s2 + $0x28] sm:$0xff]   ;;  %v209_v14 = vld [vmem:[%s281_s2 + $0x30] sm:$0xff]  }
   0x4   :  { %v23_v10 = vadd.f32 %v22_v9, %v21_v8  ;;  %v161_v12 = vld [vmem:[%s283_s1] ss:$0 sm:$0xff]  ;;  %v210_v16 = vld [vmem:[%s281_s2 + $0x38] sm:$0xff]   ;;  %vm147_vm2 = vcmp.eq.s32.totalorder %v146_v28, 0 }
   0x5   :  { %v162_v18 = vld [vmem:[%s284_s3] ss:$0 sm:$0xff] }
   0x6   :  { %184 = vmatpush3.bf16.msra.mxu0 %v204_v2  ;;  %v31_v13 = vadd.f32 %v161_v12, %v23_v10 }
   0x7   :  { %185 = vmatprep.subr.bf16.mxu0 %v215_v0 }
   0x8   :  { %v32_v15 = vmax.f32 %v31_v13, 0.0 }
   0xa   :  { %186 = vmatpush3.bf16.msra.mxu0 %v205_v3  ;;  %v33_v17 = vpack.c.bf16 %v32_v15, %v32_v15 }
   0xb   :  { %187 = vmatprep.subr.bf16.mxu0 %v215_v0 }
   0xe   :  { %188 = vmatpush3.bf16.msra.mxu0 %v206_v4 }
   0xf   :  { %189 = vmatprep.subr.bf16.mxu0 %v215_v0 }
  0x12   :  { %190 = vmatpush3.bf16.msra.mxu0 %v207_v7 }
  0x13   :  { %191 = vmatprep.subr.bf16.mxu0 %v215_v0 }
  0x16   :  { %192 = vmatpush3.bf16.msra.mxu0 %v208_v11 }
  0x17   :  { %193 = vmatprep.subr.bf16.mxu0 %v215_v0 }
  0x1a   :  { %194 = vmatpush3.bf16.msra.mxu0 %v209_v14 }
  0x1b   :  { %195 = vmatprep.subr.bf16.mxu0 %v215_v0 }
  0x1e   :  { %196 = vmatpush3.bf16.msra.mxu0 %v210_v16 }
  0x21   :  { %198 = vmatmul.mubr.bf16.vlgmr.msra.gmra.mrb[0].mxu0 %v33_v17 }
  0xf4   :  { %v139_v19 = vpop.f32.mrb[0].mxu0 }
  0xf5   :  { %v140_v20 = vadd.f32 %v162_v18, %v139_v19  ;;  %v199_v21 = vpop.f32.mrb[1].mxu0 }
  0xf6   :  { %v142_v22 = vpop.f32.mrb[2].mxu0 }
  0xf7   :  { %v171_v23 = vmul.f32 -1.442695, %v140_v20  ;;  %v200_v24 = vpop.f32.mrb[3].mxu0 }
  0xf9   :  { %211 = vpow2.f32 %v171_v23 }
 0x103   :  { %v212_v25 = vpop.eup %211 }
 0x104   :  { %v151_v26 = vadd.f32 1.0, %v212_v25 }
 0x106   :  { %213 = vrcp.f32 %v151_v26 }
 0x110   :  { %v214_v29 = vpop.eup %213 }
 0x111   :  { %v154_v30 = vsel %vm147_vm2, %v214_v29, %v140_v20 }
 0x112   :  { %156 = vst.msk [vmem:[%s285_s4] sm:$0x3] %vm155_vm3, %v154_v30 }

// kernel: custom_cnn_forward.6
= control target key start
LH: loop header
LB: loop body
LE: loop exit
PB: predicated region body
PF: predicated region fallthrough
CT: control target
= control target key end

     0   :  { %s4138_s9 = smov 0   ;;  %s4140_s10 = smov 0   ;;  %s4495_s0 = inlined_call_operand.vmem [shape: bf16[2,8192], index: 0, kind: input, shape index: {}]   ;;  %s4496_s1 = inlined_call_operand.vmem [shape: bf16[8192,128], index: 1, kind: input, shape index: {}]   ;;  %s4497_s2 = inlined_call_operand.vmem [shape: f32[2,2,128], index: 2, kind: output, shape index: {}]  }
   0x1   :  { %s4142_s11 = smov 0  }
   0x2 LB: > { %s24_s12 = sadd.s32 1, %s4115_s10  ;;  %p3196_p0 = scmp.ge.s32.totalorder %s4119_s11, 1  ;;  %s4119_s11 = sphi %s4142_s11, %s12_s11   ;;  %s4115_s10 = sphi %s4140_s10, %s4499_s10   ;;  %s4111_s9 = sphi %s4138_s9, %s4498_s9  }
   0x3   : > { %p26_p1 = scmp.ge.s32.totalorder %s24_s12, 2  ;;  %p143_p2 = scmp.lt.s32.totalorder %s4119_s11, 3 }
   0x5   : > { %s4501_s12 = smov (%p26_p1, %s24_s12), 0  ;;  %p144_p3 = pnand %p3196_p0, %p143_p2 }
   0x6   : > { %s3198_s13 = sshll.u32 (!%p144_p3), %s4111_s9, 9  ;;  %s3197_s18 = sshll.u32 (!%p144_p3), %s4111_s9, 5  ;;  %v720_v21 = vlaneseq (!%p144_p3)  ;;  %v4121_v23 = vmov (!%p144_p3), 1966171168  }
   0x7   : > { %147 = sbr.rel (%p144_p3) target bundleno = 497 (0x1f1), region = 28  ;;  %p179_p4 = scmp.lt.s32.totalorder (!%p144_p3), %s3198_s13, 1023  ;;  %v718_v24 = vunpack.c.l.s4 (!%p144_p3), %v4121_v23 }
   0x8   : > { %p172_p5 = scmp.lt.s32.totalorder (!%p144_p3), %s3197_s18, 63  ;;  %v721_v28 = vshrl.u32 (!%p144_p3), %v720_v21, 7  ;;  %p185_p6 = scmp.lt.s32.totalorder (!%p144_p3), %s4111_s9, 1 }
   0x9   : > { %v719_v30 = vunpack.c.0.s8 (!%p144_p3), %v718_v24 }
   0xb   : > { %v4200_v35 = vsub.s32 (!%p144_p3), %v719_v30, %v721_v28 }
   0xe   : > { %s4503_s13 = smov (!%p179_p4, %s3198_s13), 1023  ;;  %s4505_s18 = smov (!%p172_p5, %s3197_s18), 63 }
   0xf   : > { %s3199_s14 = sshll.u32 %s4503_s13, 2  ;;  %s4198_s21 = scalar_lea.vmem %s4495_s0, %s4505_s18 }
  0x10   : > { %s4162_s17 = scalar_lea.vmem %s4496_s1, %s3199_s14  ;;  %v196_v38 = vld [vmem:[%s4198_s21] sm:$0xff]  ;;  %s4507_s9 = smov (!%p185_p6, %s4111_s9), 1 }
  0x11   : > { %v3837_v0 = vld [vmem:[%s4162_s17 + $0x40] sm:$0xff]   ;;  %v3841_v4 = vld [vmem:[%s4162_s17 + $0x48] sm:$0xff]   ;;  %v3845_v8 = vld [vmem:[%s4162_s17 + $0x50] sm:$0xff]   ;;  %v716_v39 = vcombine.high %v196_v38, %v196_v38  ;;  %v723_v40 = vrot.slane %v196_v38, %v4200_v35  ;;  %s3200_s22 = sshll.u32 %s4507_s9, 1 }
  0x12   : > { %v3838_v1 = vld [vmem:[%s4162_s17 + $0xc0] sm:$0xff]   ;;  %3459 = vmatprep.subr.bf16.mxu0 %v3837_v0  ;;  %v3842_v5 = vld [vmem:[%s4162_s17 + $0xc8] sm:$0xff]   ;;  %v3846_v9 = vld [vmem:[%s4162_s17 + $0xd0] sm:$0xff]   ;;  %s4481_s25 = scalar_lea.vmem %s4497_s2, %s3200_s22 }
  0x13   : > { %v3839_v2 = vld [vmem:[%s4162_s17] sm:$0xff]   ;;  %3481 = vmatprep.subr.bf16.mxu1 %v3838_v1  ;;  %v3843_v6 = vld [vmem:[%s4162_s17 + $0x8] sm:$0xff]   ;;  %v3847_v10 = vld [vmem:[%s4162_s17 + $0x10] sm:$0xff]   ;;  %v731_v43 = vcombine.high %v723_v40, %v723_v40  ;;  %v739_v44 = vrot.slane %v723_v40, %v4200_v35  ;;  %v4210_v45 = vrot.slane %v716_v39, %v4200_v35 }
  0x14   : > { %v3840_v3 = vld [vmem:[%s4162_s17 + $0x80] sm:$0xff]   ;;  %3460 = vmatpush3.bf16.msra.mxu0 %v3839_v2  ;;  %v3844_v7 = vld [vmem:[%s4162_s17 + $0x88] sm:$0xff]   ;;  %v3848_v11 = vld [vmem:[%s4162_s17 + $0x90] sm:$0xff]  }
  0x15   : > { %3482 = vmatpush3.bf16.msra.mxu1 %v3840_v3  ;;  %3461 = vmatprep.subr.bf16.mxu0 %v3841_v4  ;;  %v3849_v12 = vld [vmem:[%s4162_s17 + $0x58] sm:$0xff]   ;;  %v3853_v16 = vld [vmem:[%s4162_s17 + $0x60] sm:$0xff]   ;;  %v3857_v20 = vld [vmem:[%s4162_s17 + $0x68] sm:$0xff]   ;;  %v753_v47 = vrot.slane %v731_v43, %v4200_v35  ;;  %v732_v49 = vcombine.high %v4210_v45, %v4210_v45  ;;  %v761_v50 = vcombine.high %v739_v44, %v739_v44 }
  0x16   : > { %3483 = vmatprep.subr.bf16.mxu1 %v3842_v5  ;;  %v3850_v13 = vld [vmem:[%s4162_s17 + $0xd8] sm:$0xff]   ;;  %v3854_v17 = vld [vmem:[%s4162_s17 + $0xe0] sm:$0xff]   ;;  %v3858_v22 = vld [vmem:[%s4162_s17 + $0xe8] sm:$0xff]  }
  0x17   : > { %v3851_v14 = vld [vmem:[%s4162_s17 + $0x18] sm:$0xff]   ;;  %v3855_v18 = vld [vmem:[%s4162_s17 + $0x20] sm:$0xff]   ;;  %v3859_v25 = vld [vmem:[%s4162_s17 + $0x28] sm:$0xff]   ;;  %2512 = vmatprep.mubr.bf16.mxu0 %v753_v47  ;;  %v763_v52 = vcombine.high %v753_v47, %v753_v47  ;;  %v760_v54 = vrot.slane %v732_v49, %v4200_v35 }
  0x18   : > { %3462 = vmatpush3.bf16.msra.mxu0 %v3843_v6  ;;  %v3852_v15 = vld [vmem:[%s4162_s17 + $0x98] sm:$0xff]   ;;  %v3856_v19 = vld [vmem:[%s4162_s17 + $0xa0] sm:$0xff]   ;;  %v3860_v26 = vld [vmem:[%s4162_s17 + $0xa8] sm:$0xff]  }
  0x19   : > { %3484 = vmatpush3.bf16.msra.mxu1 %v3844_v7  ;;  %3463 = vmatprep.subr.bf16.mxu0 %v3845_v8  ;;  %v3861_v27 = vld [vmem:[%s4162_s17 + $0x70] sm:$0xff]   ;;  %v3865_v33 = vld [vmem:[%s4162_s17 + $0x78] sm:$0xff]   ;;  %v3870_v41 = vld [vmem:[%s4162_s17 + $0x140] sm:$0xff]   ;;  %v764_v57 = vcombine.high %v760_v54, %v760_v54 }
  0x1a   : > { %3485 = vmatprep.subr.bf16.mxu1 %v3846_v9  ;;  %v3862_v29 = vld [vmem:[%s4162_s17 + $0xf0] sm:$0xff]   ;;  %v3866_v34 = vld [vmem:[%s4162_s17 + $0xf8] sm:$0xff]   ;;  %v3871_v42 = vld [vmem:[%s4162_s17 + $0x1c0] sm:$0xff]   ;;  %2552 = vmatprep.mubr.bf16.mxu1 %v763_v52 }
  0x1b   : > { %v3863_v31 = vld [vmem:[%s4162_s17 + $0x30] sm:$0xff]   ;;  %v3867_v36 = vld [vmem:[%s4162_s17 + $0x38] sm:$0xff]   ;;  %v3872_v46 = vld [vmem:[%s4162_s17 + $0x100] sm:$0xff]  }
  0x1c   : > { %3464 = vmatpush3.bf16.msra.mxu0 %v3847_v10  ;;  %v3864_v32 = vld [vmem:[%s4162_s17 + $0xb0] sm:$0xff]   ;;  %v3868_v37 = vld [vmem:[%s4162_s17 + $0xb8] sm:$0xff]   ;;  %v3873_v48 = vld [vmem:[%s4162_s17 + $0x180] sm:$0xff]  }
  0x1d   : > { %3486 = vmatpush3.bf16.msra.mxu1 %v3848_v11  ;;  %3465 = vmatprep.subr.bf16.mxu0 %v3849_v12  ;;  %v3874_v51 = vld [vmem:[%s4162_s17 + $0x148] sm:$0xff]   ;;  %v3878_v58 = vld [vmem:[%s4162_s17 + $0x150] sm:$0xff]   ;;  %v3882_v62 = vld [vmem:[%s4162_s17 + $0x158] sm:$0xff]  }
  0x1e   : > { %3487 = vmatprep.subr.bf16.mxu1 %v3850_v13  ;;  %v3875_v53 = vld [vmem:[%s4162_s17 + $0x1c8] sm:$0xff]   ;;  %v3879_v59 = vld [vmem:[%s4162_s17 + $0x1d0] sm:$0xff]   ;;  %v3883_v63 = vld [vmem:[%s4162_s17 + $0x1d8] sm:$0xff]  }
  0x1f   : > { %v3876_v55 = vld [vmem:[%s4162_s17 + $0x108] sm:$0xff]   ;;  %v3880_v60 = vld [vmem:[%s4162_s17 + $0x110] sm:$0xff]   ;;  %v3884_v0 = vld [vmem:[%s4162_s17 + $0x118] sm:$0xff]  }
  0x20   : > { %3466 = vmatpush3.bf16.msra.mxu0 %v3851_v14  ;;  %v3877_v56 = vld [vmem:[%s4162_s17 + $0x188] sm:$0xff]   ;;  %v3881_v61 = vld [vmem:[%s4162_s17 + $0x190] sm:$0xff]   ;;  %v3885_v1 = vld [vmem:[%s4162_s17 + $0x198] sm:$0xff]  }
  0x21   : > { %3488 = vmatpush3.bf16.msra.mxu1 %v3852_v15  ;;  %3467 = vmatprep.subr.bf16.mxu0 %v3853_v16  ;;  %v3886_v2 = vld [vmem:[%s4162_s17 + $0x160] sm:$0xff]   ;;  %v3890_v6 = vld [vmem:[%s4162_s17 + $0x168] sm:$0xff]   ;;  %v3894_v10 = vld [vmem:[%s4162_s17 + $0x170] sm:$0xff]  }
  0x22   : > { %3489 = vmatprep.subr.bf16.mxu1 %v3854_v17  ;;  %v3887_v3 = vld [vmem:[%s4162_s17 + $0x1e0] sm:$0xff]   ;;  %v3891_v7 = vld [vmem:[%s4162_s17 + $0x1e8] sm:$0xff]   ;;  %v3895_v11 = vld [vmem:[%s4162_s17 + $0x1f0] sm:$0xff]  }
  0x23   : > { %v3888_v4 = vld [vmem:[%s4162_s17 + $0x120] sm:$0xff]   ;;  %v3892_v8 = vld [vmem:[%s4162_s17 + $0x128] sm:$0xff]   ;;  %v3896_v12 = vld [vmem:[%s4162_s17 + $0x130] sm:$0xff]  }
  0x24   : > { %3468 = vmatpush3.bf16.msra.mxu0 %v3855_v18  ;;  %v3889_v5 = vld [vmem:[%s4162_s17 + $0x1a0] sm:$0xff]   ;;  %v3893_v9 = vld [vmem:[%s4162_s17 + $0x1a8] sm:$0xff]   ;;  %v3897_v13 = vld [vmem:[%s4162_s17 + $0x1b0] sm:$0xff]   ;;  %v746_v18 = vrot.slane %v4210_v45, %v4200_v35 }
  0x25   : > { %3490 = vmatpush3.bf16.msra.mxu1 %v3856_v19  ;;  %3469 = vmatprep.subr.bf16.mxu0 %v3857_v20  ;;  %v3898_v14 = vld [vmem:[%s4162_s17 + $0x178] sm:$0xff]   ;;  %v3902_v19 = vld [vmem:[%s4162_s17 + $0x240] sm:$0xff]   ;;  %v3906_v24 = vld [vmem:[%s4162_s17 + $0x248] sm:$0xff]  }
  0x26   : > { %3491 = vmatprep.subr.bf16.mxu1 %v3858_v22  ;;  %v3899_v15 = vld [vmem:[%s4162_s17 + $0x1f8] sm:$0xff]   ;;  %v3903_v20 = vld [vmem:[%s4162_s17 + $0x2c0] sm:$0xff]   ;;  %v762_v23 = vcombine.high %v746_v18, %v746_v18  ;;  %v3910_v28 = vld [vmem:[%s4162_s17 + $0x250] sm:$0xff]  }
  0x27   : > { %v3900_v16 = vld [vmem:[%s4162_s17 + $0x138] sm:$0xff]   ;;  %v3904_v21 = vld [vmem:[%s4162_s17 + $0x200] sm:$0xff]   ;;  %v3912_v30 = vld [vmem:[%s4162_s17 + $0x210] sm:$0xff]  }
  0x28   : > { %3470 = vmatpush3.bf16.msra.mxu0 %v3859_v25  ;;  %v3901_v17 = vld [vmem:[%s4162_s17 + $0x1b8] sm:$0xff]   ;;  %v3905_v22 = vld [vmem:[%s4162_s17 + $0x280] sm:$0xff]   ;;  %v3907_v25 = vld [vmem:[%s4162_s17 + $0x2c8] sm:$0xff]  }
  0x29   : > { %3492 = vmatpush3.bf16.msra.mxu1 %v3860_v26  ;;  %3471 = vmatprep.subr.bf16.mxu0 %v3861_v27  ;;  %v3908_v26 = vld [vmem:[%s4162_s17 + $0x208] sm:$0xff]   ;;  %v3919_v38 = vld [vmem:[%s4162_s17 + $0x2e0] sm:$0xff]   ;;  %v3926_v45 = vld [vmem:[%s4162_s17 + $0x270] sm:$0xff]  }
  0x2a   : > { %3493 = vmatprep.subr.bf16.mxu1 %v3862_v29  ;;  %v3909_v27 = vld [vmem:[%s4162_s17 + $0x288] sm:$0xff]   ;;  %v3911_v29 = vld [vmem:[%s4162_s17 + $0x2d0] sm:$0xff]   ;;  %v3920_v39 = vld [vmem:[%s4162_s17 + $0x220] sm:$0xff]  }
  0x2b   : > { %v3921_v40 = vld [vmem:[%s4162_s17 + $0x2a0] sm:$0xff]   ;;  %v3924_v43 = vld [vmem:[%s4162_s17 + $0x228] sm:$0xff]   ;;  %v3928_v47 = vld [vmem:[%s4162_s17 + $0x230] sm:$0xff]  }
  0x2c   : > { %3472 = vmatpush3.bf16.msra.mxu0 %v3863_v31  ;;  %v3913_v31 = vld [vmem:[%s4162_s17 + $0x290] sm:$0xff]   ;;  %v3930_v49 = vld [vmem:[%s4162_s17 + $0x278] sm:$0xff]   ;;  %v197_v52 = vld [vmem:[%s4198_s21 + $0x8] sm:$0xff] }
  0x2d   : > { %3494 = vmatpush3.bf16.msra.mxu1 %v3864_v32  ;;  %3473 = vmatprep.subr.bf16.mxu0 %v3865_v33  ;;  %v3914_v32 = vld [vmem:[%s4162_s17 + $0x258] sm:$0xff]  }
  0x2e   : > { %3495 = vmatprep.subr.bf16.mxu1 %v3866_v34  ;;  %v3915_v33 = vld [vmem:[%s4162_s17 + $0x2d8] sm:$0xff]  }
  0x2f   : > { %v3916_v34 = vld [vmem:[%s4162_s17 + $0x218] sm:$0xff]  }
  0x30   : > { %3474 = vmatpush3.bf16.msra.mxu0 %v3867_v36  ;;  %v3917_v36 = vld [vmem:[%s4162_s17 + $0x298] sm:$0xff]  }
  0x31   : > { %3496 = vmatpush3.bf16.msra.mxu1 %v3868_v37  ;;  %3503 = vmatprep.subr.bf16.mxu0 %v3870_v41  ;;  %v3918_v37 = vld [vmem:[%s4162_s17 + $0x260] sm:$0xff]   ;;  %v3922_v41 = vld [vmem:[%s4162_s17 + $0x268] sm:$0xff]  }
  0x32   : > { %3525 = vmatprep.subr.bf16.mxu1 %v3871_v42  ;;  %v3923_v42 = vld [vmem:[%s4162_s17 + $0x2e8] sm:$0xff]  }
  0x33   : > { %2513 = vmatmul.mubr.bf16.vlgmr.msra.gmra.mrb[0].mxu0 %v739_v44  ;;  %v3925_v44 = vld [vmem:[%s4162_s17 + $0x2a8] sm:$0xff]  }
  0x34   : > { %3504 = vmatpush3.bf16.msra.mxu0 %v3872_v46  ;;  %2553 = vmatmul.mubr.bf16.vlgmr.msra.gmra.mrb[0].mxu1 %v761_v50  ;;  %v3927_v46 = vld [vmem:[%s4162_s17 + $0x2f0] sm:$0xff]   ;;  %v3931_v50 = vld [vmem:[%s4162_s17 + $0x2f8] sm:$0xff]  }
  0x35   : > { %3505 = vmatprep.subr.bf16.mxu0 %v3874_v51  ;;  %3526 = vmatpush3.bf16.msra.mxu1 %v3873_v48  ;;  %v3929_v48 = vld [vmem:[%s4162_s17 + $0x2b0] sm:$0xff]   ;;  %v3932_v51 = vld [vmem:[%s4162_s17 + $0x238] sm:$0xff]  }
  0x36   : > { %2592 = vmatprep.mubr.bf16.mxu0 %v760_v54  ;;  %3527 = vmatprep.subr.bf16.mxu1 %v3875_v53  ;;  %v3933_v53 = vld [vmem:[%s4162_s17 + $0x2b8] sm:$0xff]   ;;  %v772_v54 = vrot.slane %v197_v52, %v4200_v35 }
  0x37   : > { %2632 = vmatprep.mubr.bf16.mxu1 %v764_v57 }
  0x38   : > { %3506 = vmatpush3.bf16.msra.mxu0 %v3876_v55  ;;  %v765_v55 = vcombine.high %v197_v52, %v197_v52  ;;  %v780_v57 = vcombine.high %v772_v54, %v772_v54  ;;  %v3983_v52 = vld [vmem:[%s4162_s17 + $0x460] sm:$0xff]  }
  0x39   : > { %3507 = vmatprep.subr.bf16.mxu0 %v3878_v58  ;;  %3528 = vmatpush3.bf16.msra.mxu1 %v3877_v56  ;;  %v3934_v56 = vld [vmem:[%s4162_s17 + $0x340] sm:$0xff]   ;;  %v788_v58 = vrot.slane %v772_v54, %v4200_v35 }
  0x3a   : > { %3529 = vmatprep.subr.bf16.mxu1 %v3879_v59  ;;  %v3935_v59 = vld [vmem:[%s4162_s17 + $0x3c0] sm:$0xff]  }
  0x3b   : > { %v3985_v54 = vld [vmem:[%s4162_s17 + $0x420] sm:$0xff]  }
  0x3c   : > { %3508 = vmatpush3.bf16.msra.mxu0 %v3880_v60  ;;  %v4286_v60 = vrot.slane %v765_v55, %v4200_v35  ;;  %v3986_v55 = vld [vmem:[%s4162_s17 + $0x4a0] sm:$0xff]  }
  0x3d   : > { %3509 = vmatprep.subr.bf16.mxu0 %v3882_v62  ;;  %3530 = vmatpush3.bf16.msra.mxu1 %v3881_v61  ;;  %v3936_v61 = vld [vmem:[%s4162_s17 + $0x300] sm:$0xff]   ;;  %v802_v62 = vrot.slane %v780_v57, %v4200_v35  ;;  %v3988_v57 = vld [vmem:[%s4162_s17 + $0x4e8] sm:$0xff]  }
  0x3e   : > { %3531 = vmatprep.subr.bf16.mxu1 %v3883_v63  ;;  %v3937_v63 = vld [vmem:[%s4162_s17 + $0x380] sm:$0xff]  }
  0x40   : > { %3510 = vmatpush3.bf16.msra.mxu0 %v3884_v0  ;;  %v781_v0 = vcombine.high %v4286_v60, %v4286_v60 }
  0x41   : > { %3511 = vmatprep.subr.bf16.mxu0 %v3886_v2  ;;  %3532 = vmatpush3.bf16.msra.mxu1 %v3885_v1  ;;  %v810_v1 = vcombine.high %v788_v58, %v788_v58  ;;  %v3938_v2 = vld [vmem:[%s4162_s17 + $0x348] sm:$0xff]  }
  0x42   : > { %3533 = vmatprep.subr.bf16.mxu1 %v3887_v3  ;;  %v812_v3 = vcombine.high %v802_v62, %v802_v62 }
  0x44   : > { %3512 = vmatpush3.bf16.msra.mxu0 %v3888_v4  ;;  %v3939_v4 = vld [vmem:[%s4162_s17 + $0x3c8] sm:$0xff]  }
  0x45   : > { %3513 = vmatprep.subr.bf16.mxu0 %v3890_v6  ;;  %3534 = vmatpush3.bf16.msra.mxu1 %v3889_v5  ;;  %v809_v5 = vrot.slane %v781_v0, %v4200_v35  ;;  %v3940_v6 = vld [vmem:[%s4162_s17 + $0x308] sm:$0xff]   ;;  %v3995_v0 = vld [vmem:[%s4162_s17 + $0x478] sm:$0xff]  }
  0x46   : > { %3535 = vmatprep.subr.bf16.mxu1 %v3891_v7  ;;  %v3941_v7 = vld [vmem:[%s4162_s17 + $0x388] sm:$0xff]  }
  0x48   : > { %3514 = vmatpush3.bf16.msra.mxu0 %v3892_v8  ;;  %v813_v8 = vcombine.high %v809_v5, %v809_v5 }
  0x49   : > { %3515 = vmatprep.subr.bf16.mxu0 %v3894_v10  ;;  %3536 = vmatpush3.bf16.msra.mxu1 %v3893_v9  ;;  %v3942_v9 = vld [vmem:[%s4162_s17 + $0x350] sm:$0xff]  }
  0x4a   : > { %3537 = vmatprep.subr.bf16.mxu1 %v3895_v11  ;;  %v3943_v10 = vld [vmem:[%s4162_s17 + $0x3d0] sm:$0xff]  }
  0x4b   : > { %v3944_v11 = vld [vmem:[%s4162_s17 + $0x310] sm:$0xff]  }
  0x4c   : > { %3516 = vmatpush3.bf16.msra.mxu0 %v3896_v12  ;;  %v3945_v12 = vld [vmem:[%s4162_s17 + $0x390] sm:$0xff]  }
  0x4d   : > { %3517 = vmatprep.subr.bf16.mxu0 %v3898_v14  ;;  %3538 = vmatpush3.bf16.msra.mxu1 %v3897_v13  ;;  %v3946_v13 = vld [vmem:[%s4162_s17 + $0x358] sm:$0xff]  }
  0x4e   : > { %3539 = vmatprep.subr.bf16.mxu1 %v3899_v15  ;;  %v3947_v14 = vld [vmem:[%s4162_s17 + $0x3d8] sm:$0xff]  }
  0x4f   : > { %v3948_v15 = vld [vmem:[%s4162_s17 + $0x318] sm:$0xff]  }
  0x50   : > { %3518 = vmatpush3.bf16.msra.mxu0 %v3900_v16  ;;  %v3949_v16 = vld [vmem:[%s4162_s17 + $0x398] sm:$0xff]  }
  0x51   : > { %3547 = vmatprep.subr.bf16.mxu0 %v3902_v19  ;;  %3540 = vmatpush3.bf16.msra.mxu1 %v3901_v17  ;;  %v3950_v17 = vld [vmem:[%s4162_s17 + $0x360] sm:$0xff]  }
  0x52   : > { %3569 = vmatprep.subr.bf16.mxu1 %v3903_v20  ;;  %v3952_v19 = vld [vmem:[%s4162_s17 + $0x320] sm:$0xff]  }
  0x53   : > { %2593 = vmatmul.mubr.bf16.vlgmr.msra.gmra.mrb[4].mxu0 %v746_v18  ;;  %v3951_v18 = vld [vmem:[%s4162_s17 + $0x3e0] sm:$0xff]  }
  0x54   : > { %3548 = vmatpush3.bf16.msra.mxu0 %v3904_v21  ;;  %2633 = vmatmul.mubr.bf16.vlgmr.msra.gmra.mrb[4].mxu1 %v762_v23  ;;  %v3953_v20 = vld [vmem:[%s4162_s17 + $0x3a0] sm:$0xff]   ;;  %v3954_v21 = vld [vmem:[%s4162_s17 + $0x368] sm:$0xff]  }
  0x55   : > { %3549 = vmatprep.subr.bf16.mxu0 %v3906_v24  ;;  %3570 = vmatpush3.bf16.msra.mxu1 %v3905_v22  ;;  %v3955_v22 = vld [vmem:[%s4162_s17 + $0x3e8] sm:$0xff]  }
  0x56   : > { %3571 = vmatprep.subr.bf16.mxu1 %v3907_v25  ;;  %2672 = vmatprep.mubr.bf16.mxu0 %v802_v62  ;;  %v3956_v23 = vld [vmem:[%s4162_s17 + $0x328] sm:$0xff]   ;;  %v3958_v25 = vld [vmem:[%s4162_s17 + $0x370] sm:$0xff]  }
  0x57   : > { %2712 = vmatprep.mubr.bf16.mxu1 %v812_v3  ;;  %v3957_v24 = vld [vmem:[%s4162_s17 + $0x3a8] sm:$0xff]   ;;  %v3993_v62 = vld [vmem:[%s4162_s17 + $0x430] sm:$0xff]  }
  0x58   : > { %3550 = vmatpush3.bf16.msra.mxu0 %v3908_v26  ;;  %v3959_v26 = vld [vmem:[%s4162_s17 + $0x3f0] sm:$0xff]  }
  0x59   : > { %3551 = vmatprep.subr.bf16.mxu0 %v3910_v28  ;;  %3572 = vmatpush3.bf16.msra.mxu1 %v3909_v27  ;;  %v3960_v27 = vld [vmem:[%s4162_s17 + $0x330] sm:$0xff]  }
  0x5a   : > { %3573 = vmatprep.subr.bf16.mxu1 %v3911_v29  ;;  %v3961_v28 = vld [vmem:[%s4162_s17 + $0x3b0] sm:$0xff]   ;;  %v3962_v29 = vld [vmem:[%s4162_s17 + $0x378] sm:$0xff]  }
  0x5b   : > { %v198_v3 = vld [vmem:[%s4198_s21 + $0x10] sm:$0xff] }
  0x5c   : > { %3552 = vmatpush3.bf16.msra.mxu0 %v3912_v30  ;;  %v3963_v30 = vld [vmem:[%s4162_s17 + $0x3f8] sm:$0xff]  }
  0x5d   : > { %3553 = vmatprep.subr.bf16.mxu0 %v3914_v32  ;;  %3574 = vmatpush3.bf16.msra.mxu1 %v3913_v31  ;;  %v3964_v31 = vld [vmem:[%s4162_s17 + $0x338] sm:$0xff]  }
  0x5e   : > { %3575 = vmatprep.subr.bf16.mxu1 %v3915_v33  ;;  %v3965_v32 = vld [vmem:[%s4162_s17 + $0x3b8] sm:$0xff]   ;;  %v795_v33 = vrot.slane %v4286_v60, %v4200_v35  ;;  %v3991_v60 = vld [vmem:[%s4162_s17 + $0x470] sm:$0xff]  }
  0x60   : > { %3554 = vmatpush3.bf16.msra.mxu0 %v3916_v34  ;;  %v3967_v34 = vld [vmem:[%s4162_s17 + $0x440] sm:$0xff]  }
  0x61   : > { %3555 = vmatprep.subr.bf16.mxu0 %v3918_v37  ;;  %3576 = vmatpush3.bf16.msra.mxu1 %v3917_v36  ;;  %v3968_v36 = vld [vmem:[%s4162_s17 + $0x4c0] sm:$0xff]  }
  0x62   : > { %3577 = vmatprep.subr.bf16.mxu1 %v3919_v38  ;;  %v3969_v37 = vld [vmem:[%s4162_s17 + $0x400] sm:$0xff]  }
  0x63   : > { %v3970_v38 = vld [vmem:[%s4162_s17 + $0x480] sm:$0xff]  }
  0x64   : > { %3556 = vmatpush3.bf16.msra.mxu0 %v3920_v39  ;;  %v811_v39 = vcombine.high %v795_v33, %v795_v33 }
  0x65   : > { %3557 = vmatprep.subr.bf16.mxu0 %v3922_v41  ;;  %3578 = vmatpush3.bf16.msra.mxu1 %v3921_v40  ;;  %v3971_v40 = vld [vmem:[%s4162_s17 + $0x448] sm:$0xff]  }
  0x66   : > { %3579 = vmatprep.subr.bf16.mxu1 %v3923_v42  ;;  %v3972_v41 = vld [vmem:[%s4162_s17 + $0x4c8] sm:$0xff]  }
  0x67   : > { %v3973_v42 = vld [vmem:[%s4162_s17 + $0x408] sm:$0xff]  }
  0x68   : > { %3558 = vmatpush3.bf16.msra.mxu0 %v3924_v43  ;;  %v3974_v43 = vld [vmem:[%s4162_s17 + $0x488] sm:$0xff]  }
  0x69   : > { %3559 = vmatprep.subr.bf16.mxu0 %v3926_v45  ;;  %3580 = vmatpush3.bf16.msra.mxu1 %v3925_v44  ;;  %v3975_v44 = vld [vmem:[%s4162_s17 + $0x450] sm:$0xff]  }
  0x6a   : > { %3581 = vmatprep.subr.bf16.mxu1 %v3927_v46  ;;  %v3976_v45 = vld [vmem:[%s4162_s17 + $0x4d0] sm:$0xff]  }
  0x6b   : > { %v3977_v46 = vld [vmem:[%s4162_s17 + $0x410] sm:$0xff]  }
  0x6c   : > { %3560 = vmatpush3.bf16.msra.mxu0 %v3928_v47  ;;  %v3978_v47 = vld [vmem:[%s4162_s17 + $0x490] sm:$0xff]  }
  0x6d   : > { %3561 = vmatprep.subr.bf16.mxu0 %v3930_v49  ;;  %3582 = vmatpush3.bf16.msra.mxu1 %v3929_v48  ;;  %v3979_v48 = vld [vmem:[%s4162_s17 + $0x458] sm:$0xff]  }
  0x6e   : > { %3583 = vmatprep.subr.bf16.mxu1 %v3931_v50  ;;  %v3980_v49 = vld [vmem:[%s4162_s17 + $0x4d8] sm:$0xff]  }
  0x6f   : > { %v3981_v50 = vld [vmem:[%s4162_s17 + $0x418] sm:$0xff]  }
  0x70   : > { %3562 = vmatpush3.bf16.msra.mxu0 %v3932_v51  ;;  %v3982_v51 = vld [vmem:[%s4162_s17 + $0x498] sm:$0xff]  }
  0x71   : > { %3591 = vmatprep.subr.bf16.mxu0 %v3934_v56  ;;  %3584 = vmatpush3.bf16.msra.mxu1 %v3933_v53  ;;  %v3984_v53 = vld [vmem:[%s4162_s17 + $0x4e0] sm:$0xff]   ;;  %v3987_v56 = vld [vmem:[%s4162_s17 + $0x468] sm:$0xff]  }
  0x72   : > { %3613 = vmatprep.subr.bf16.mxu1 %v3935_v59  ;;  %v3990_v59 = vld [vmem:[%s4162_s17 + $0x4a8] sm:$0xff]  }
  0x73   : > { %2673 = vmatmul.mubr.bf16.vlgmr.msra.gmra.mrb[8].mxu0 %v788_v58  ;;  %v3989_v58 = vld [vmem:[%s4162_s17 + $0x428] sm:$0xff]  }
  0x74   : > { %3592 = vmatpush3.bf16.msra.mxu0 %v3936_v61  ;;  %2713 = vmatmul.mubr.bf16.vlgmr.msra.gmra.mrb[8].mxu1 %v810_v1  ;;  %v3992_v61 = vld [vmem:[%s4162_s17 + $0x4f0] sm:$0xff]   ;;  %v3996_v1 = vld [vmem:[%s4162_s17 + $0x4f8] sm:$0xff]  }
  0x75   : > { %3593 = vmatprep.subr.bf16.mxu0 %v3938_v2  ;;  %3614 = vmatpush3.bf16.msra.mxu1 %v3937_v63  ;;  %v3994_v63 = vld [vmem:[%s4162_s17 + $0x4b0] sm:$0xff]   ;;  %v3997_v2 = vld [vmem:[%s4162_s17 + $0x438] sm:$0xff]  }
  0x76   : > { %2752 = vmatprep.mubr.bf16.mxu0 %v809_v5  ;;  %3615 = vmatprep.subr.bf16.mxu1 %v3939_v4  ;;  %v3998_v4 = vld [vmem:[%s4162_s17 + $0x4b8] sm:$0xff]   ;;  %v821_v5 = vrot.slane %v198_v3, %v4200_v35 }
  0x77   : > { %2792 = vmatprep.mubr.bf16.mxu1 %v813_v8 }
  0x78   : > { %3594 = vmatpush3.bf16.msra.mxu0 %v3940_v6  ;;  %v814_v6 = vcombine.high %v198_v3, %v198_v3  ;;  %v829_v8 = vcombine.high %v821_v5, %v821_v5  ;;  %v4048_v3 = vld [vmem:[%s4162_s17 + $0x660] sm:$0xff]  }
  0x79   : > { %3595 = vmatprep.subr.bf16.mxu0 %v3942_v9  ;;  %3616 = vmatpush3.bf16.msra.mxu1 %v3941_v7  ;;  %v3999_v7 = vld [vmem:[%s4162_s17 + $0x540] sm:$0xff]   ;;  %v837_v9 = vrot.slane %v821_v5, %v4200_v35 }
  0x7a   : > { %3617 = vmatprep.subr.bf16.mxu1 %v3943_v10  ;;  %v4000_v10 = vld [vmem:[%s4162_s17 + $0x5c0] sm:$0xff]  }
  0x7b   : > { %v4050_v5 = vld [vmem:[%s4162_s17 + $0x620] sm:$0xff]  }
  0x7c   : > { %3596 = vmatpush3.bf16.msra.mxu0 %v3944_v11  ;;  %v4362_v11 = vrot.slane %v814_v6, %v4200_v35  ;;  %v4051_v6 = vld [vmem:[%s4162_s17 + $0x6a0] sm:$0xff]  }
  0x7d   : > { %3597 = vmatprep.subr.bf16.mxu0 %v3946_v13  ;;  %3618 = vmatpush3.bf16.msra.mxu1 %v3945_v12  ;;  %v4001_v12 = vld [vmem:[%s4162_s17 + $0x500] sm:$0xff]   ;;  %v851_v13 = vrot.slane %v829_v8, %v4200_v35  ;;  %v4053_v8 = vld [vmem:[%s4162_s17 + $0x6e8] sm:$0xff]  }
  0x7e   : > { %3619 = vmatprep.subr.bf16.mxu1 %v3947_v14  ;;  %v4002_v14 = vld [vmem:[%s4162_s17 + $0x580] sm:$0xff]  }
  0x80   : > { %3598 = vmatpush3.bf16.msra.mxu0 %v3948_v15  ;;  %v830_v15 = vcombine.high %v4362_v11, %v4362_v11 }
  0x81   : > { %3599 = vmatprep.subr.bf16.mxu0 %v3950_v17  ;;  %3620 = vmatpush3.bf16.msra.mxu1 %v3949_v16  ;;  %v859_v16 = vcombine.high %v837_v9, %v837_v9  ;;  %v4003_v17 = vld [vmem:[%s4162_s17 + $0x548] sm:$0xff]  }
  0x82   : > { %3621 = vmatprep.subr.bf16.mxu1 %v3951_v18  ;;  %v861_v18 = vcombine.high %v851_v13, %v851_v13 }
  0x84   : > { %3600 = vmatpush3.bf16.msra.mxu0 %v3952_v19  ;;  %v4004_v19 = vld [vmem:[%s4162_s17 + $0x5c8] sm:$0xff]  }
  0x85   : > { %3601 = vmatprep.subr.bf16.mxu0 %v3954_v21  ;;  %3622 = vmatpush3.bf16.msra.mxu1 %v3953_v20  ;;  %v858_v20 = vrot.slane %v830_v15, %v4200_v35  ;;  %v4005_v21 = vld [vmem:[%s4162_s17 + $0x508] sm:$0xff]   ;;  %v4060_v15 = vld [vmem:[%s4162_s17 + $0x678] sm:$0xff]  }
  0x86   : > { %3623 = vmatprep.subr.bf16.mxu1 %v3955_v22  ;;  %v4006_v22 = vld [vmem:[%s4162_s17 + $0x588] sm:$0xff]  }
  0x88   : > { %3602 = vmatpush3.bf16.msra.mxu0 %v3956_v23  ;;  %v862_v23 = vcombine.high %v858_v20, %v858_v20 }
  0x89   : > { %3603 = vmatprep.subr.bf16.mxu0 %v3958_v25  ;;  %3624 = vmatpush3.bf16.msra.mxu1 %v3957_v24  ;;  %v4007_v24 = vld [vmem:[%s4162_s17 + $0x550] sm:$0xff]  }
  0x8a   : > { %3625 = vmatprep.subr.bf16.mxu1 %v3959_v26  ;;  %v4008_v25 = vld [vmem:[%s4162_s17 + $0x5d0] sm:$0xff]  }
  0x8b   : > { %v4009_v26 = vld [vmem:[%s4162_s17 + $0x510] sm:$0xff]  }
  0x8c   : > { %3604 = vmatpush3.bf16.msra.mxu0 %v3960_v27  ;;  %v4010_v27 = vld [vmem:[%s4162_s17 + $0x590] sm:$0xff]  }
  0x8d   : > { %3605 = vmatprep.subr.bf16.mxu0 %v3962_v29  ;;  %3626 = vmatpush3.bf16.msra.mxu1 %v3961_v28  ;;  %v4011_v28 = vld [vmem:[%s4162_s17 + $0x558] sm:$0xff]  }
  0x8e   : > { %3627 = vmatprep.subr.bf16.mxu1 %v3963_v30  ;;  %v4012_v29 = vld [vmem:[%s4162_s17 + $0x5d8] sm:$0xff]  }
  0x8f   : > { %v4013_v30 = vld [vmem:[%s4162_s17 + $0x518] sm:$0xff]  }
  0x90   : > { %3606 = vmatpush3.bf16.msra.mxu0 %v3964_v31  ;;  %v4014_v31 = vld [vmem:[%s4162_s17 + $0x598] sm:$0xff]  }
  0x91   : > { %3635 = vmatprep.subr.bf16.mxu0 %v3967_v34  ;;  %3628 = vmatpush3.bf16.msra.mxu1 %v3965_v32  ;;  %v4015_v32 = vld [vmem:[%s4162_s17 + $0x560] sm:$0xff]  }
  0x92   : > { %3657 = vmatprep.subr.bf16.mxu1 %v3968_v36  ;;  %v4017_v34 = vld [vmem:[%s4162_s17 + $0x520] sm:$0xff]  }
  0x93   : > { %2753 = vmatmul.mubr.bf16.vlgmr.msra.gmra.mrb[12].mxu0 %v795_v33  ;;  %v4016_v33 = vld [vmem:[%s4162_s17 + $0x5e0] sm:$0xff]  }
  0x94   : > { %3636 = vmatpush3.bf16.msra.mxu0 %v3969_v37  ;;  %2793 = vmatmul.mubr.bf16.vlgmr.msra.gmra.mrb[12].mxu1 %v811_v39  ;;  %v4018_v36 = vld [vmem:[%s4162_s17 + $0x5a0] sm:$0xff]   ;;  %v4019_v37 = vld [vmem:[%s4162_s17 + $0x568] sm:$0xff]  }
  0x95   : > { %3637 = vmatprep.subr.bf16.mxu0 %v3971_v40  ;;  %3658 = vmatpush3.bf16.msra.mxu1 %v3970_v38  ;;  %v4020_v38 = vld [vmem:[%s4162_s17 + $0x5e8] sm:$0xff]  }
  0x96   : > { %3659 = vmatprep.subr.bf16.mxu1 %v3972_v41  ;;  %2832 = vmatprep.mubr.bf16.mxu0 %v851_v13  ;;  %v4021_v39 = vld [vmem:[%s4162_s17 + $0x528] sm:$0xff]   ;;  %v4023_v41 = vld [vmem:[%s4162_s17 + $0x570] sm:$0xff]  }
  0x97   : > { %2872 = vmatprep.mubr.bf16.mxu1 %v861_v18  ;;  %v4022_v40 = vld [vmem:[%s4162_s17 + $0x5a8] sm:$0xff]   ;;  %v4058_v13 = vld [vmem:[%s4162_s17 + $0x630] sm:$0xff]   ;;  %v199_v18 = vld [vmem:[%s4198_s21 + $0x18] sm:$0xff] }
  0x98   : > { %3638 = vmatpush3.bf16.msra.mxu0 %v3973_v42  ;;  %v4024_v42 = vld [vmem:[%s4162_s17 + $0x5f0] sm:$0xff]  }
  0x99   : > { %3639 = vmatprep.subr.bf16.mxu0 %v3975_v44  ;;  %3660 = vmatpush3.bf16.msra.mxu1 %v3974_v43  ;;  %v4025_v43 = vld [vmem:[%s4162_s17 + $0x530] sm:$0xff]  }
  0x9a   : > { %3661 = vmatprep.subr.bf16.mxu1 %v3976_v45  ;;  %v4026_v44 = vld [vmem:[%s4162_s17 + $0x5b0] sm:$0xff]   ;;  %v4027_v45 = vld [vmem:[%s4162_s17 + $0x578] sm:$0xff]  }
  0x9c   : > { %3640 = vmatpush3.bf16.msra.mxu0 %v3977_v46  ;;  %v4028_v46 = vld [vmem:[%s4162_s17 + $0x5f8] sm:$0xff]  }
  0x9d   : > { %3641 = vmatprep.subr.bf16.mxu0 %v3979_v48  ;;  %3662 = vmatpush3.bf16.msra.mxu1 %v3978_v47  ;;  %v4029_v47 = vld [vmem:[%s4162_s17 + $0x538] sm:$0xff]  }
  0x9e   : > { %3663 = vmatprep.subr.bf16.mxu1 %v3980_v49  ;;  %v4030_v48 = vld [vmem:[%s4162_s17 + $0x5b8] sm:$0xff]   ;;  %v844_v49 = vrot.slane %v4362_v11, %v4200_v35  ;;  %v4056_v11 = vld [vmem:[%s4162_s17 + $0x670] sm:$0xff]  }
  0xa0   : > { %3642 = vmatpush3.bf16.msra.mxu0 %v3981_v50  ;;  %v4032_v50 = vld [vmem:[%s4162_s17 + $0x640] sm:$0xff]  }
  0xa1   : > { %3643 = vmatprep.subr.bf16.mxu0 %v3983_v52  ;;  %3664 = vmatpush3.bf16.msra.mxu1 %v3982_v51  ;;  %v4033_v51 = vld [vmem:[%s4162_s17 + $0x6c0] sm:$0xff]  }
  0xa2   : > { %3665 = vmatprep.subr.bf16.mxu1 %v3984_v53  ;;  %v4034_v52 = vld [vmem:[%s4162_s17 + $0x600] sm:$0xff]  }
  0xa3   : > { %v4035_v53 = vld [vmem:[%s4162_s17 + $0x680] sm:$0xff]  }
  0xa4   : > { %3644 = vmatpush3.bf16.msra.mxu0 %v3985_v54  ;;  %v860_v54 = vcombine.high %v844_v49, %v844_v49 }
  0xa5   : > { %3645 = vmatprep.subr.bf16.mxu0 %v3987_v56  ;;  %3666 = vmatpush3.bf16.msra.mxu1 %v3986_v55  ;;  %v4036_v55 = vld [vmem:[%s4162_s17 + $0x648] sm:$0xff]  }
  0xa6   : > { %3667 = vmatprep.subr.bf16.mxu1 %v3988_v57  ;;  %v4037_v56 = vld [vmem:[%s4162_s17 + $0x6c8] sm:$0xff]  }
  0xa7   : > { %v4038_v57 = vld [vmem:[%s4162_s17 + $0x608] sm:$0xff]  }
  0xa8   : > { %3646 = vmatpush3.bf16.msra.mxu0 %v3989_v58  ;;  %v4039_v58 = vld [vmem:[%s4162_s17 + $0x688] sm:$0xff]  }
  0xa9   : > { %3647 = vmatprep.subr.bf16.mxu0 %v3991_v60  ;;  %3668 = vmatpush3.bf16.msra.mxu1 %v3990_v59  ;;  %v4040_v59 = vld [vmem:[%s4162_s17 + $0x650] sm:$0xff]  }
  0xaa   : > { %3669 = vmatprep.subr.bf16.mxu1 %v3992_v61  ;;  %v4041_v60 = vld [vmem:[%s4162_s17 + $0x6d0] sm:$0xff]  }
  0xab   : > { %v4042_v61 = vld [vmem:[%s4162_s17 + $0x610] sm:$0xff]  }
  0xac   : > { %3648 = vmatpush3.bf16.msra.mxu0 %v3993_v62  ;;  %v4043_v62 = vld [vmem:[%s4162_s17 + $0x690] sm:$0xff]  }
  0xad   : > { %3649 = vmatprep.subr.bf16.mxu0 %v3995_v0  ;;  %3670 = vmatpush3.bf16.msra.mxu1 %v3994_v63  ;;  %v4044_v63 = vld [vmem:[%s4162_s17 + $0x658] sm:$0xff]  }
  0xae   : > { %3671 = vmatprep.subr.bf16.mxu1 %v3996_v1  ;;  %v4045_v0 = vld [vmem:[%s4162_s17 + $0x6d8] sm:$0xff]  }
  0xaf   : > { %v4046_v1 = vld [vmem:[%s4162_s17 + $0x618] sm:$0xff]  }
  0xb0   : > { %3650 = vmatpush3.bf16.msra.mxu0 %v3997_v2  ;;  %v4047_v2 = vld [vmem:[%s4162_s17 + $0x698] sm:$0xff]  }
  0xb1   : > { %3679 = vmatprep.subr.bf16.mxu0 %v3999_v7  ;;  %3672 = vmatpush3.bf16.msra.mxu1 %v3998_v4  ;;  %v4049_v4 = vld [vmem:[%s4162_s17 + $0x6e0] sm:$0xff]   ;;  %v4052_v7 = vld [vmem:[%s4162_s17 + $0x668] sm:$0xff]  }
  0xb2   : > { %3701 = vmatprep.subr.bf16.mxu1 %v4000_v10  ;;  %v4055_v10 = vld [vmem:[%s4162_s17 + $0x6a8] sm:$0xff]  }
  0xb3   : > { %2833 = vmatmul.mubr.bf16.vlgmr.msra.gmra.mrb[16].mxu0 %v837_v9  ;;  %v4054_v9 = vld [vmem:[%s4162_s17 + $0x628] sm:$0xff]  }
  0xb4   : > { %3680 = vmatpush3.bf16.msra.mxu0 %v4001_v12  ;;  %2873 = vmatmul.mubr.bf16.vlgmr.msra.gmra.mrb[16].mxu1 %v859_v16  ;;  %v4057_v12 = vld [vmem:[%s4162_s17 + $0x6f0] sm:$0xff]   ;;  %v4061_v16 = vld [vmem:[%s4162_s17 + $0x6f8] sm:$0xff]  }
  0xb5   : > { %3681 = vmatprep.subr.bf16.mxu0 %v4003_v17  ;;  %3702 = vmatpush3.bf16.msra.mxu1 %v4002_v14  ;;  %v4059_v14 = vld [vmem:[%s4162_s17 + $0x6b0] sm:$0xff]   ;;  %v4062_v17 = vld [vmem:[%s4162_s17 + $0x638] sm:$0xff]  }
  0xb6   : > { %2912 = vmatprep.mubr.bf16.mxu0 %v858_v20  ;;  %3703 = vmatprep.subr.bf16.mxu1 %v4004_v19  ;;  %v870_v19 = vrot.slane %v199_v18, %v4200_v35  ;;  %v4064_v20 = vld [vmem:[%s4162_s17 + $0x740] sm:$0xff]  }
  0xb7   : > { %2952 = vmatprep.mubr.bf16.mxu1 %v862_v23 }
  0xb8   : > { %3682 = vmatpush3.bf16.msra.mxu0 %v4005_v21  ;;  %v863_v21 = vcombine.high %v199_v18, %v199_v18  ;;  %v878_v23 = vcombine.high %v870_v19, %v870_v19 }
  0xb9   : > { %3683 = vmatprep.subr.bf16.mxu0 %v4007_v24  ;;  %3704 = vmatpush3.bf16.msra.mxu1 %v4006_v22  ;;  %v4063_v22 = vld [vmem:[%s4162_s17 + $0x6b8] sm:$0xff]   ;;  %v886_v24 = vrot.slane %v870_v19, %v4200_v35 }
  0xba   : > { %3705 = vmatprep.subr.bf16.mxu1 %v4008_v25  ;;  %v4065_v25 = vld [vmem:[%s4162_s17 + $0x7c0] sm:$0xff]  }
  0xbc   : > { %3684 = vmatpush3.bf16.msra.mxu0 %v4009_v26  ;;  %v4438_v26 = vrot.slane %v863_v21, %v4200_v35 }
  0xbd   : > { %3685 = vmatprep.subr.bf16.mxu0 %v4011_v28  ;;  %3706 = vmatpush3.bf16.msra.mxu1 %v4010_v27  ;;  %v900_v27 = vrot.slane %v878_v23, %v4200_v35  ;;  %v4066_v28 = vld [vmem:[%s4162_s17 + $0x700] sm:$0xff]  }
  0xbe   : > { %3707 = vmatprep.subr.bf16.mxu1 %v4012_v29  ;;  %v879_v29 = vcombine.high %v4438_v26, %v4438_v26 }
  0xc0   : > { %3686 = vmatpush3.bf16.msra.mxu0 %v4013_v30  ;;  %v908_v30 = vcombine.high %v886_v24, %v886_v24 }
  0xc1   : > { %3687 = vmatprep.subr.bf16.mxu0 %v4015_v32  ;;  %3708 = vmatpush3.bf16.msra.mxu1 %v4014_v31  ;;  %v4068_v31 = vld [vmem:[%s4162_s17 + $0x748] sm:$0xff]   ;;  %v910_v32 = vcombine.high %v900_v27, %v900_v27 }
  0xc2   : > { %3709 = vmatprep.subr.bf16.mxu1 %v4016_v33  ;;  %v4067_v33 = vld [vmem:[%s4162_s17 + $0x780] sm:$0xff]  }
  0xc4   : > { %3688 = vmatpush3.bf16.msra.mxu0 %v4017_v34  ;;  %v907_v34 = vrot.slane %v879_v29, %v4200_v35 }
  0xc5   : > { %3689 = vmatprep.subr.bf16.mxu0 %v4019_v37  ;;  %3710 = vmatpush3.bf16.msra.mxu1 %v4018_v36  ;;  %v4069_v36 = vld [vmem:[%s4162_s17 + $0x7c8] sm:$0xff]  }
  0xc6   : > { %3711 = vmatprep.subr.bf16.mxu1 %v4020_v38  ;;  %v4070_v37 = vld [vmem:[%s4162_s17 + $0x708] sm:$0xff]   ;;  %v911_v38 = vcombine.high %v907_v34, %v907_v34 }
  0xc8   : > { %3690 = vmatpush3.bf16.msra.mxu0 %v4021_v39  ;;  %v4072_v39 = vld [vmem:[%s4162_s17 + $0x750] sm:$0xff]  }
  0xc9   : > { %3691 = vmatprep.subr.bf16.mxu0 %v4023_v41  ;;  %3712 = vmatpush3.bf16.msra.mxu1 %v4022_v40  ;;  %v4071_v40 = vld [vmem:[%s4162_s17 + $0x788] sm:$0xff]   ;;  %v4073_v41 = vld [vmem:[%s4162_s17 + $0x7d0] sm:$0xff]  }
  0xca   : > { %3713 = vmatprep.subr.bf16.mxu1 %v4024_v42  ;;  %v4074_v42 = vld [vmem:[%s4162_s17 + $0x710] sm:$0xff]  }
  0xcc   : > { %3692 = vmatpush3.bf16.msra.mxu0 %v4025_v43  ;;  %v4076_v43 = vld [vmem:[%s4162_s17 + $0x758] sm:$0xff]  }
  0xcd   : > { %3693 = vmatprep.subr.bf16.mxu0 %v4027_v45  ;;  %3714 = vmatpush3.bf16.msra.mxu1 %v4026_v44  ;;  %v4075_v44 = vld [vmem:[%s4162_s17 + $0x790] sm:$0xff]   ;;  %v4077_v45 = vld [vmem:[%s4162_s17 + $0x7d8] sm:$0xff]  }
  0xce   : > { %3715 = vmatprep.subr.bf16.mxu1 %v4028_v46  ;;  %v4078_v46 = vld [vmem:[%s4162_s17 + $0x718] sm:$0xff]  }
  0xd0   : > { %3694 = vmatpush3.bf16.msra.mxu0 %v4029_v47  ;;  %v4080_v47 = vld [vmem:[%s4162_s17 + $0x760] sm:$0xff]  }
  0xd1   : > { %3723 = vmatprep.subr.bf16.mxu0 %v4032_v50  ;;  %3716 = vmatpush3.bf16.msra.mxu1 %v4030_v48  ;;  %v4079_v48 = vld [vmem:[%s4162_s17 + $0x798] sm:$0xff]   ;;  %v4082_v50 = vld [vmem:[%s4162_s17 + $0x720] sm:$0xff]  }
  0xd2   : > { %3745 = vmatprep.subr.bf16.mxu1 %v4033_v51  ;;  %v4084_v51 = vld [vmem:[%s4162_s17 + $0x768] sm:$0xff]  }
  0xd3   : > { %2913 = vmatmul.mubr.bf16.vlgmr.msra.gmra.mrb[20].mxu0 %v844_v49  ;;  %v4081_v49 = vld [vmem:[%s4162_s17 + $0x7e0] sm:$0xff]  }
  0xd4   : > { %3724 = vmatpush3.bf16.msra.mxu0 %v4034_v52  ;;  %2953 = vmatmul.mubr.bf16.vlgmr.msra.gmra.mrb[20].mxu1 %v860_v54  ;;  %v4083_v52 = vld [vmem:[%s4162_s17 + $0x7a0] sm:$0xff]   ;;  %v4086_v54 = vld [vmem:[%s4162_s17 + $0x728] sm:$0xff]  }
  0xd5   : > { %3725 = vmatprep.subr.bf16.mxu0 %v4036_v55  ;;  %3746 = vmatpush3.bf16.msra.mxu1 %v4035_v53  ;;  %v4085_v53 = vld [vmem:[%s4162_s17 + $0x7e8] sm:$0xff]  }
  0xd6   : > { %3747 = vmatprep.subr.bf16.mxu1 %v4037_v56  ;;  %2992 = vmatprep.mubr.bf16.mxu0 %v900_v27  ;;  %v4088_v56 = vld [vmem:[%s4162_s17 + $0x770] sm:$0xff]  }
  0xd7   : > { %3032 = vmatprep.mubr.bf16.mxu1 %v910_v32 }
  0xd8   : > { %3726 = vmatpush3.bf16.msra.mxu0 %v4038_v57 }
  0xd9   : > { %3727 = vmatprep.subr.bf16.mxu0 %v4040_v59  ;;  %3748 = vmatpush3.bf16.msra.mxu1 %v4039_v58  ;;  %v4087_v58 = vld [vmem:[%s4162_s17 + $0x7a8] sm:$0xff]  }
  0xda   : > { %3749 = vmatprep.subr.bf16.mxu1 %v4041_v60 }
  0xdc   : > { %3728 = vmatpush3.bf16.msra.mxu0 %v4042_v61 }
  0xdd   : > { %3729 = vmatprep.subr.bf16.mxu0 %v4044_v63  ;;  %3750 = vmatpush3.bf16.msra.mxu1 %v4043_v62  ;;  %v4089_v62 = vld [vmem:[%s4162_s17 + $0x7f0] sm:$0xff]  }
  0xde   : > { %3751 = vmatprep.subr.bf16.mxu1 %v4045_v0  ;;  %v4090_v63 = vld [vmem:[%s4162_s17 + $0x730] sm:$0xff]  }
  0xe0   : > { %3730 = vmatpush3.bf16.msra.mxu0 %v4046_v1 }
  0xe1   : > { %3731 = vmatprep.subr.bf16.mxu0 %v4048_v3  ;;  %3752 = vmatpush3.bf16.msra.mxu1 %v4047_v2 }
  0xe2   : > { %3753 = vmatprep.subr.bf16.mxu1 %v4049_v4  ;;  %v4092_v4 = vld [vmem:[%s4162_s17 + $0x778] sm:$0xff]  }
  0xe4   : > { %3732 = vmatpush3.bf16.msra.mxu0 %v4050_v5 }
  0xe5   : > { %3733 = vmatprep.subr.bf16.mxu0 %v4052_v7  ;;  %3754 = vmatpush3.bf16.msra.mxu1 %v4051_v6  ;;  %v4091_v6 = vld [vmem:[%s4162_s17 + $0x7b0] sm:$0xff]  }
  0xe6   : > { %3755 = vmatprep.subr.bf16.mxu1 %v4053_v8  ;;  %v4093_v8 = vld [vmem:[%s4162_s17 + $0x7f8] sm:$0xff]  }
  0xe8   : > { %3734 = vmatpush3.bf16.msra.mxu0 %v4054_v9  ;;  %v4094_v9 = vld [vmem:[%s4162_s17 + $0x738] sm:$0xff]  }
  0xe9   : > { %3735 = vmatprep.subr.bf16.mxu0 %v4056_v11  ;;  %3756 = vmatpush3.bf16.msra.mxu1 %v4055_v10  ;;  %v893_v10 = vrot.slane %v4438_v26, %v4200_v35  ;;  %v4095_v11 = vld [vmem:[%s4162_s17 + $0x7b8] sm:$0xff]  }
  0xea   : > { %3757 = vmatprep.subr.bf16.mxu1 %v4057_v12 }
  0xeb   : > { %v909_v12 = vcombine.high %v893_v10, %v893_v10 }
  0xec   : > { %3736 = vmatpush3.bf16.msra.mxu0 %v4058_v13 }
  0xed   : > { %3737 = vmatprep.subr.bf16.mxu0 %v4060_v15  ;;  %3758 = vmatpush3.bf16.msra.mxu1 %v4059_v14 }
  0xee   : > { %3759 = vmatprep.subr.bf16.mxu1 %v4061_v16 }
  0xf0   : > { %3738 = vmatpush3.bf16.msra.mxu0 %v4062_v17 }
  0xf1   : > { %3767 = vmatprep.subr.bf16.mxu0 %v4064_v20  ;;  %3760 = vmatpush3.bf16.msra.mxu1 %v4063_v22 }
  0xf2   : > { %3789 = vmatprep.subr.bf16.mxu1 %v4065_v25 }
  0xf3   : > { %2993 = vmatmul.mubr.bf16.vlgmr.msra.gmra.mrb[24].mxu0 %v886_v24 }
  0xf4   : > { %3768 = vmatpush3.bf16.msra.mxu0 %v4066_v28  ;;  %3033 = vmatmul.mubr.bf16.vlgmr.msra.gmra.mrb[24].mxu1 %v908_v30 }
  0xf5   : > { %3769 = vmatprep.subr.bf16.mxu0 %v4068_v31  ;;  %3790 = vmatpush3.bf16.msra.mxu1 %v4067_v33 }
  0xf6   : > { %3072 = vmatprep.mubr.bf16.mxu0 %v907_v34  ;;  %3791 = vmatprep.subr.bf16.mxu1 %v4069_v36 }
  0xf7   : > { %3112 = vmatprep.mubr.bf16.mxu1 %v911_v38 }
  0xf8   : > { %3770 = vmatpush3.bf16.msra.mxu0 %v4070_v37 }
  0xf9   : > { %3771 = vmatprep.subr.bf16.mxu0 %v4072_v39  ;;  %3792 = vmatpush3.bf16.msra.mxu1 %v4071_v40 }
  0xfa   : > { %3793 = vmatprep.subr.bf16.mxu1 %v4073_v41 }
  0xfc   : > { %3772 = vmatpush3.bf16.msra.mxu0 %v4074_v42 }
  0xfd   : > { %3773 = vmatprep.subr.bf16.mxu0 %v4076_v43  ;;  %3794 = vmatpush3.bf16.msra.mxu1 %v4075_v44  ;;  %v4122_v44 = vmov 0.0  }
  0xfe   : > { %3795 = vmatprep.subr.bf16.mxu1 %v4077_v45  ;;  %194 = vst [vmem:[%s4481_s25] sm:$0x3] %v4122_v44 }
 0x100   : > { %3774 = vmatpush3.bf16.msra.mxu0 %v4078_v46 }
 0x101   : > { %3775 = vmatprep.subr.bf16.mxu0 %v4080_v47  ;;  %3796 = vmatpush3.bf16.msra.mxu1 %v4079_v48 }
 0x102   : > { %3797 = vmatprep.subr.bf16.mxu1 %v4081_v49 }
 0x104   : > { %3776 = vmatpush3.bf16.msra.mxu0 %v4082_v50 }
 0x105   : > { %3777 = vmatprep.subr.bf16.mxu0 %v4084_v51  ;;  %3798 = vmatpush3.bf16.msra.mxu1 %v4083_v52 }
 0x106   : > { %v3475_v55 = vpop.f32.mrb[0].mxu0  ;;  %3799 = vmatprep.subr.bf16.mxu1 %v4085_v53 }
 0x107   : > { %v3476_v57 = vpop.f32.mrb[1].mxu0  ;;  %v3497_v59 = vpop.f32.mrb[0].mxu1 }
 0x108   : > { %v3477_v60 = vadd.f32 %v3476_v57, %v3475_v55  ;;  %v3478_v61 = vpop.f32.mrb[2].mxu0  ;;  %v3498_v0 = vpop.f32.mrb[1].mxu1  ;;  %3778 = vmatpush3.bf16.msra.mxu0 %v4086_v54 }
 0x109   : > { %v3479_v1 = vpop.f32.mrb[3].mxu0  ;;  %v3499_v2 = vadd.f32 %v3498_v0, %v3497_v59  ;;  %v3500_v3 = vpop.f32.mrb[2].mxu1  ;;  %3779 = vmatprep.subr.bf16.mxu0 %v4088_v56  ;;  %3800 = vmatpush3.bf16.msra.mxu1 %v4087_v58 }
 0x10a   : > { %v3501_v5 = vpop.f32.mrb[3].mxu1  ;;  %3801 = vmatprep.subr.bf16.mxu1 %v4089_v62 }
 0x10b   : > { %v2555_v7 = vadd.f32 %v3499_v2, %v3477_v60 }
 0x10c   : > { %3780 = vmatpush3.bf16.msra.mxu0 %v4090_v63 }
 0x10d   : > { %3781 = vmatprep.subr.bf16.mxu0 %v4092_v4  ;;  %3802 = vmatpush3.bf16.msra.mxu1 %v4091_v6 }
 0x10e   : > { %3803 = vmatprep.subr.bf16.mxu1 %v4093_v8 }
 0x110   : > { %3782 = vmatpush3.bf16.msra.mxu0 %v4094_v9 }
 0x111   : > { %3804 = vmatpush3.bf16.msra.mxu1 %v4095_v11 }
 0x113   : > { %3073 = vmatmul.mubr.bf16.vlgmr.msra.gmra.mrb[28].mxu0 %v893_v10 }
 0x114   : > { %3113 = vmatmul.mubr.bf16.vlgmr.msra.gmra.mrb[28].mxu1 %v909_v12 }
 0x126   : > { %v3519_v13 = vpop.f32.mrb[4].mxu0 }
 0x127   : > { %v3520_v14 = vpop.f32.mrb[5].mxu0  ;;  %v3541_v15 = vpop.f32.mrb[4].mxu1 }
 0x128   : > { %v3521_v16 = vadd.f32 %v3520_v14, %v3519_v13  ;;  %v3522_v17 = vpop.f32.mrb[6].mxu0  ;;  %v3542_v18 = vpop.f32.mrb[5].mxu1 }
 0x129   : > { %v3523_v19 = vpop.f32.mrb[7].mxu0  ;;  %v3543_v21 = vadd.f32 %v3542_v18, %v3541_v15  ;;  %v3544_v22 = vpop.f32.mrb[6].mxu1 }
 0x12a   : > { %v2595_v20 = vadd.f32 %v3521_v16, %v2555_v7  ;;  %v3545_v35 = vpop.f32.mrb[7].mxu1 }
 0x12c   : > { %v2635_v23 = vadd.f32 %v3543_v21, %v2595_v20 }
 0x146   : > { %v3563_v24 = vpop.f32.mrb[8].mxu0 }
 0x147   : > { %v3564_v25 = vpop.f32.mrb[9].mxu0  ;;  %v3585_v26 = vpop.f32.mrb[8].mxu1 }
 0x148   : > { %v3565_v27 = vadd.f32 %v3564_v25, %v3563_v24  ;;  %v3566_v28 = vpop.f32.mrb[10].mxu0  ;;  %v3586_v29 = vpop.f32.mrb[9].mxu1 }
 0x149   : > { %v3567_v30 = vpop.f32.mrb[11].mxu0  ;;  %v3587_v32 = vadd.f32 %v3586_v29, %v3585_v26  ;;  %v3588_v33 = vpop.f32.mrb[10].mxu1 }
 0x14a   : > { %v2675_v31 = vadd.f32 %v3565_v27, %v2635_v23  ;;  %v3589_v34 = vpop.f32.mrb[11].mxu1 }
 0x14c   : > { %v2715_v36 = vadd.f32 %v3587_v32, %v2675_v31  ;;  %v195_v31 = vld [vmem:[%s4481_s25] sm:$0x3] }
 0x166   : > { %v3607_v37 = vpop.f32.mrb[12].mxu0 }
 0x167   : > { %v3608_v38 = vpop.f32.mrb[13].mxu0  ;;  %v3629_v39 = vpop.f32.mrb[12].mxu1 }
 0x168   : > { %v3609_v40 = vadd.f32 %v3608_v38, %v3607_v37  ;;  %v3610_v41 = vpop.f32.mrb[14].mxu0  ;;  %v3630_v42 = vpop.f32.mrb[13].mxu1 }
 0x169   : > { %v3611_v43 = vpop.f32.mrb[15].mxu0  ;;  %v3631_v46 = vadd.f32 %v3630_v42, %v3629_v39  ;;  %v3632_v47 = vpop.f32.mrb[14].mxu1 }
 0x16a   : > { %v2755_v45 = vadd.f32 %v3609_v40, %v2715_v36  ;;  %v3633_v48 = vpop.f32.mrb[15].mxu1 }
 0x16c   : > { %v2795_v49 = vadd.f32 %v3631_v46, %v2755_v45 }
 0x186   : > { %v3651_v50 = vpop.f32.mrb[16].mxu0 }
 0x187   : > { %v3652_v51 = vpop.f32.mrb[17].mxu0  ;;  %v3673_v52 = vpop.f32.mrb[16].mxu1 }
 0x188   : > { %v3653_v53 = vadd.f32 %v3652_v51, %v3651_v50  ;;  %v3654_v54 = vpop.f32.mrb[18].mxu0  ;;  %v3674_v55 = vpop.f32.mrb[17].mxu1 }
 0x189   : > { %v3655_v56 = vpop.f32.mrb[19].mxu0  ;;  %v3675_v58 = vadd.f32 %v3674_v55, %v3673_v52  ;;  %v3676_v59 = vpop.f32.mrb[18].mxu1 }
 0x18a   : > { %v2835_v57 = vadd.f32 %v3653_v53, %v2795_v49  ;;  %v3677_v60 = vpop.f32.mrb[19].mxu1 }
 0x18c   : > { %v2875_v61 = vadd.f32 %v3675_v58, %v2835_v57 }
 0x1a6   : > { %v3695_v62 = vpop.f32.mrb[20].mxu0 }
 0x1a7   : > { %v3696_v63 = vpop.f32.mrb[21].mxu0  ;;  %v3717_v0 = vpop.f32.mrb[20].mxu1 }
 0x1a8   : > { %v3697_v1 = vadd.f32 %v3696_v63, %v3695_v62  ;;  %v3698_v2 = vpop.f32.mrb[22].mxu0  ;;  %v3718_v3 = vpop.f32.mrb[21].mxu1 }
 0x1a9   : > { %v3699_v4 = vpop.f32.mrb[23].mxu0  ;;  %v3719_v6 = vadd.f32 %v3718_v3, %v3717_v0  ;;  %v3720_v7 = vpop.f32.mrb[22].mxu1 }
 0x1aa   : > { %v2915_v5 = vadd.f32 %v3697_v1, %v2875_v61  ;;  %v3721_v8 = vpop.f32.mrb[23].mxu1 }
 0x1ac   : > { %v2955_v9 = vadd.f32 %v3719_v6, %v2915_v5 }
 0x1c6   : > { %v3739_v10 = vpop.f32.mrb[24].mxu0 }
 0x1c7   : > { %v3740_v11 = vpop.f32.mrb[25].mxu0  ;;  %v3761_v12 = vpop.f32.mrb[24].mxu1 }
 0x1c8   : > { %v3741_v13 = vadd.f32 %v3740_v11, %v3739_v10  ;;  %v3742_v14 = vpop.f32.mrb[26].mxu0  ;;  %v3762_v15 = vpop.f32.mrb[25].mxu1 }
 0x1c9   : > { %v3743_v16 = vpop.f32.mrb[27].mxu0  ;;  %v3763_v18 = vadd.f32 %v3762_v15, %v3761_v12  ;;  %v3764_v19 = vpop.f32.mrb[26].mxu1 }
 0x1ca   : > { %v2995_v17 = vadd.f32 %v3741_v13, %v2955_v9  ;;  %v3765_v20 = vpop.f32.mrb[27].mxu1 }
 0x1cc   : > { %v3035_v21 = vadd.f32 %v3763_v18, %v2995_v17 }
 0x1e6   : > { %v3783_v22 = vpop.f32.mrb[28].mxu0 }
 0x1e7   : > { %v3784_v35 = vpop.f32.mrb[29].mxu0  ;;  %v3805_v23 = vpop.f32.mrb[28].mxu1 }
 0x1e8   : > { %v3785_v24 = vadd.f32 %v3784_v35, %v3783_v22  ;;  %v3786_v25 = vpop.f32.mrb[30].mxu0  ;;  %v3806_v26 = vpop.f32.mrb[29].mxu1 }
 0x1e9   : > { %v3787_v27 = vpop.f32.mrb[31].mxu0  ;;  %v3807_v29 = vadd.f32 %v3806_v26, %v3805_v23  ;;  %v3808_v30 = vpop.f32.mrb[30].mxu1 }
 0x1ea   : > { %v3075_v28 = vadd.f32 %v3785_v24, %v3035_v21  ;;  %v3809_v32 = vpop.f32.mrb[31].mxu1 }
 0x1ec   : > { %v3115_v33 = vadd.f32 %v3807_v29, %v3075_v28 }
 0x1ee   : > { %v3120_v34 = vadd.f32 %v3115_v33, %v195_v31 }
 0x1f0   : > { %3121 = vst [vmem:[%s4481_s25] sm:$0x3] %v3120_v34 }
 0x1f1 PF: > { %s12_s11 = sadd.s32 1, %s4119_s11   ;;  %s4498_s9 = smov %s4115_s10 }
 0x1f2   : > { %p9_p7 = scmp.ge.s32.totalorder %s12_s11, 4   ;;  %s4499_s10 = smov %s4501_s12 }
 0x1f4   :  { %11 = sbr.rel (!%p9_p7) target bundleno = 2 (0x2), region = 65 }

</bundles_post_ra>
